<compile_context>
chip_gen: v7x
topology: tpu7x:2x2x1
jax: 0.10.0
libtpu: 0.0.40
codegen_flags: <defaults>
</compile_context>

<pallas_src>
import functools

import jax
import jax.numpy as jnp
from jax import lax
from jax.experimental import pallas as pl
from jax.experimental.pallas import tpu as pltpu


# ----------------------------------------------------------------------------
# small helpers
# ----------------------------------------------------------------------------
def _wspec(arr, grid_ndim):
    """Full-array block, constant index map (weight resident across the grid)."""
    zeros = (0,) * arr.ndim
    if grid_ndim == 2:
        return pl.BlockSpec(arr.shape, lambda b, t: zeros)
    return pl.BlockSpec(arr.shape, lambda b, s, t: zeros)


def _pick_tile(npts):
    # Prefer big tiles (per-grid-step overhead ~0.35us, deeper pipelining);
    # VMEM budget at tm=2048 stays well under the explicit 48 MiB limit.
    for t in (2048, 1024, 512, 256, 128):
        if npts % t == 0:
            return t
    return npts  # small / irregular point counts: one tile per batch


def _relu_bf16(v):
    return jnp.maximum(v, 0.0).astype(jnp.bfloat16)


def _dot(a, w_ref):
    return jnp.dot(a, w_ref[...], preferred_element_type=jnp.float32)


_VMEM_LIMIT = 48 * 1024 * 1024  # safe on v5e/v6e (128 MiB) and v7x (64 MiB)


# ----------------------------------------------------------------------------
# Kernel A: PointNet (3->64->128->512) fused with per-batch max-over-points
# ----------------------------------------------------------------------------
def _pnmax_kernel(x_ref, w1, b1, w2, b2, w3, b3, gmax_ref):
    t = pl.program_id(2)
    xt = x_ref[0]                                        # (tm, 3) f32
    p1 = _relu_bf16(_dot(xt, w1) + b1[...])              # (tm, 64)
    p2 = _relu_bf16(_dot(p1, w2) + b2[...])              # (tm, 128)
    p3 = _dot(p2, w3) + b3[...]                          # (tm, 512) f32, no act
    tile_max = jnp.max(p3, axis=0, keepdims=True).reshape(1, 1, 1, 512)

    @pl.when(t == 0)
    def _():
        gmax_ref[...] = jnp.full(gmax_ref.shape, -jnp.inf, dtype=gmax_ref.dtype)

    # NOTE: t axis must stay "arbitrary" and the output index map constant over
    # it (running-max accumulator).
    gmax_ref[...] = jnp.maximum(gmax_ref[...], tile_max)


def pointnet_global_max(params, x, tm):
    """x: (bs, npts, 3) f32 -> per-batch max of the 512-d PointNet feature."""
    bs, npts, _ = x.shape
    nt = npts // tm
    # Split the point axis into a parallel half so both v7x TensorCores are
    # used even at bs=1 (no effect on single-TC v5e/v6e).
    ns = 2 if (nt >= 2 and nt % 2 == 0) else 1
    ntp = nt // ns
    w1, b1 = params["pn1"]
    w2, b2 = params["pn2"]
    w3, b3 = params["pn3"]
    weights = [w1, b1, w2, b2, w3, b3]
    out = pl.pallas_call(
        _pnmax_kernel,
        out_shape=jax.ShapeDtypeStruct((bs, ns, 1, 512), jnp.float32),
        grid=(bs, ns, ntp),
        in_specs=[pl.BlockSpec((1, tm, 3), lambda b, s, t: (b, s * ntp + t, 0))]
                 + [_wspec(w, 3) for w in weights],
        out_specs=pl.BlockSpec((1, 1, 1, 512), lambda b, s, t: (b, s, 0, 0)),
        compiler_params=pltpu.CompilerParams(
            dimension_semantics=("parallel", "parallel", "arbitrary"),
            vmem_limit_bytes=_VMEM_LIMIT),
    )(x, *weights)
    return jnp.max(out, axis=1).reshape(bs, 512)        # combine partial maxes


# ----------------------------------------------------------------------------
# Kernel B: fused per-point pipeline + merged lane-dense heads
# ----------------------------------------------------------------------------
def _fused_kernel(xin_ref, gb_ref,
                  w_in, b_in, w_rgb, b_rgb, w_pe, w_e2,
                  w_s2, b_s2, w_s3, b_s3, w_k2, b_k2, w_k3, b_k3,
                  w_h, b_h, out_ref, *, num_obj, num_kps):
    xin = xin_ref[0]                                     # (tm, 8) f32: [x|pix|0,0]

    # Fused K=3 input layers (block-diagonal weight): pe = [p1(64) | e1(32)].
    pe = jnp.maximum(_dot(xin, w_in) + b_in[...], 0.0)   # (tm, 96) f32
    pe_bf = pe.astype(jnp.bfloat16)

    # rgb embedding 32->256; weight rows for the p1 lanes are zero so pe can be
    # fed directly (no interior lane slice needed).
    e2 = _relu_bf16(_dot(pe_bf, w_rgb) + b_rgb[...])     # (tm, 256)

    gb = gb_ref[0]                                       # (1, 1024) f32: gfeat fold + bias

    # Merged cf_seg|cf_kp first layer (864->512 twice, N-merged to 1024):
    # 3 dots into one (tm, 1024) accumulator, one relu, slice at lane 512.
    h = _dot(pe_bf, w_pe) + _dot(e2, w_e2) + gb          # (tm, 1024) f32
    h = _relu_bf16(h)
    h_seg = h[:, :512]                                   # 128-lane boundary slices
    h_kp = h[:, 512:]

    f_seg = _relu_bf16(_dot(_relu_bf16(_dot(h_seg, w_s2) + b_s2[...]), w_s3)
                       + b_s3[...])                      # (tm, 128)
    f_kp = _relu_bf16(_dot(_relu_bf16(_dot(h_kp, w_k2) + b_k2[...]), w_k3)
                      + b_k3[...])                       # (tm, 128)

    # Merged heads: single K=256 push into one lane-dense slab [seg|kp|c|nm|pad].
    f_cat = jnp.concatenate([f_seg, f_kp], axis=-1)      # (tm, 256), lane-boundary concat
    y = _dot(f_cat, w_h) + b_h[...]                      # (tm, HEADW) f32

    # Epilogue: log_softmax (seg lanes) / sigmoid (conf lanes) blended in-vreg
    # with iota masks, then ONE full-width lane-dense store.
    lane = lax.broadcasted_iota(jnp.int32, y.shape, 1)
    seg_in = lane < num_obj
    seg_m = jnp.where(seg_in, y, -jnp.inf)
    mx = jnp.max(seg_m, axis=-1, keepdims=True)
    lse = mx + jnp.log(jnp.sum(jnp.exp(seg_m - mx), axis=-1, keepdims=True))
    # (log_softmax applied twice in the reference == once; it is idempotent)

    c_off = num_obj + num_kps * 3
    conf_in = (lane >= c_off) & (lane < c_off + num_kps)
    conf = pl.reciprocal(1.0 + jnp.exp(-jnp.clip(y, -30.0, 30.0)), approx=True)

    y = jnp.where(seg_in, y - lse, y)
    y = jnp.where(conf_in, conf, y)
    out_ref[0] = y.astype(out_ref.dtype)


def fused_point_head(params, xin, gb, tm, num_obj, num_kps):
    bs, npts, _ = xin.shape
    nt = npts // tm
    head_w = params["b_h"].shape[1]
    weights = [
        params["w_in"], params["b_in"], params["w_rgb"], params["b_rgb"],
        params["w_pe"], params["w_e2"],
        *params["s2"], *params["s3"], *params["k2"], *params["k3"],
        params["w_h"], params["b_h"],
    ]
    in_specs = [
        pl.BlockSpec((1, tm, 8), lambda b, t: (b, t, 0)),
        pl.BlockSpec((1, 1, 1024), lambda b, t: (b, 0, 0)),
    ] + [_wspec(w, 2) for w in weights]
    return pl.pallas_call(
        functools.partial(_fused_kernel, num_obj=num_obj, num_kps=num_kps),
        out_shape=jax.ShapeDtypeStruct((bs, npts, head_w), jnp.float32),
        grid=(bs, nt),
        in_specs=in_specs,
        out_specs=pl.BlockSpec((1, tm, head_w), lambda b, t: (b, t, 0)),
        compiler_params=pltpu.CompilerParams(
            dimension_semantics=("parallel", "parallel"),
            vmem_limit_bytes=_VMEM_LIMIT),
    )(xin, gb, *weights)


# ----------------------------------------------------------------------------
# Deterministic parameter construction (synthetic, not a checkpoint)
# ----------------------------------------------------------------------------
def _conv_wb(key, cin, cout):
    kw, kb = jax.random.split(key)
    w = jax.random.normal(kw, (cout, cin), jnp.float32) / jnp.sqrt(float(cin))
    b = 0.01 * jax.random.normal(kb, (cout,), jnp.float32)
    return w, b


def _conv_plain(key, cin, cout):
    w, b = _conv_wb(key, cin, cout)
    return w.T, b                                   # (cin, cout), (cout,)


def _conv_bn_folded(key, cin, cout, eps=1e-5):
    """Conv1d(cin, cout, 1) + BatchNorm1d(cout) in eval mode, folded."""
    k1, kg, kb, km, kv = jax.random.split(key, 5)
    w, b = _conv_wb(k1, cin, cout)
    gamma = 1.0 + 0.1 * jax.random.normal(kg, (cout,), jnp.float32)
    beta = 0.01 * jax.random.normal(kb, (cout,), jnp.float32)
    mean = 0.01 * jax.random.normal(km, (cout,), jnp.float32)
    var = 0.5 + jax.random.uniform(kv, (cout,), jnp.float32)
    s = gamma / jnp.sqrt(var + eps)
    w_f = w * s[:, None]
    b_f = s * (b - mean) + beta
    return w_f.T, b_f                               # (cin, cout), (cout,)


def init_params(key, num_obj, num_kps):
    keys = jax.random.split(key, 16)
    bf16 = jnp.bfloat16
    p = {}

    # raw per-layer weights
    w_cnn, b_cnn = _conv_plain(keys[0], 3, 32)          # PSPNet stand-in 3->32
    w_rgb, b_rgb = _conv_bn_folded(keys[1], 32, 256)    # rgb_emb_conv1 + bn1
    w_pn1, b_pn1 = _conv_bn_folded(keys[2], 3, 64)      # PointNet 3->64
    w_pn2, b_pn2 = _conv_bn_folded(keys[3], 64, 128)
    w_pn3, b_pn3 = _conv_bn_folded(keys[4], 128, 512)

    # Kernel A (PointNet + global max) weights.  K=3 layer stays f32.
    p["pn1"] = (w_pn1, b_pn1.reshape(1, -1))
    p["pn2"] = (w_pn2.astype(bf16), b_pn2.reshape(1, -1))
    p["pn3"] = (w_pn3.astype(bf16), b_pn3.reshape(1, -1))

    # Fused K=3 input layer: xin=[x(3)|pix(3)|0,0] -> pe=[p1(64)|e1(32)].
    w_in = jnp.zeros((8, 96), jnp.float32)
    w_in = w_in.at[0:3, 0:64].set(w_pn1)
    w_in = w_in.at[3:6, 64:96].set(w_cnn)
    p["w_in"] = w_in
    p["b_in"] = jnp.concatenate([b_pn1, b_cnn]).reshape(1, 96)

    # rgb embedding 32->256, extended to K=96 with zero rows for the p1 lanes
    # so it can consume pe directly (avoids an interior lane slice).
    w_rgb96 = jnp.zeros((96, 256), jnp.float32).at[64:96, :].set(w_rgb)
    p["w_rgb"] = w_rgb96.astype(bf16)
    p["b_rgb"] = b_rgb.reshape(1, -1)

    # ConvFeat first layers (864->512), cf_seg|cf_kp merged along N (->1024).
    # rgbd_emb row order: [gfeat 0:512 | p1 512:576 | e1 576:608 | e2 608:864].
    w_s1, b_s1 = _conv_bn_folded(keys[5], 864, 512)
    w_k1, b_k1 = _conv_bn_folded(keys[8], 864, 512)
    p["w_g"] = jnp.concatenate([w_s1[0:512], w_k1[0:512]], axis=1)   # (512,1024) f32 fold
    p["b_g"] = jnp.concatenate([b_s1, b_k1]).reshape(1, 1024)
    w_pe = jnp.concatenate(
        [jnp.concatenate([w_s1[512:576], w_k1[512:576]], axis=1),    # p1 rows (64,1024)
         jnp.concatenate([w_s1[576:608], w_k1[576:608]], axis=1)],   # e1 rows (32,1024)
        axis=0)
    p["w_pe"] = w_pe.astype(bf16)                                    # (96, 1024)
    p["w_e2"] = jnp.concatenate([w_s1[608:864], w_k1[608:864]], axis=1).astype(bf16)

    w_s2, b_s2 = _conv_bn_folded(keys[6], 512, 256)
    w_s3, b_s3 = _conv_bn_folded(keys[7], 256, 128)
    w_k2, b_k2 = _conv_bn_folded(keys[9], 512, 256)
    w_k3, b_k3 = _conv_bn_folded(keys[10], 256, 128)
    p["s2"] = (w_s2.astype(bf16), b_s2.reshape(1, -1))
    p["s3"] = (w_s3.astype(bf16), b_s3.reshape(1, -1))
    p["k2"] = (w_k2.astype(bf16), b_k2.reshape(1, -1))
    p["k3"] = (w_k3.astype(bf16), b_k3.reshape(1, -1))

    # Heads merged along K: f_cat=[f_seg|f_kp] (256) -> [seg|kp|c|nm|pad].
    ws, bseg = _conv_plain(keys[11], 128, num_obj)
    wk, bkp = _conv_plain(keys[12], 128, num_kps * 3)
    wc, bc = _conv_plain(keys[13], 128, num_kps)
    wn, bnm = _conv_plain(keys[14], 128, 3)
    total = num_obj + num_kps * 4 + 3
    head_w = ((total + 127) // 128) * 128
    o_kp = num_obj
    o_c = num_obj + num_kps * 3
    o_nm = o_c + num_kps
    w_h = jnp.zeros((256, head_w), jnp.float32)
    w_h = w_h.at[0:128, 0:num_obj].set(ws)                # f_seg -> seg logits
    w_h = w_h.at[128:256, o_kp:o_kp + num_kps * 3].set(wk)  # f_kp -> kp
    w_h = w_h.at[128:256, o_c:o_c + num_kps].set(wc)        # f_kp -> conf
    w_h = w_h.at[128:256, o_nm:o_nm + 3].set(wn)            # f_kp -> normals
    b_h = jnp.zeros((head_w,), jnp.float32)
    b_h = b_h.at[:num_obj].set(bseg)
    b_h = b_h.at[o_kp:o_kp + num_kps * 3].set(bkp)
    b_h = b_h.at[o_c:o_c + num_kps].set(bc)
    b_h = b_h.at[o_nm:o_nm + 3].set(bnm)
    p["w_h"] = w_h.astype(bf16)
    p["b_h"] = b_h.reshape(1, head_w)
    return p


# ----------------------------------------------------------------------------
# Forward pass
# ----------------------------------------------------------------------------
def sgkpnet_forward(params, img, x, choose, *, num_obj, num_kps):
    bs, _, H, W = img.shape
    npts = x.shape[1]

    # Gather the chosen pixels.  The CNN stand-in is a per-pixel 1x1 conv, so
    # conv and gather commute and the conv runs inside the fused kernel.
    img_rows = jnp.transpose(img, (0, 2, 3, 1)).reshape(bs, H * W, 3)
    idx = choose[:, 0, :].astype(jnp.int32)
    pix = jnp.take_along_axis(img_rows, idx[:, :, None], axis=1)   # (bs, npts, 3)

    x = x.astype(jnp.float32)
    pix = pix.astype(jnp.float32)
    # Packed (bs, npts, 8) input for the fused K=3 layers: [x | pix | 0 | 0].
    xin = jnp.concatenate([x, pix, jnp.zeros((bs, npts, 2), jnp.float32)], axis=-1)

    tm = _pick_tile(npts)

    # PointNet global feature (pn1->pn2->pn3 fused with the per-batch max).
    gmax = pointnet_global_max(params, x, tm)                      # (bs, 512) f32

    # Fold the per-batch global feature + cf_{seg,kp}1 biases into one
    # per-batch (1, 1024) bias for the merged first layer.
    gb = (jnp.dot(gmax, params["w_g"]) + params["b_g"]).reshape(bs, 1, 1024)

    # Fused per-point pipeline + merged lane-dense heads.
    out = fused_point_head(params, xin, gb, tm, num_obj, num_kps)

    nk3 = num_kps * 3
    c_off = num_obj + nk3
    x_seg = out[:, :, :num_obj]                                    # already log_softmax'd
    x_kp = out[:, :, num_obj:c_off].reshape(bs, npts, num_kps, 3).transpose(0, 2, 1, 3)
    x_c = out[:, :, c_off:c_off + num_kps].transpose(0, 2, 1)[..., None]
    # x_nm lanes are computed in-kernel but not returned (matches the reference forward)
    trans, trans_feat = None, None   # TODO(synk): STN of ModifiedPointNetfeat not provided
    return x_seg, x_kp, x_c, trans, trans_feat


# ----------------------------------------------------------------------------
# main
# ----------------------------------------------------------------------------
if __name__ == "__main__":
    bs, H, W = 2, 16, 16
    num_points, num_obj, num_kps = 128, 8, 4

    key = jax.random.PRNGKey(0)
    k_img, k_x, k_ch, k_par = jax.random.split(key, 4)

    img = jax.random.normal(k_img, (bs, 3, H, W), jnp.float32)           # NCHW
    x = jax.random.normal(k_x, (bs, num_points, 3), jnp.float32)         # points
    choose = jax.random.randint(k_ch, (bs, 1, num_points), 0, H * W, jnp.int32)

    params = init_params(k_par, num_obj, num_kps)

    fwd = jax.jit(functools.partial(sgkpnet_forward, num_obj=num_obj, num_kps=num_kps))
    x_seg, x_kp, x_c, trans, trans_feat = fwd(params, img, x, choose)
    jax.block_until_ready((x_seg, x_kp, x_c))

    assert x_seg.shape == (bs, num_points, num_obj)
    assert x_kp.shape == (bs, num_kps, num_points, 3)
    assert x_c.shape == (bs, num_kps, num_points, 1)
    assert trans is None and trans_feat is None
    print("KERNEL_OK")
</pallas_src>

<mosaic_0001>
module attributes {stable_mosaic.version = 11 : i64} {
  func.func @_fused_kernel(%arg0: i32, %arg1: i32, %arg2: memref<1x128x8xf32, #tpu.memory_space<vmem>>, %arg3: memref<1x1x1024xf32, #tpu.memory_space<vmem>>, %arg4: memref<8x96xf32, #tpu.memory_space<vmem>>, %arg5: memref<1x96xf32, #tpu.memory_space<vmem>>, %arg6: memref<96x256xbf16, #tpu.memory_space<vmem>>, %arg7: memref<1x256xf32, #tpu.memory_space<vmem>>, %arg8: memref<96x1024xbf16, #tpu.memory_space<vmem>>, %arg9: memref<256x1024xbf16, #tpu.memory_space<vmem>>, %arg10: memref<512x256xbf16, #tpu.memory_space<vmem>>, %arg11: memref<1x256xf32, #tpu.memory_space<vmem>>, %arg12: memref<256x128xbf16, #tpu.memory_space<vmem>>, %arg13: memref<1x128xf32, #tpu.memory_space<vmem>>, %arg14: memref<512x256xbf16, #tpu.memory_space<vmem>>, %arg15: memref<1x256xf32, #tpu.memory_space<vmem>>, %arg16: memref<256x128xbf16, #tpu.memory_space<vmem>>, %arg17: memref<1x128xf32, #tpu.memory_space<vmem>>, %arg18: memref<256x128xbf16, #tpu.memory_space<vmem>>, %arg19: memref<1x128xf32, #tpu.memory_space<vmem>>, %arg20: memref<1x128x128xf32, #tpu.memory_space<vmem>>) attributes {dimension_semantics = [#tpu.dimension_semantics<parallel>, #tpu.dimension_semantics<parallel>], iteration_bounds = array<i64: 2, 1>, scalar_prefetch = 0 : i64, scratch_operands = 0 : i64, tpu.core_type = #tpu.core_type<tc>, window_params = [{transform_indices = @transform_0, window_bounds = array<i64: 1, 128, 8>}, {transform_indices = @transform_1, window_bounds = array<i64: 1, 1, 1024>}, {pipeline_mode = #tpu.pipeline_mode<synchronous>, transform_indices = @transform_2, window_bounds = array<i64: 8, 96>}, {pipeline_mode = #tpu.pipeline_mode<synchronous>, transform_indices = @transform_3, window_bounds = array<i64: 1, 96>}, {pipeline_mode = #tpu.pipeline_mode<synchronous>, transform_indices = @transform_4, window_bounds = array<i64: 96, 256>}, {pipeline_mode = #tpu.pipeline_mode<synchronous>, transform_indices = @transform_5, window_bounds = array<i64: 1, 256>}, {pipeline_mode = #tpu.pipeline_mode<synchronous>, transform_indices = @transform_6, window_bounds = array<i64: 96, 1024>}, {pipeline_mode = #tpu.pipeline_mode<synchronous>, transform_indices = @transform_7, window_bounds = array<i64: 256, 1024>}, {pipeline_mode = #tpu.pipeline_mode<synchronous>, transform_indices = @transform_8, window_bounds = array<i64: 512, 256>}, {pipeline_mode = #tpu.pipeline_mode<synchronous>, transform_indices = @transform_9, window_bounds = array<i64: 1, 256>}, {pipeline_mode = #tpu.pipeline_mode<synchronous>, transform_indices = @transform_10, window_bounds = array<i64: 256, 128>}, {pipeline_mode = #tpu.pipeline_mode<synchronous>, transform_indices = @transform_11, window_bounds = array<i64: 1, 128>}, {pipeline_mode = #tpu.pipeline_mode<synchronous>, transform_indices = @transform_12, window_bounds = array<i64: 512, 256>}, {pipeline_mode = #tpu.pipeline_mode<synchronous>, transform_indices = @transform_13, window_bounds = array<i64: 1, 256>}, {pipeline_mode = #tpu.pipeline_mode<synchronous>, transform_indices = @transform_14, window_bounds = array<i64: 256, 128>}, {pipeline_mode = #tpu.pipeline_mode<synchronous>, transform_indices = @transform_15, window_bounds = array<i64: 1, 128>}, {pipeline_mode = #tpu.pipeline_mode<synchronous>, transform_indices = @transform_16, window_bounds = array<i64: 256, 128>}, {pipeline_mode = #tpu.pipeline_mode<synchronous>, transform_indices = @transform_17, window_bounds = array<i64: 1, 128>}, {transform_indices = @transform_18, window_bounds = array<i64: 1, 128, 128>}]} {
    %c0 = arith.constant 0 : index
    %c0_0 = arith.constant 0 : index
    %c0_1 = arith.constant 0 : index
    %0 = vector.load %arg2[%c0, %c0_0, %c0_1] : memref<1x128x8xf32, #tpu.memory_space<vmem>>, vector<1x128x8xf32>
    %1 = vector.shape_cast %0 : vector<1x128x8xf32> to vector<128x8xf32>
    %c0_2 = arith.constant 0 : index
    %c0_3 = arith.constant 0 : index
    %2 = vector.load %arg4[%c0_2, %c0_3] : memref<8x96xf32, #tpu.memory_space<vmem>>, vector<8x96xf32>
    %cst = arith.constant dense<0.000000e+00> : vector<128x96xf32>
    %3 = tpu.matmul %1, %2, %cst {dimension_numbers = #tpu.dot_dimension_numbers<[1], [0], [0], [1], [0, 0, 1, 1], [], []>} : vector<128x8xf32>, vector<8x96xf32>, vector<128x96xf32> -> vector<128x96xf32>
    %c0_4 = arith.constant 0 : index
    %c0_5 = arith.constant 0 : index
    %4 = vector.load %arg5[%c0_4, %c0_5] : memref<1x96xf32, #tpu.memory_space<vmem>>, vector<1x96xf32>
    %5 = vector.broadcast %4 : vector<1x96xf32> to vector<128x96xf32>
    %6 = arith.addf %3, %5 : vector<128x96xf32>
    %cst_6 = arith.constant 0.000000e+00 : f32
    %7 = vector.broadcast %cst_6 : f32 to vector<128x96xf32>
    %8 = arith.maximumf %6, %7 : vector<128x96xf32>
    %9 = arith.truncf %8 : vector<128x96xf32> to vector<128x96xbf16>
    %c0_7 = arith.constant 0 : index
    %c0_8 = arith.constant 0 : index
    %10 = vector.load %arg6[%c0_7, %c0_8] : memref<96x256xbf16, #tpu.memory_space<vmem>>, vector<96x256xbf16>
    %cst_9 = arith.constant dense<0.000000e+00> : vector<128x256xf32>
    %11 = tpu.matmul %9, %10, %cst_9 {dimension_numbers = #tpu.dot_dimension_numbers<[1], [0], [0], [1], [0, 0, 1, 1], [], []>} : vector<128x96xbf16>, vector<96x256xbf16>, vector<128x256xf32> -> vector<128x256xf32>
    %c0_10 = arith.constant 0 : index
    %c0_11 = arith.constant 0 : index
    %12 = vector.load %arg7[%c0_10, %c0_11] : memref<1x256xf32, #tpu.memory_space<vmem>>, vector<1x256xf32>
    %13 = vector.broadcast %12 : vector<1x256xf32> to vector<128x256xf32>
    %14 = arith.addf %11, %13 : vector<128x256xf32>
    %cst_12 = arith.constant 0.000000e+00 : f32
    %15 = vector.broadcast %cst_12 : f32 to vector<128x256xf32>
    %16 = arith.maximumf %14, %15 : vector<128x256xf32>
    %17 = arith.truncf %16 : vector<128x256xf32> to vector<128x256xbf16>
    %c0_13 = arith.constant 0 : index
    %c0_14 = arith.constant 0 : index
    %c0_15 = arith.constant 0 : index
    %18 = vector.load %arg3[%c0_13, %c0_14, %c0_15] : memref<1x1x1024xf32, #tpu.memory_space<vmem>>, vector<1x1x1024xf32>
    %19 = vector.shape_cast %18 : vector<1x1x1024xf32> to vector<1x1024xf32>
    %c0_16 = arith.constant 0 : index
    %c0_17 = arith.constant 0 : index
    %20 = vector.load %arg8[%c0_16, %c0_17] : memref<96x1024xbf16, #tpu.memory_space<vmem>>, vector<96x1024xbf16>
    %cst_18 = arith.constant dense<0.000000e+00> : vector<128x1024xf32>
    %21 = tpu.matmul %9, %20, %cst_18 {dimension_numbers = #tpu.dot_dimension_numbers<[1], [0], [0], [1], [0, 0, 1, 1], [], []>} : vector<128x96xbf16>, vector<96x1024xbf16>, vector<128x1024xf32> -> vector<128x1024xf32>
    %c0_19 = arith.constant 0 : index
    %c0_20 = arith.constant 0 : index
    %22 = vector.load %arg9[%c0_19, %c0_20] : memref<256x1024xbf16, #tpu.memory_space<vmem>>, vector<256x1024xbf16>
    %cst_21 = arith.constant dense<0.000000e+00> : vector<128x1024xf32>
    %23 = tpu.matmul %17, %22, %cst_21 {dimension_numbers = #tpu.dot_dimension_numbers<[1], [0], [0], [1], [0, 0, 1, 1], [], []>} : vector<128x256xbf16>, vector<256x1024xbf16>, vector<128x1024xf32> -> vector<128x1024xf32>
    %24 = arith.addf %21, %23 : vector<128x1024xf32>
    %25 = vector.broadcast %19 : vector<1x1024xf32> to vector<128x1024xf32>
    %26 = arith.addf %24, %25 : vector<128x1024xf32>
    %cst_22 = arith.constant 0.000000e+00 : f32
    %27 = vector.broadcast %cst_22 : f32 to vector<128x1024xf32>
    %28 = arith.maximumf %26, %27 : vector<128x1024xf32>
    %29 = arith.truncf %28 : vector<128x1024xf32> to vector<128x1024xbf16>
    %30 = vector.extract_strided_slice %29 {offsets = [0, 0], sizes = [128, 512], strides = [1, 1]} : vector<128x1024xbf16> to vector<128x512xbf16>
    %31 = vector.extract_strided_slice %29 {offsets = [0, 512], sizes = [128, 512], strides = [1, 1]} : vector<128x1024xbf16> to vector<128x512xbf16>
    %c0_23 = arith.constant 0 : index
    %c0_24 = arith.constant 0 : index
    %32 = vector.load %arg10[%c0_23, %c0_24] : memref<512x256xbf16, #tpu.memory_space<vmem>>, vector<512x256xbf16>
    %cst_25 = arith.constant dense<0.000000e+00> : vector<128x256xf32>
    %33 = tpu.matmul %30, %32, %cst_25 {dimension_numbers = #tpu.dot_dimension_numbers<[1], [0], [0], [1], [0, 0, 1, 1], [], []>} : vector<128x512xbf16>, vector<512x256xbf16>, vector<128x256xf32> -> vector<128x256xf32>
    %c0_26 = arith.constant 0 : index
    %c0_27 = arith.constant 0 : index
    %34 = vector.load %arg11[%c0_26, %c0_27] : memref<1x256xf32, #tpu.memory_space<vmem>>, vector<1x256xf32>
    %35 = vector.broadcast %34 : vector<1x256xf32> to vector<128x256xf32>
    %36 = arith.addf %33, %35 : vector<128x256xf32>
    %cst_28 = arith.constant 0.000000e+00 : f32
    %37 = vector.broadcast %cst_28 : f32 to vector<128x256xf32>
    %38 = arith.maximumf %36, %37 : vector<128x256xf32>
    %39 = arith.truncf %38 : vector<128x256xf32> to vector<128x256xbf16>
    %c0_29 = arith.constant 0 : index
    %c0_30 = arith.constant 0 : index
    %40 = vector.load %arg12[%c0_29, %c0_30] : memref<256x128xbf16, #tpu.memory_space<vmem>>, vector<256x128xbf16>
    %cst_31 = arith.constant dense<0.000000e+00> : vector<128x128xf32>
    %41 = tpu.matmul %39, %40, %cst_31 {dimension_numbers = #tpu.dot_dimension_numbers<[1], [0], [0], [1], [0, 0, 1, 1], [], []>} : vector<128x256xbf16>, vector<256x128xbf16>, vector<128x128xf32> -> vector<128x128xf32>
    %c0_32 = arith.constant 0 : index
    %c0_33 = arith.constant 0 : index
    %42 = vector.load %arg13[%c0_32, %c0_33] : memref<1x128xf32, #tpu.memory_space<vmem>>, vector<1x128xf32>
    %43 = vector.broadcast %42 : vector<1x128xf32> to vector<128x128xf32>
    %44 = arith.addf %41, %43 : vector<128x128xf32>
    %cst_34 = arith.constant 0.000000e+00 : f32
    %45 = vector.broadcast %cst_34 : f32 to vector<128x128xf32>
    %46 = arith.maximumf %44, %45 : vector<128x128xf32>
    %47 = arith.truncf %46 : vector<128x128xf32> to vector<128x128xbf16>
    %c0_35 = arith.constant 0 : index
    %c0_36 = arith.constant 0 : index
    %48 = vector.load %arg14[%c0_35, %c0_36] : memref<512x256xbf16, #tpu.memory_space<vmem>>, vector<512x256xbf16>
    %cst_37 = arith.constant dense<0.000000e+00> : vector<128x256xf32>
    %49 = tpu.matmul %31, %48, %cst_37 {dimension_numbers = #tpu.dot_dimension_numbers<[1], [0], [0], [1], [0, 0, 1, 1], [], []>} : vector<128x512xbf16>, vector<512x256xbf16>, vector<128x256xf32> -> vector<128x256xf32>
    %c0_38 = arith.constant 0 : index
    %c0_39 = arith.constant 0 : index
    %50 = vector.load %arg15[%c0_38, %c0_39] : memref<1x256xf32, #tpu.memory_space<vmem>>, vector<1x256xf32>
    %51 = vector.broadcast %50 : vector<1x256xf32> to vector<128x256xf32>
    %52 = arith.addf %49, %51 : vector<128x256xf32>
    %cst_40 = arith.constant 0.000000e+00 : f32
    %53 = vector.broadcast %cst_40 : f32 to vector<128x256xf32>
    %54 = arith.maximumf %52, %53 : vector<128x256xf32>
    %55 = arith.truncf %54 : vector<128x256xf32> to vector<128x256xbf16>
    %c0_41 = arith.constant 0 : index
    %c0_42 = arith.constant 0 : index
    %56 = vector.load %arg16[%c0_41, %c0_42] : memref<256x128xbf16, #tpu.memory_space<vmem>>, vector<256x128xbf16>
    %cst_43 = arith.constant dense<0.000000e+00> : vector<128x128xf32>
    %57 = tpu.matmul %55, %56, %cst_43 {dimension_numbers = #tpu.dot_dimension_numbers<[1], [0], [0], [1], [0, 0, 1, 1], [], []>} : vector<128x256xbf16>, vector<256x128xbf16>, vector<128x128xf32> -> vector<128x128xf32>
    %c0_44 = arith.constant 0 : index
    %c0_45 = arith.constant 0 : index
    %58 = vector.load %arg17[%c0_44, %c0_45] : memref<1x128xf32, #tpu.memory_space<vmem>>, vector<1x128xf32>
    %59 = vector.broadcast %58 : vector<1x128xf32> to vector<128x128xf32>
    %60 = arith.addf %57, %59 : vector<128x128xf32>
    %cst_46 = arith.constant 0.000000e+00 : f32
    %61 = vector.broadcast %cst_46 : f32 to vector<128x128xf32>
    %62 = arith.maximumf %60, %61 : vector<128x128xf32>
    %63 = arith.truncf %62 : vector<128x128xf32> to vector<128x128xbf16>
    %64 = tpu.concatenate %47, %63 in 1 : vector<128x128xbf16>, vector<128x128xbf16> -> vector<128x256xbf16>
    %c0_47 = arith.constant 0 : index
    %c0_48 = arith.constant 0 : index
    %65 = vector.load %arg18[%c0_47, %c0_48] : memref<256x128xbf16, #tpu.memory_space<vmem>>, vector<256x128xbf16>
    %cst_49 = arith.constant dense<0.000000e+00> : vector<128x128xf32>
    %66 = tpu.matmul %64, %65, %cst_49 {dimension_numbers = #tpu.dot_dimension_numbers<[1], [0], [0], [1], [0, 0, 1, 1], [], []>} : vector<128x256xbf16>, vector<256x128xbf16>, vector<128x128xf32> -> vector<128x128xf32>
    %c0_50 = arith.constant 0 : index
    %c0_51 = arith.constant 0 : index
    %67 = vector.load %arg19[%c0_50, %c0_51] : memref<1x128xf32, #tpu.memory_space<vmem>>, vector<1x128xf32>
    %68 = vector.broadcast %67 : vector<1x128xf32> to vector<128x128xf32>
    %69 = arith.addf %66, %68 : vector<128x128xf32>
    %70 = tpu.iota {dimensions = array<i32: 1>} : vector<128x128xi32>
    %c8_i32 = arith.constant 8 : i32
    %71 = vector.broadcast %c8_i32 : i32 to vector<128x128xi32>
    %72 = arith.cmpi slt, %70, %71 : vector<128x128xi32>
    %cst_52 = arith.constant 0xFF800000 : f32
    %73 = vector.broadcast %cst_52 : f32 to vector<128x128xf32>
    %74 = arith.select %72, %69, %73 : vector<128x128xi1>, vector<128x128xf32>
    %cst_53 = arith.constant dense<0xFF800000> : vector<128xf32>
    %75 = vector.multi_reduction <maximumf>, %74, %cst_53 [1] : vector<128x128xf32> to vector<128xf32>
    %76 = vector.shape_cast %75 : vector<128xf32> to vector<128x1xf32>
    %77 = vector.broadcast %76 : vector<128x1xf32> to vector<128x128xf32>
    %78 = arith.subf %74, %77 : vector<128x128xf32>
    %79 = math.exp %78 : vector<128x128xf32>
    %cst_54 = arith.constant dense<0.000000e+00> : vector<128xf32>
    %80 = vector.multi_reduction <add>, %79, %cst_54 [1] : vector<128x128xf32> to vector<128xf32>
    %81 = vector.shape_cast %80 : vector<128xf32> to vector<128x1xf32>
    %82 = math.log %81 : vector<128x1xf32>
    %83 = arith.addf %76, %82 : vector<128x1xf32>
    %c20_i32 = arith.constant 20 : i32
    %84 = vector.broadcast %c20_i32 : i32 to vector<128x128xi32>
    %85 = arith.cmpi sge, %70, %84 : vector<128x128xi32>
    %c24_i32 = arith.constant 24 : i32
    %86 = vector.broadcast %c24_i32 : i32 to vector<128x128xi32>
    %87 = arith.cmpi slt, %70, %86 : vector<128x128xi32>
    %88 = arith.andi %85, %87 : vector<128x128xi1>
    %cst_55 = arith.constant -3.000000e+01 : f32
    %cst_56 = arith.constant 3.000000e+01 : f32
    %89 = vector.broadcast %cst_55 : f32 to vector<128x128xf32>
    %90 = arith.maximumf %89, %69 : vector<128x128xf32>
    %91 = vector.broadcast %cst_56 : f32 to vector<128x128xf32>
    %92 = arith.minimumf %91, %90 : vector<128x128xf32>
    %cst_57 = arith.constant 0.000000e+00 : f32
    %93 = vector.broadcast %cst_57 : f32 to vector<128x128xf32>
    %94 = arith.subf %93, %92 : vector<128x128xf32>
    %95 = math.exp %94 : vector<128x128xf32>
    %cst_58 = arith.constant 1.000000e+00 : f32
    %96 = vector.broadcast %cst_58 : f32 to vector<128x128xf32>
    %97 = arith.addf %96, %95 : vector<128x128xf32>
    %98 = tpu.reciprocal %97 {approx = true} : vector<128x128xf32> -> vector<128x128xf32>
    %99 = vector.broadcast %83 : vector<128x1xf32> to vector<128x128xf32>
    %100 = arith.subf %69, %99 : vector<128x128xf32>
    %101 = arith.select %72, %100, %69 : vector<128x128xi1>, vector<128x128xf32>
    %102 = arith.select %88, %98, %101 : vector<128x128xi1>, vector<128x128xf32>
    %c0_59 = arith.constant 0 : index
    %c0_60 = arith.constant 0 : index
    %c0_61 = arith.constant 0 : index
    %103 = vector.load %arg20[%c0_59, %c0_60, %c0_61] : memref<1x128x128xf32, #tpu.memory_space<vmem>>, vector<1x128x128xf32>
    %104 = vector.shape_cast %103 : vector<1x128x128xf32> to vector<128x128xf32>
    %105 = vector.shape_cast %102 : vector<128x128xf32> to vector<1x128x128xf32>
    tpu.vector_store %arg20[%c0_59, %c0_60, %c0_61], %105 {strides = array<i32>} : memref<1x128x128xf32, #tpu.memory_space<vmem>>, vector<1x128x128xf32>,
    return
  }
  func.func @transform_0(%arg0: i32, %arg1: i32) -> (i32, i32, i32) {
    %c0_i32 = arith.constant 0 : i32
    %c0_i32_0 = arith.constant 0 : i32
    return %arg0, %arg1, %c0_i32 : i32, i32, i32
  }
  func.func @transform_1(%arg0: i32, %arg1: i32) -> (i32, i32, i32) {
    %c0_i32 = arith.constant 0 : i32
    %c0_i32_0 = arith.constant 0 : i32
    %c0_i32_1 = arith.constant 0 : i32
    return %arg0, %c0_i32, %c0_i32_0 : i32, i32, i32
  }
  func.func @transform_2(%arg0: i32, %arg1: i32) -> (i32, i32) {
    %c0_i32 = arith.constant 0 : i32
    %c0_i32_0 = arith.constant 0 : i32
    %c0_i32_1 = arith.constant 0 : i32
    return %c0_i32, %c0_i32_0 : i32, i32
  }
  func.func @transform_3(%arg0: i32, %arg1: i32) -> (i32, i32) {
    %c0_i32 = arith.constant 0 : i32
    %c0_i32_0 = arith.constant 0 : i32
    %c0_i32_1 = arith.constant 0 : i32
    return %c0_i32, %c0_i32_0 : i32, i32
  }
  func.func @transform_4(%arg0: i32, %arg1: i32) -> (i32, i32) {
    %c0_i32 = arith.constant 0 : i32
    %c0_i32_0 = arith.constant 0 : i32
    %c0_i32_1 = arith.constant 0 : i32
    return %c0_i32, %c0_i32_0 : i32, i32
  }
  func.func @transform_5(%arg0: i32, %arg1: i32) -> (i32, i32) {
    %c0_i32 = arith.constant 0 : i32
    %c0_i32_0 = arith.constant 0 : i32
    %c0_i32_1 = arith.constant 0 : i32
    return %c0_i32, %c0_i32_0 : i32, i32
  }
  func.func @transform_6(%arg0: i32, %arg1: i32) -> (i32, i32) {
    %c0_i32 = arith.constant 0 : i32
    %c0_i32_0 = arith.constant 0 : i32
    %c0_i32_1 = arith.constant 0 : i32
    return %c0_i32, %c0_i32_0 : i32, i32
  }
  func.func @transform_7(%arg0: i32, %arg1: i32) -> (i32, i32) {
    %c0_i32 = arith.constant 0 : i32
    %c0_i32_0 = arith.constant 0 : i32
    %c0_i32_1 = arith.constant 0 : i32
    return %c0_i32, %c0_i32_0 : i32, i32
  }
  func.func @transform_8(%arg0: i32, %arg1: i32) -> (i32, i32) {
    %c0_i32 = arith.constant 0 : i32
    %c0_i32_0 = arith.constant 0 : i32
    %c0_i32_1 = arith.constant 0 : i32
    return %c0_i32, %c0_i32_0 : i32, i32
  }
  func.func @transform_9(%arg0: i32, %arg1: i32) -> (i32, i32) {
    %c0_i32 = arith.constant 0 : i32
    %c0_i32_0 = arith.constant 0 : i32
    %c0_i32_1 = arith.constant 0 : i32
    return %c0_i32, %c0_i32_0 : i32, i32
  }
  func.func @transform_10(%arg0: i32, %arg1: i32) -> (i32, i32) {
    %c0_i32 = arith.constant 0 : i32
    %c0_i32_0 = arith.constant 0 : i32
    %c0_i32_1 = arith.constant 0 : i32
    return %c0_i32, %c0_i32_0 : i32, i32
  }
  func.func @transform_11(%arg0: i32, %arg1: i32) -> (i32, i32) {
    %c0_i32 = arith.constant 0 : i32
    %c0_i32_0 = arith.constant 0 : i32
    %c0_i32_1 = arith.constant 0 : i32
    return %c0_i32, %c0_i32_0 : i32, i32
  }
  func.func @transform_12(%arg0: i32, %arg1: i32) -> (i32, i32) {
    %c0_i32 = arith.constant 0 : i32
    %c0_i32_0 = arith.constant 0 : i32
    %c0_i32_1 = arith.constant 0 : i32
    return %c0_i32, %c0_i32_0 : i32, i32
  }
  func.func @transform_13(%arg0: i32, %arg1: i32) -> (i32, i32) {
    %c0_i32 = arith.constant 0 : i32
    %c0_i32_0 = arith.constant 0 : i32
    %c0_i32_1 = arith.constant 0 : i32
    return %c0_i32, %c0_i32_0 : i32, i32
  }
  func.func @transform_14(%arg0: i32, %arg1: i32) -> (i32, i32) {
    %c0_i32 = arith.constant 0 : i32
    %c0_i32_0 = arith.constant 0 : i32
    %c0_i32_1 = arith.constant 0 : i32
    return %c0_i32, %c0_i32_0 : i32, i32
  }
  func.func @transform_15(%arg0: i32, %arg1: i32) -> (i32, i32) {
    %c0_i32 = arith.constant 0 : i32
    %c0_i32_0 = arith.constant 0 : i32
    %c0_i32_1 = arith.constant 0 : i32
    return %c0_i32, %c0_i32_0 : i32, i32
  }
  func.func @transform_16(%arg0: i32, %arg1: i32) -> (i32, i32) {
    %c0_i32 = arith.constant 0 : i32
    %c0_i32_0 = arith.constant 0 : i32
    %c0_i32_1 = arith.constant 0 : i32
    return %c0_i32, %c0_i32_0 : i32, i32
  }
  func.func @transform_17(%arg0: i32, %arg1: i32) -> (i32, i32) {
    %c0_i32 = arith.constant 0 : i32
    %c0_i32_0 = arith.constant 0 : i32
    %c0_i32_1 = arith.constant 0 : i32
    return %c0_i32, %c0_i32_0 : i32, i32
  }
  func.func @transform_18(%arg0: i32, %arg1: i32) -> (i32, i32, i32) {
    %c0_i32 = arith.constant 0 : i32
    %c0_i32_0 = arith.constant 0 : i32
    return %arg0, %arg1, %c0_i32 : i32, i32, i32
  }
}

module attributes {stable_mosaic.version = 11 : i64} {
  func.func @_pnmax_kernel(%arg0: i32, %arg1: i32, %arg2: i32, %arg3: memref<1x128x3xf32, #tpu.memory_space<vmem>>, %arg4: memref<3x64xf32, #tpu.memory_space<vmem>>, %arg5: memref<1x64xf32, #tpu.memory_space<vmem>>, %arg6: memref<64x128xbf16, #tpu.memory_space<vmem>>, %arg7: memref<1x128xf32, #tpu.memory_space<vmem>>, %arg8: memref<128x512xbf16, #tpu.memory_space<vmem>>, %arg9: memref<1x512xf32, #tpu.memory_space<vmem>>, %arg10: memref<1x1x1x512xf32, #tpu.memory_space<vmem>>) attributes {dimension_semantics = [#tpu.dimension_semantics<parallel>, #tpu.dimension_semantics<parallel>, #tpu.dimension_semantics<arbitrary>], iteration_bounds = array<i64: 2, 1, 1>, scalar_prefetch = 0 : i64, scratch_operands = 0 : i64, tpu.core_type = #tpu.core_type<tc>, window_params = [{transform_indices = @transform_0, window_bounds = array<i64: 1, 128, 3>}, {pipeline_mode = #tpu.pipeline_mode<synchronous>, transform_indices = @transform_1, window_bounds = array<i64: 3, 64>}, {pipeline_mode = #tpu.pipeline_mode<synchronous>, transform_indices = @transform_2, window_bounds = array<i64: 1, 64>}, {pipeline_mode = #tpu.pipeline_mode<synchronous>, transform_indices = @transform_3, window_bounds = array<i64: 64, 128>}, {pipeline_mode = #tpu.pipeline_mode<synchronous>, transform_indices = @transform_4, window_bounds = array<i64: 1, 128>}, {pipeline_mode = #tpu.pipeline_mode<synchronous>, transform_indices = @transform_5, window_bounds = array<i64: 128, 512>}, {pipeline_mode = #tpu.pipeline_mode<synchronous>, transform_indices = @transform_6, window_bounds = array<i64: 1, 512>}, {transform_indices = @transform_7, window_bounds = array<i64: 1, 1, 1, 512>}]} {
    %c0 = arith.constant 0 : index
    %c0_0 = arith.constant 0 : index
    %c0_1 = arith.constant 0 : index
    %0 = vector.load %arg3[%c0, %c0_0, %c0_1] : memref<1x128x3xf32, #tpu.memory_space<vmem>>, vector<1x128x3xf32>
    %1 = vector.shape_cast %0 : vector<1x128x3xf32> to vector<128x3xf32>
    %c0_2 = arith.constant 0 : index
    %c0_3 = arith.constant 0 : index
    %2 = vector.load %arg4[%c0_2, %c0_3] : memref<3x64xf32, #tpu.memory_space<vmem>>, vector<3x64xf32>
    %cst = arith.constant dense<0.000000e+00> : vector<128x64xf32>
    %3 = tpu.matmul %1, %2, %cst {dimension_numbers = #tpu.dot_dimension_numbers<[1], [0], [0], [1], [0, 0, 1, 1], [], []>} : vector<128x3xf32>, vector<3x64xf32>, vector<128x64xf32> -> vector<128x64xf32>
    %c0_4 = arith.constant 0 : index
    %c0_5 = arith.constant 0 : index
    %4 = vector.load %arg5[%c0_4, %c0_5] : memref<1x64xf32, #tpu.memory_space<vmem>>, vector<1x64xf32>
    %5 = vector.broadcast %4 : vector<1x64xf32> to vector<128x64xf32>
    %6 = arith.addf %3, %5 : vector<128x64xf32>
    %cst_6 = arith.constant 0.000000e+00 : f32
    %7 = vector.broadcast %cst_6 : f32 to vector<128x64xf32>
    %8 = arith.maximumf %6, %7 : vector<128x64xf32>
    %9 = arith.truncf %8 : vector<128x64xf32> to vector<128x64xbf16>
    %c0_7 = arith.constant 0 : index
    %c0_8 = arith.constant 0 : index
    %10 = vector.load %arg6[%c0_7, %c0_8] : memref<64x128xbf16, #tpu.memory_space<vmem>>, vector<64x128xbf16>
    %cst_9 = arith.constant dense<0.000000e+00> : vector<128x128xf32>
    %11 = tpu.matmul %9, %10, %cst_9 {dimension_numbers = #tpu.dot_dimension_numbers<[1], [0], [0], [1], [0, 0, 1, 1], [], []>} : vector<128x64xbf16>, vector<64x128xbf16>, vector<128x128xf32> -> vector<128x128xf32>
    %c0_10 = arith.constant 0 : index
    %c0_11 = arith.constant 0 : index
    %12 = vector.load %arg7[%c0_10, %c0_11] : memref<1x128xf32, #tpu.memory_space<vmem>>, vector<1x128xf32>
    %13 = vector.broadcast %12 : vector<1x128xf32> to vector<128x128xf32>
    %14 = arith.addf %11, %13 : vector<128x128xf32>
    %cst_12 = arith.constant 0.000000e+00 : f32
    %15 = vector.broadcast %cst_12 : f32 to vector<128x128xf32>
    %16 = arith.maximumf %14, %15 : vector<128x128xf32>
    %17 = arith.truncf %16 : vector<128x128xf32> to vector<128x128xbf16>
    %c0_13 = arith.constant 0 : index
    %c0_14 = arith.constant 0 : index
    %18 = vector.load %arg8[%c0_13, %c0_14] : memref<128x512xbf16, #tpu.memory_space<vmem>>, vector<128x512xbf16>
    %cst_15 = arith.constant dense<0.000000e+00> : vector<128x512xf32>
    %19 = tpu.matmul %17, %18, %cst_15 {dimension_numbers = #tpu.dot_dimension_numbers<[1], [0], [0], [1], [0, 0, 1, 1], [], []>} : vector<128x128xbf16>, vector<128x512xbf16>, vector<128x512xf32> -> vector<128x512xf32>
    %c0_16 = arith.constant 0 : index
    %c0_17 = arith.constant 0 : index
    %20 = vector.load %arg9[%c0_16, %c0_17] : memref<1x512xf32, #tpu.memory_space<vmem>>, vector<1x512xf32>
    %21 = vector.broadcast %20 : vector<1x512xf32> to vector<128x512xf32>
    %22 = arith.addf %19, %21 : vector<128x512xf32>
    %cst_18 = arith.constant dense<0xFF800000> : vector<512xf32>
    %23 = vector.multi_reduction <maximumf>, %22, %cst_18 [0] : vector<128x512xf32> to vector<512xf32>
    %24 = vector.shape_cast %23 : vector<512xf32> to vector<1x512xf32>
    %25 = vector.shape_cast %24 : vector<1x512xf32> to vector<1x1x1x512xf32>
    %c0_i32 = arith.constant 0 : i32
    %26 = arith.cmpi eq, %arg2, %c0_i32 : i32
    %27 = arith.extui %26 : i1 to i32
    %c0_i32_19 = arith.constant 0 : i32
    %28 = arith.cmpi ne, %27, %c0_i32_19 : i32
    scf.if %28 {
      %cst_28 = arith.constant 0xFF800000 : f32
      %32 = vector.broadcast %cst_28 : f32 to vector<1x1x1x512xf32>
      %c0_29 = arith.constant 0 : index
      %c0_30 = arith.constant 0 : index
      %c0_31 = arith.constant 0 : index
      %c0_32 = arith.constant 0 : index
      %33 = vector.load %arg10[%c0_29, %c0_30, %c0_31, %c0_32] : memref<1x1x1x512xf32, #tpu.memory_space<vmem>>, vector<1x1x1x512xf32>
      tpu.vector_store %arg10[%c0_29, %c0_30, %c0_31, %c0_32], %32 {strides = array<i32>} : memref<1x1x1x512xf32, #tpu.memory_space<vmem>>, vector<1x1x1x512xf32>,
    } else {
    }
    %c0_20 = arith.constant 0 : index
    %c0_21 = arith.constant 0 : index
    %c0_22 = arith.constant 0 : index
    %c0_23 = arith.constant 0 : index
    %29 = vector.load %arg10[%c0_20, %c0_21, %c0_22, %c0_23] : memref<1x1x1x512xf32, #tpu.memory_space<vmem>>, vector<1x1x1x512xf32>
    %30 = arith.maximumf %29, %25 : vector<1x1x1x512xf32>
    %c0_24 = arith.constant 0 : index
    %c0_25 = arith.constant 0 : index
    %c0_26 = arith.constant 0 : index
    %c0_27 = arith.constant 0 : index
    %31 = vector.load %arg10[%c0_24, %c0_25, %c0_26, %c0_27] : memref<1x1x1x512xf32, #tpu.memory_space<vmem>>, vector<1x1x1x512xf32>
    tpu.vector_store %arg10[%c0_24, %c0_25, %c0_26, %c0_27], %30 {strides = array<i32>} : memref<1x1x1x512xf32, #tpu.memory_space<vmem>>, vector<1x1x1x512xf32>,
    return
  }
  func.func @transform_0(%arg0: i32, %arg1: i32, %arg2: i32) -> (i32, i32, i32) {
    %c1_i32 = arith.constant 1 : i32
    %0 = arith.muli %arg1, %c1_i32 : i32
    %1 = arith.addi %0, %arg2 : i32
    %c0_i32 = arith.constant 0 : i32
    %c0_i32_0 = arith.constant 0 : i32
    return %arg0, %1, %c0_i32 : i32, i32, i32
  }
  func.func @transform_1(%arg0: i32, %arg1: i32, %arg2: i32) -> (i32, i32) {
    %c0_i32 = arith.constant 0 : i32
    %c0_i32_0 = arith.constant 0 : i32
    %c0_i32_1 = arith.constant 0 : i32
    return %c0_i32, %c0_i32_0 : i32, i32
  }
  func.func @transform_2(%arg0: i32, %arg1: i32, %arg2: i32) -> (i32, i32) {
    %c0_i32 = arith.constant 0 : i32
    %c0_i32_0 = arith.constant 0 : i32
    %c0_i32_1 = arith.constant 0 : i32
    return %c0_i32, %c0_i32_0 : i32, i32
  }
  func.func @transform_3(%arg0: i32, %arg1: i32, %arg2: i32) -> (i32, i32) {
    %c0_i32 = arith.constant 0 : i32
    %c0_i32_0 = arith.constant 0 : i32
    %c0_i32_1 = arith.constant 0 : i32
    return %c0_i32, %c0_i32_0 : i32, i32
  }
  func.func @transform_4(%arg0: i32, %arg1: i32, %arg2: i32) -> (i32, i32) {
    %c0_i32 = arith.constant 0 : i32
    %c0_i32_0 = arith.constant 0 : i32
    %c0_i32_1 = arith.constant 0 : i32
    return %c0_i32, %c0_i32_0 : i32, i32
  }
  func.func @transform_5(%arg0: i32, %arg1: i32, %arg2: i32) -> (i32, i32) {
    %c0_i32 = arith.constant 0 : i32
    %c0_i32_0 = arith.constant 0 : i32
    %c0_i32_1 = arith.constant 0 : i32
    return %c0_i32, %c0_i32_0 : i32, i32
  }
  func.func @transform_6(%arg0: i32, %arg1: i32, %arg2: i32) -> (i32, i32) {
    %c0_i32 = arith.constant 0 : i32
    %c0_i32_0 = arith.constant 0 : i32
    %c0_i32_1 = arith.constant 0 : i32
    return %c0_i32, %c0_i32_0 : i32, i32
  }
  func.func @transform_7(%arg0: i32, %arg1: i32, %arg2: i32) -> (i32, i32, i32, i32) {
    %c0_i32 = arith.constant 0 : i32
    %c0_i32_0 = arith.constant 0 : i32
    %c0_i32_1 = arith.constant 0 : i32
    return %arg0, %arg1, %c0_i32, %c0_i32_0 : i32, i32, i32, i32
  }
}

</mosaic_0001>

<bundles_post_ra>
// kernel: sgkpnet_forward.2
= control target key start
LH: loop header
LB: loop body
LE: loop exit
PB: predicated region body
PF: predicated region fallthrough
CT: control target
= control target key end

     0   :  { %s1715_s24 = smov 0   ;;  %s1717_s25 = smov 0   ;;  %s2058_s0 = inlined_call_operand.vmem [shape: f32[2,128,3], index: 0, kind: input, shape index: {}]   ;;  %s2059_s1 = inlined_call_operand.vmem [shape: f32[3,64], index: 1, kind: input, shape index: {}]   ;;  %s2060_s2 = inlined_call_operand.vmem [shape: f32[1,64], index: 2, kind: input, shape index: {}]   ;;  %s2061_s3 = inlined_call_operand.vmem [shape: bf16[64,128], index: 3, kind: input, shape index: {}]   ;;  %s2062_s4 = inlined_call_operand.vmem [shape: f32[1,128], index: 4, kind: input, shape index: {}]   ;;  %s2063_s5 = inlined_call_operand.vmem [shape: bf16[128,512], index: 5, kind: input, shape index: {}]   ;;  %s2064_s6 = inlined_call_operand.vmem [shape: f32[1,512], index: 6, kind: input, shape index: {}]   ;;  %s2065_s7 = inlined_call_operand.vmem [shape: f32[2,1,1,512], index: 7, kind: output, shape index: {}]  }
   0x1   :  { %s1719_s26 = smov 0  }
   0x2 LB: > { %s36_s27 = sadd.s32 1, %s1666_s25  ;;  %p1420_p0 = scmp.ge.s32.totalorder %s1670_s26, 1  ;;  %s1670_s26 = sphi %s1719_s26, %s17_s26   ;;  %s1666_s25 = sphi %s1717_s25, %s2069_s25   ;;  %s1662_s24 = sphi %s1715_s24, %s2068_s24  }
   0x3   : > { %p38_p1 = scmp.ge.s32.totalorder %s36_s27, 2  ;;  %p269_p2 = scmp.lt.s32.totalorder %s1670_s26, 3 }
   0x5   : > { %s2071_s27 = smov (%p38_p1, %s36_s27), 0  ;;  %p270_p3 = pnand %p1420_p0, %p269_p2 }
   0x6   : > { %v346_v0 = vld [vmem:[%s2059_s1] sm:$0x7] (!%p270_p3)  ;;  %vm403_vm0 = vcmask (!%p270_p3), 1042432   ;;  %p311_p4 = scmp.lt.s32.totalorder (!%p270_p3), %s1662_s24, 1  ;;  %vm354_vm1 = vcmask (!%p270_p3), 23552   ;;  %v1597_v18 = vld [vmem:[%s2061_s3 + $0x8] sm:$0xff] (!%p270_p3)  }
   0x7   : > { %273 = sbr.rel (%p270_p3) target bundleno = 761 (0x2f9), region = 48  ;;  %v1596_v1 = vld [vmem:[%s2061_s3] sm:$0xff] (!%p270_p3)   ;;  %1519 = vmatprep.subr.msk.mxu0 (!%p270_p3), %vm403_vm0, %v346_v0  ;;  %v1598_v19 = vld [vmem:[%s2061_s3 + $0x10] sm:$0xff] (!%p270_p3)   ;;  %v1599_v20 = vld [vmem:[%s2061_s3 + $0x18] sm:$0xff] (!%p270_p3)   ;;  %vm615_vm2 = vcmask (!%p270_p3), 523264  }
   0x8   : > { %1520 = vmatpush3.msk.msra.mxu0 (!%p270_p3), %vm403_vm0, %v346_v0  ;;  %1545 = vmatprep.subr.bf16.mxu1 (!%p270_p3), %v1596_v1  ;;  %v1600_v21 = vld [vmem:[%s2063_s5] ss:$16 sps:$4 sm:$0xff] (!%p270_p3)   ;;  %v1602_v22 = vld [vmem:[%s2063_s5 + $0x4] ss:$16 sps:$4 sm:$0xff] (!%p270_p3)   ;;  %v1605_v23 = vld [vmem:[%s2063_s5 + $0xc] ss:$16 sps:$4 sm:$0xff] (!%p270_p3)  }
   0x9   : > { %1546 = vmatpush3.bf16.msra.mxu1 (!%p270_p3), %v1596_v1  ;;  %v1608_v24 = vld [vmem:[%s2063_s5 + $0x24] ss:$16 sps:$4 sm:$0xff] (!%p270_p3)   ;;  %975 = vmatprep.subr.bf16.mxu0 (!%p270_p3), %v1602_v22  ;;  %v1606_v25 = vld [vmem:[%s2063_s5 + $0x20] ss:$16 sps:$4 sm:$0xff] (!%p270_p3)   ;;  %v1603_v51 = vld [vmem:[%s2063_s5 + $0x8] ss:$16 sps:$4 sm:$0xff] (!%p270_p3)  }
   0xa   : > { %1547 = vmatprep.subr.bf16.mxu1 (!%p270_p3), %v1597_v18  ;;  %v1614_v26 = vld [vmem:[%s2063_s5 + $0x44] ss:$16 sps:$4 sm:$0xff] (!%p270_p3)   ;;  %v1612_v27 = vld [vmem:[%s2063_s5 + $0x40] ss:$16 sps:$4 sm:$0xff] (!%p270_p3)   ;;  %v1611_v54 = vld [vmem:[%s2063_s5 + $0x2c] ss:$16 sps:$4 sm:$0xff] (!%p270_p3)  }
   0xb   : > { %v1620_v28 = vld [vmem:[%s2063_s5 + $0x64] ss:$16 sps:$4 sm:$0xff] (!%p270_p3)   ;;  %v1618_v29 = vld [vmem:[%s2063_s5 + $0x60] ss:$16 sps:$4 sm:$0xff] (!%p270_p3)   ;;  %v1609_v60 = vld [vmem:[%s2063_s5 + $0x28] ss:$16 sps:$4 sm:$0xff] (!%p270_p3)  }
   0xc   : > { %v1626_v30 = vld [vmem:[%s2063_s5 + $0x84] ss:$16 sps:$4 sm:$0xff] (!%p270_p3)   ;;  %v1624_v31 = vld [vmem:[%s2063_s5 + $0x80] ss:$16 sps:$4 sm:$0xff] (!%p270_p3)   ;;  %v1617_v63 = vld [vmem:[%s2063_s5 + $0x4c] ss:$16 sps:$4 sm:$0xff] (!%p270_p3)  }
   0xd   : > { %1548 = vmatpush3.bf16.msra.mxu1 (!%p270_p3), %v1597_v18  ;;  %v1632_v32 = vld [vmem:[%s2063_s5 + $0xa4] ss:$16 sps:$4 sm:$0xff] (!%p270_p3)   ;;  %v1630_v33 = vld [vmem:[%s2063_s5 + $0xa0] ss:$16 sps:$4 sm:$0xff] (!%p270_p3)  }
   0xe   : > { %s2073_s24 = smov (!%p311_p4, %s1662_s24), 1  ;;  %1549 = vmatprep.subr.bf16.mxu1 %v1598_v19  ;;  %v1830_v34 = vld [vmem:[%s2060_s2] ss:$0 sm:$0xff] }
   0xf   : > { %s1489_s9 = sshll.u32 %s2073_s24, 7  ;;  %s1423_s11 = sshll.u32 %s2073_s24, 2 }
  0x10   : > { %s1745_s12 = scalar_lea.vmem %s2058_s0, %s1489_s9  ;;  %s1954_s14 = scalar_lea.vmem %s2065_s7, %s1423_s11 }
  0x11   : > { %v330_v2 = vld [vmem:[%s1745_s12] sm:$0xff]  ;;  %v331_v3 = vld [vmem:[%s1745_s12 + $0x8] sm:$0xff]  ;;  %v332_v4 = vld [vmem:[%s1745_s12 + $0x10] sm:$0xff]  ;;  %1550 = vmatpush3.bf16.msra.mxu1 %v1598_v19 }
  0x12   : > { %1521 = vmatprep.mubr.msk.f32.mxu0 %vm354_vm1, %v330_v2  ;;  %v333_v5 = vld [vmem:[%s1745_s12 + $0x18] sm:$0xff]  ;;  %v334_v6 = vld [vmem:[%s1745_s12 + $0x20] sm:$0xff]  ;;  %v335_v7 = vld [vmem:[%s1745_s12 + $0x28] sm:$0xff]  ;;  %1551 = vmatprep.subr.bf16.mxu1 %v1599_v20 }
  0x13   : > { %1522 = vmatmul.mubr.msk.f32.vlgmr.msra.gmra.mrb[0].mxu0 %vm354_vm1, %v331_v3  ;;  %v336_v8 = vld [vmem:[%s1745_s12 + $0x30] sm:$0xff]  ;;  %v337_v9 = vld [vmem:[%s1745_s12 + $0x38] sm:$0xff]  ;;  %v338_v10 = vld [vmem:[%s1745_s12 + $0x40] sm:$0xff] }
  0x14   : > { %1524 = vmatprep.mubr.msk.f32.mxu0 %vm354_vm1, %v332_v4  ;;  %v339_v11 = vld [vmem:[%s1745_s12 + $0x48] sm:$0xff]  ;;  %v340_v12 = vld [vmem:[%s1745_s12 + $0x50] sm:$0xff]  ;;  %v341_v13 = vld [vmem:[%s1745_s12 + $0x58] sm:$0xff]  ;;  %976 = vmatpush1.bf16.msra.mxu0 %v1600_v21 }
  0x15   : > { %v342_v14 = vld [vmem:[%s1745_s12 + $0x60] sm:$0xff]  ;;  %v343_v15 = vld [vmem:[%s1745_s12 + $0x68] sm:$0xff]  ;;  %v344_v16 = vld [vmem:[%s1745_s12 + $0x70] sm:$0xff]  ;;  %1552 = vmatpush3.bf16.msra.mxu1 %v1599_v20  ;;  %977 = vmatprep.subr.bf16.mxu0 %v1608_v24 }
  0x16   : > { %v345_v17 = vld [vmem:[%s1745_s12 + $0x78] sm:$0xff]  ;;  %1088 = vmatprep.subr.bf16.mxu1 %v1605_v23 }
  0x17   : > { %1525 = vmatmul.mubr.msk.f32.gmra.mrb[2].mxu0 %vm354_vm1, %v333_v5  ;;  %v1615_v5 = vld [vmem:[%s2063_s5 + $0x48] ss:$16 sps:$4 sm:$0xff]  }
  0x18   : > { %1527 = vmatprep.mubr.msk.f32.mxu0 %vm354_vm1, %v334_v6  ;;  %978 = vmatpush1.bf16.msra.mxu0 %v1606_v25  ;;  %v1627_v23 = vld [vmem:[%s2063_s5 + $0x88] ss:$16 sps:$4 sm:$0xff]  }
  0x19   : > { %979 = vmatprep.subr.bf16.mxu0 %v1614_v26  ;;  %v1635_v26 = vld [vmem:[%s2063_s5 + $0xac] ss:$16 sps:$4 sm:$0xff]  }
  0x1b   : > { %1528 = vmatmul.mubr.msk.f32.gmra.mrb[4].mxu0 %vm354_vm1, %v335_v7 }
  0x1c   : > { %1530 = vmatprep.mubr.msk.f32.mxu0 %vm354_vm1, %v336_v8  ;;  %980 = vmatpush1.bf16.msra.mxu0 %v1612_v27  ;;  %v1623_v8 = vld [vmem:[%s2063_s5 + $0x6c] ss:$16 sps:$4 sm:$0xff]  }
  0x1d   : > { %981 = vmatprep.subr.bf16.mxu0 %v1620_v28 }
  0x1f   : > { %1531 = vmatmul.mubr.msk.f32.gmra.mrb[6].mxu0 %vm354_vm1, %v337_v9 }
  0x20   : > { %1533 = vmatprep.mubr.msk.f32.mxu0 %vm354_vm1, %v338_v10  ;;  %982 = vmatpush1.bf16.msra.mxu0 %v1618_v29 }
  0x21   : > { %983 = vmatprep.subr.bf16.mxu0 %v1626_v30 }
  0x23   : > { %1534 = vmatmul.mubr.msk.f32.gmra.mrb[8].mxu0 %vm354_vm1, %v339_v11 }
  0x24   : > { %1536 = vmatprep.mubr.msk.f32.mxu0 %vm354_vm1, %v340_v12  ;;  %984 = vmatpush1.bf16.msra.mxu0 %v1624_v31 }
  0x25   : > { %985 = vmatprep.subr.bf16.mxu0 %v1632_v32  ;;  %v1633_v32 = vld [vmem:[%s2063_s5 + $0xa8] ss:$16 sps:$4 sm:$0xff]  }
  0x27   : > { %1537 = vmatmul.mubr.msk.f32.gmra.mrb[10].mxu0 %vm354_vm1, %v341_v13 }
  0x28   : > { %1539 = vmatprep.mubr.msk.f32.mxu0 %vm354_vm1, %v342_v14  ;;  %986 = vmatpush1.bf16.msra.mxu0 %v1630_v33  ;;  %v1621_v14 = vld [vmem:[%s2063_s5 + $0x68] ss:$16 sps:$4 sm:$0xff]  }
  0x2b   : > { %1540 = vmatmul.mubr.msk.f32.gmra.mrb[12].mxu0 %vm354_vm1, %v343_v15 }
  0x2c   : > { %1542 = vmatprep.mubr.msk.f32.mxu0 %vm354_vm1, %v344_v16 }
  0x2f   : > { %1543 = vmatmul.mubr.msk.f32.gmra.mrb[14].mxu0 %vm354_vm1, %v345_v17  ;;  %v1629_v17 = vld [vmem:[%s2063_s5 + $0x8c] ss:$16 sps:$4 sm:$0xff]  }
  0xe6   : > { %v1523_v35 = vpop.f32.mrb[0].mxu0 }
  0xe7   : > { %v479_v36 = vadd.f32 %v1523_v35, %v1830_v34  ;;  %v473_v37 = vpop.f32.mrb[1].mxu0 }
  0xe8   : > { %v474_v38 = vadd.f32 %v1830_v34, %v473_v37 }
  0xe9   : > { %v553_v39 = vmax.f32 %v479_v36, 0.0 }
  0xea   : > { %v552_v40 = vmax.f32 %v474_v38, 0.0  ;;  %v1526_v41 = vpop.f32.mrb[2].mxu0 }
  0xeb   : > { %v489_v42 = vadd.f32 %v1526_v41, %v1830_v34  ;;  %v483_v43 = vpop.f32.mrb[3].mxu0  ;;  %v1639_v41 = vld [vmem:[%s2063_s5 + $0xc8] ss:$16 sps:$4 sm:$0xff]  }
  0xec   : > { %v484_v44 = vadd.f32 %v1830_v34, %v483_v43  ;;  %v568_v45 = vpack.c.bf16 %v553_v39, %v552_v40  ;;  %v1638_v39 = vld [vmem:[%s2063_s5 + $0xc4] ss:$16 sps:$4 sm:$0xff]   ;;  %v1641_v40 = vld [vmem:[%s2063_s5 + $0xcc] ss:$16 sps:$4 sm:$0xff]  }
  0xed   : > { %v555_v46 = vmax.f32 %v489_v42, 0.0  ;;  %987 = vmatprep.subr.bf16.mxu0 %v1638_v39  ;;  %v1644_v42 = vld [vmem:[%s2063_s5 + $0xe4] ss:$16 sps:$4 sm:$0xff]   ;;  %v1647_v43 = vld [vmem:[%s2063_s5 + $0xec] ss:$16 sps:$4 sm:$0xff]  }
  0xee   : > { %v554_v47 = vmax.f32 %v484_v44, 0.0  ;;  %1553 = vmatprep.mubr.msk.bf16.mxu1 %vm615_vm2, %v568_v45  ;;  %v1529_v48 = vpop.f32.mrb[4].mxu0  ;;  %v1642_v44 = vld [vmem:[%s2063_s5 + $0xe0] ss:$16 sps:$4 sm:$0xff]   ;;  %v1645_v45 = vld [vmem:[%s2063_s5 + $0xe8] ss:$16 sps:$4 sm:$0xff]  }
  0xef   : > { %v499_v49 = vadd.f32 %v1529_v48, %v1830_v34  ;;  %v493_v50 = vpop.f32.mrb[5].mxu0 }
  0xf0   : > { %v569_v52 = vpack.c.bf16 %v555_v46, %v554_v47  ;;  %v494_v53 = vadd.f32 %v1830_v34, %v493_v50  ;;  %v1672_v46 = vmov 0   ;;  %v1918_v47 = vld [vmem:[%s2062_s4] ss:$0 sm:$0xff] }
  0xf1   : > { %v557_v55 = vmax.f32 %v499_v49, 0.0  ;;  %1007 = vmatprep.mubr.bf16.mxu0 %v1672_v46 }
  0xf2   : > { %1554 = vmatmul.mubr.msk.bf16.vlgmr.msra.gmra.mrb[0].mxu1 %vm615_vm2, %v569_v52  ;;  %v556_v56 = vmax.f32 %v494_v53, 0.0  ;;  %v1532_v57 = vpop.f32.mrb[6].mxu0 }
  0xf3   : > { %v509_v58 = vadd.f32 %v1532_v57, %v1830_v34  ;;  %v503_v59 = vpop.f32.mrb[7].mxu0  ;;  %1089 = vmatpush1.bf16.msra.mxu1 %v1603_v51 }
  0xf4   : > { %v570_v61 = vpack.c.bf16 %v557_v55, %v556_v56  ;;  %v504_v62 = vadd.f32 %v1830_v34, %v503_v59  ;;  %1090 = vmatprep.subr.bf16.mxu1 %v1611_v54 }
  0xf5   : > { %v559_v0 = vmax.f32 %v509_v58, 0.0 }
  0xf6   : > { %v558_v1 = vmax.f32 %v504_v62, 0.0  ;;  %1557 = vmatprep.mubr.msk.bf16.mxu1 %vm615_vm2, %v570_v61  ;;  %v1535_v2 = vpop.f32.mrb[8].mxu0 }
  0xf7   : > { %v519_v3 = vadd.f32 %v1535_v2, %v1830_v34  ;;  %v513_v4 = vpop.f32.mrb[9].mxu0  ;;  %1091 = vmatpush1.bf16.msra.mxu1 %v1609_v60 }
  0xf8   : > { %v571_v6 = vpack.c.bf16 %v559_v0, %v558_v1  ;;  %v514_v7 = vadd.f32 %v1830_v34, %v513_v4  ;;  %1092 = vmatprep.subr.bf16.mxu1 %v1617_v63 }
  0xf9   : > { %v561_v9 = vmax.f32 %v519_v3, 0.0 }
  0xfa   : > { %1558 = vmatmul.mubr.msk.bf16.gmra.mrb[4].mxu1 %vm615_vm2, %v571_v6  ;;  %v560_v10 = vmax.f32 %v514_v7, 0.0  ;;  %v1538_v11 = vpop.f32.mrb[10].mxu0 }
  0xfb   : > { %v529_v12 = vadd.f32 %v1538_v11, %v1830_v34  ;;  %v523_v13 = vpop.f32.mrb[11].mxu0  ;;  %1093 = vmatpush1.bf16.msra.mxu1 %v1615_v5 }
  0xfc   : > { %v572_v15 = vpack.c.bf16 %v561_v9, %v560_v10  ;;  %v524_v16 = vadd.f32 %v1830_v34, %v523_v13  ;;  %1094 = vmatprep.subr.bf16.mxu1 %v1623_v8 }
  0xfd   : > { %v563_v18 = vmax.f32 %v529_v12, 0.0 }
  0xfe   : > { %v562_v19 = vmax.f32 %v524_v16, 0.0  ;;  %1561 = vmatprep.mubr.msk.bf16.mxu1 %vm615_vm2, %v572_v15  ;;  %v1541_v20 = vpop.f32.mrb[12].mxu0 }
  0xff   : > { %v539_v21 = vadd.f32 %v1541_v20, %v1830_v34  ;;  %v533_v22 = vpop.f32.mrb[13].mxu0  ;;  %1095 = vmatpush1.bf16.msra.mxu1 %v1621_v14 }
 0x100   : > { %v573_v24 = vpack.c.bf16 %v563_v18, %v562_v19  ;;  %v534_v25 = vadd.f32 %v1830_v34, %v533_v22  ;;  %1096 = vmatprep.subr.bf16.mxu1 %v1629_v17 }
 0x101   : > { %v565_v27 = vmax.f32 %v539_v21, 0.0 }
 0x102   : > { %1562 = vmatmul.mubr.msk.bf16.gmra.mrb[8].mxu1 %vm615_vm2, %v573_v24  ;;  %v564_v28 = vmax.f32 %v534_v25, 0.0  ;;  %v1544_v29 = vpop.f32.mrb[14].mxu0 }
 0x103   : > { %v549_v30 = vadd.f32 %v1544_v29, %v1830_v34  ;;  %v543_v31 = vpop.f32.mrb[15].mxu0  ;;  %1097 = vmatpush1.bf16.msra.mxu1 %v1627_v23 }
 0x104   : > { %v574_v33 = vpack.c.bf16 %v565_v27, %v564_v28  ;;  %v544_v35 = vadd.f32 %v1830_v34, %v543_v31  ;;  %1098 = vmatprep.subr.bf16.mxu1 %v1635_v26  ;;  %v1636_v34 = vld [vmem:[%s2063_s5 + $0xc0] ss:$16 sps:$4 sm:$0xff]  }
 0x105   : > { %v567_v36 = vmax.f32 %v549_v30, 0.0  ;;  %988 = vmatpush1.bf16.msra.mxu0 %v1636_v34  ;;  %v795_v34 = vlaneseq }
 0x106   : > { %v566_v37 = vmax.f32 %v544_v35, 0.0  ;;  %1565 = vmatprep.mubr.msk.bf16.mxu1 %vm615_vm2, %v574_v33  ;;  %989 = vmatprep.subr.bf16.mxu0 %v1644_v42  ;;  %v1673_v42 = vmov -inf  }
 0x107   : > { %1099 = vmatpush1.bf16.msra.mxu1 %v1633_v32  ;;  %vm1956_vm3 = vcmp.lt.s32.totalorder %v795_v34, 512 }
 0x108   : > { %v575_v38 = vpack.c.bf16 %v567_v36, %v566_v37  ;;  %1100 = vmatprep.subr.bf16.mxu1 %v1641_v40  ;;  %1293 = vst.msk [vmem:[%s1954_s14] sm:$0xf] %vm1956_vm3, %v1673_v42 }
 0x109   : > { %990 = vmatpush1.bf16.msra.mxu0 %v1642_v44 }
 0x10a   : > { %1566 = vmatmul.mubr.msk.bf16.gmra.mrb[12].mxu1 %vm615_vm2, %v575_v38 }
 0x10b   : > { %1101 = vmatpush1.bf16.msra.mxu1 %v1639_v41  ;;  %1120 = vmatprep.mubr.bf16.mxu1 %v1672_v46 }
 0x10c   : > { %1102 = vmatprep.subr.bf16.mxu1 %v1647_v43  ;;  %v1963_v43 = vshrl.u32 %v795_v34, 7 }
 0x10e   : > { %v797_v44 = vsub.s32 0, %v1963_v43 }
 0x10f   : > { %1103 = vmatpush1.bf16.msra.mxu1 %v1645_v45  ;;  %v805_v45 = vsub.s32 2, %v1963_v43 }
 0x1c5   : > { %v1555_v48 = vpop.f32.mrb[0].mxu1 }
 0x1c6   : > { %v683_v49 = vadd.f32 %v1555_v48, %v1918_v47  ;;  %v674_v50 = vpop.f32.mrb[1].mxu1  ;;  %v809_v48 = vsub.s32 3, %v1963_v43 }
 0x1c7   : > { %v675_v51 = vadd.f32 %v1918_v47, %v674_v50  ;;  %v1556_v52 = vpop.f32.mrb[2].mxu1 }
 0x1c8   : > { %v686_v53 = vadd.f32 %v1556_v52, %v1918_v47  ;;  %v677_v54 = vpop.f32.mrb[3].mxu1  ;;  %v739_v56 = vmax.f32 %v683_v49, 0.0 }
 0x1c9   : > { %v678_v55 = vadd.f32 %v1918_v47, %v677_v54  ;;  %v737_v58 = vmax.f32 %v675_v51, 0.0 }
 0x1ca   : > { %v740_v57 = vmax.f32 %v686_v53, 0.0 }
 0x1cb   : > { %v738_v59 = vmax.f32 %v678_v55, 0.0 }
 0x1cc   : > { %v754_v60 = vpack.c.bf16 %v740_v57, %v739_v56 }
 0x1cd   : > { %v753_v61 = vpack.c.bf16 %v738_v59, %v737_v58  ;;  %v1559_v62 = vpop.f32.mrb[4].mxu1 }
 0x1ce   : > { %v699_v63 = vadd.f32 %v1559_v62, %v1918_v47  ;;  %v690_v0 = vpop.f32.mrb[5].mxu1 }
 0x1cf   : > { %1008 = vmatmul.mubr.bf16.vlgmr.msra.gmra.mrb[16].mxu0 %v753_v61  ;;  %1121 = vmatmul.mubr.bf16.vlgmr.msra.gmra.mrb[16].mxu1 %v753_v61  ;;  %v691_v1 = vadd.f32 %v1918_v47, %v690_v0  ;;  %v1560_v2 = vpop.f32.mrb[6].mxu1 }
 0x1d0   : > { %v743_v3 = vmax.f32 %v699_v63, 0.0  ;;  %v702_v4 = vadd.f32 %v1560_v2, %v1918_v47  ;;  %v693_v5 = vpop.f32.mrb[7].mxu1  ;;  %1017 = vmatprep.mubr.bf16.mxu0 %v1672_v46  ;;  %1130 = vmatprep.mubr.bf16.mxu1 %v1672_v46 }
 0x1d1   : > { %v741_v6 = vmax.f32 %v691_v1, 0.0  ;;  %v694_v7 = vadd.f32 %v1918_v47, %v693_v5 }
 0x1d2   : > { %v744_v8 = vmax.f32 %v702_v4, 0.0 }
 0x1d3   : > { %v742_v9 = vmax.f32 %v694_v7, 0.0 }
 0x1d4   : > { %v756_v10 = vpack.c.bf16 %v744_v8, %v743_v3 }
 0x1d5   : > { %v755_v11 = vpack.c.bf16 %v742_v9, %v741_v6  ;;  %v1563_v12 = vpop.f32.mrb[8].mxu1 }
 0x1d6   : > { %v715_v13 = vadd.f32 %v1563_v12, %v1918_v47  ;;  %v706_v14 = vpop.f32.mrb[9].mxu1 }
 0x1d7   : > { %1018 = vmatmul.mubr.bf16.gmra.mrb[20].mxu0 %v754_v60  ;;  %1131 = vmatmul.mubr.bf16.gmra.mrb[20].mxu1 %v754_v60  ;;  %v707_v15 = vadd.f32 %v1918_v47, %v706_v14  ;;  %v1564_v16 = vpop.f32.mrb[10].mxu1 }
 0x1d8   : > { %1027 = vmatprep.mubr.bf16.mxu0 %v1672_v46  ;;  %1140 = vmatprep.mubr.bf16.mxu1 %v1672_v46  ;;  %v747_v17 = vmax.f32 %v715_v13, 0.0  ;;  %v718_v18 = vadd.f32 %v1564_v16, %v1918_v47  ;;  %v709_v19 = vpop.f32.mrb[11].mxu1 }
 0x1d9   : > { %v745_v20 = vmax.f32 %v707_v15, 0.0  ;;  %v710_v21 = vadd.f32 %v1918_v47, %v709_v19 }
 0x1da   : > { %v748_v22 = vmax.f32 %v718_v18, 0.0 }
 0x1db   : > { %v746_v23 = vmax.f32 %v710_v21, 0.0 }
 0x1dc   : > { %v758_v24 = vpack.c.bf16 %v748_v22, %v747_v17 }
 0x1dd   : > { %v757_v25 = vpack.c.bf16 %v746_v23, %v745_v20  ;;  %v1567_v26 = vpop.f32.mrb[12].mxu1 }
 0x1de   : > { %v731_v27 = vadd.f32 %v1567_v26, %v1918_v47  ;;  %v722_v28 = vpop.f32.mrb[13].mxu1 }
 0x1df   : > { %1028 = vmatmul.mubr.bf16.gmra.mrb[24].mxu0 %v755_v11  ;;  %1141 = vmatmul.mubr.bf16.gmra.mrb[24].mxu1 %v755_v11  ;;  %v723_v29 = vadd.f32 %v1918_v47, %v722_v28  ;;  %v1568_v30 = vpop.f32.mrb[14].mxu1 }
 0x1e0   : > { %1037 = vmatprep.mubr.bf16.mxu0 %v1672_v46  ;;  %1150 = vmatprep.mubr.bf16.mxu1 %v1672_v46  ;;  %v751_v31 = vmax.f32 %v731_v27, 0.0  ;;  %v734_v32 = vadd.f32 %v1568_v30, %v1918_v47  ;;  %v725_v33 = vpop.f32.mrb[15].mxu1 }
 0x1e1   : > { %v749_v35 = vmax.f32 %v723_v29, 0.0  ;;  %v726_v36 = vadd.f32 %v1918_v47, %v725_v33  ;;  %v801_v47 = vsub.s32 1, %v1963_v43 }
 0x1e2   : > { %v752_v37 = vmax.f32 %v734_v32, 0.0 }
 0x1e3   : > { %v750_v38 = vmax.f32 %v726_v36, 0.0 }
 0x1e4   : > { %v760_v39 = vpack.c.bf16 %v752_v37, %v751_v31 }
 0x1e5   : > { %v759_v40 = vpack.c.bf16 %v750_v38, %v749_v35 }
 0x1e7   : > { %1038 = vmatmul.mubr.bf16.gmra.mrb[28].mxu0 %v756_v10  ;;  %1151 = vmatmul.mubr.bf16.gmra.mrb[28].mxu1 %v756_v10 }
 0x1e8   : > { %1047 = vmatprep.mubr.bf16.mxu0 %v1672_v46  ;;  %1160 = vmatprep.mubr.bf16.mxu1 %v1672_v46 }
 0x1ef   : > { %1048 = vmatmul.mubr.bf16.gmra.mrb[32].mxu0 %v757_v25  ;;  %1161 = vmatmul.mubr.bf16.gmra.mrb[32].mxu1 %v757_v25 }
 0x1f0   : > { %1057 = vmatprep.mubr.bf16.mxu0 %v1672_v46  ;;  %1170 = vmatprep.mubr.bf16.mxu1 %v1672_v46 }
 0x1f7   : > { %1058 = vmatmul.mubr.bf16.gmra.mrb[36].mxu0 %v758_v24  ;;  %1171 = vmatmul.mubr.bf16.gmra.mrb[36].mxu1 %v758_v24 }
 0x1f8   : > { %1067 = vmatprep.mubr.bf16.mxu0 %v1672_v46  ;;  %1180 = vmatprep.mubr.bf16.mxu1 %v1672_v46 }
 0x1ff   : > { %1068 = vmatmul.mubr.bf16.gmra.mrb[40].mxu0 %v759_v40  ;;  %1181 = vmatmul.mubr.bf16.gmra.mrb[40].mxu1 %v759_v40 }
 0x200   : > { %1077 = vmatprep.mubr.bf16.mxu0 %v1672_v46  ;;  %1190 = vmatprep.mubr.bf16.mxu1 %v1672_v46  ;;  %v793_v46 = vld [vmem:[%s2064_s6] sm:$0xf] }
 0x201   : > { %v1972_v49 = vrot.slane %v793_v46, %v797_v44  ;;  %v1974_v50 = vrot.slane %v793_v46, %v805_v45  ;;  %v1976_v53 = vrot.slane %v793_v46, %v801_v47  ;;  %v1978_v54 = vrot.slane %v793_v46, %v809_v48 }
 0x207   : > { %1078 = vmatmul.mubr.bf16.gmra.mrb[44].mxu0 %v760_v39  ;;  %1191 = vmatmul.mubr.bf16.gmra.mrb[44].mxu1 %v760_v39 }
 0x2a2   : > { %v1009_v51 = vpop.f32.mrb[16].mxu0  ;;  %v1122_v52 = vpop.f32.mrb[16].mxu1 }
 0x2a3   : > { %v1011_v55 = vpop.f32.mrb[17].mxu0  ;;  %v1124_v56 = vpop.f32.mrb[17].mxu1  ;;  %v1010_v59 = vadd.f32 %v1009_v51, %v1972_v49  ;;  %v1123_v60 = vadd.f32 %v1122_v52, %v1974_v50 }
 0x2a4   : > { %v1013_v57 = vpop.f32.mrb[18].mxu0  ;;  %v1126_v58 = vpop.f32.mrb[18].mxu1  ;;  %v1012_v1 = vadd.f32 %v1011_v55, %v1976_v53  ;;  %v1125_v2 = vadd.f32 %v1124_v56, %v1978_v54 }
 0x2a5   : > { %v1014_v61 = vadd.f32 %v1013_v57, %v1972_v49  ;;  %v1127_v62 = vadd.f32 %v1126_v58, %v1974_v50  ;;  %v1015_v63 = vpop.f32.mrb[19].mxu0  ;;  %v1128_v0 = vpop.f32.mrb[19].mxu1 }
 0x2a6   : > { %v1016_v3 = vadd.f32 %v1015_v63, %v1976_v53  ;;  %v1129_v4 = vadd.f32 %v1128_v0, %v1978_v54 }
 0x2a7   : > { %v1201_v5 = vmax.f32 %v1010_v59, %v1014_v61  ;;  %v1243_v6 = vmax.f32 %v1123_v60, %v1127_v62 }
 0x2a8   : > { %v1222_v7 = vmax.f32 %v1012_v1, %v1016_v3  ;;  %v1264_v8 = vmax.f32 %v1125_v2, %v1129_v4 }
 0x2aa   : > { %v1019_v9 = vpop.f32.mrb[20].mxu0  ;;  %v1132_v10 = vpop.f32.mrb[20].mxu1 }
 0x2ab   : > { %v1020_v11 = vadd.f32 %v1019_v9, %v1972_v49  ;;  %v1133_v12 = vadd.f32 %v1132_v10, %v1974_v50  ;;  %v1021_v13 = vpop.f32.mrb[21].mxu0  ;;  %v1134_v14 = vpop.f32.mrb[21].mxu1 }
 0x2ac   : > { %v1022_v15 = vadd.f32 %v1021_v13, %v1976_v53  ;;  %v1135_v16 = vadd.f32 %v1134_v14, %v1978_v54  ;;  %v1023_v17 = vpop.f32.mrb[22].mxu0  ;;  %v1136_v18 = vpop.f32.mrb[22].mxu1 }
 0x2ad   : > { %v1202_v19 = vmax.f32 %v1201_v5, %v1020_v11  ;;  %v1244_v20 = vmax.f32 %v1243_v6, %v1133_v12  ;;  %v1024_v21 = vadd.f32 %v1023_v17, %v1972_v49  ;;  %v1137_v22 = vadd.f32 %v1136_v18, %v1974_v50  ;;  %v1025_v23 = vpop.f32.mrb[23].mxu0  ;;  %v1138_v24 = vpop.f32.mrb[23].mxu1 }
 0x2ae   : > { %v1223_v25 = vmax.f32 %v1222_v7, %v1022_v15  ;;  %v1265_v26 = vmax.f32 %v1264_v8, %v1135_v16  ;;  %v1026_v27 = vadd.f32 %v1025_v23, %v1976_v53  ;;  %v1139_v28 = vadd.f32 %v1138_v24, %v1978_v54 }
 0x2af   : > { %v1203_v29 = vmax.f32 %v1202_v19, %v1024_v21  ;;  %v1245_v30 = vmax.f32 %v1244_v20, %v1137_v22 }
 0x2b0   : > { %v1224_v31 = vmax.f32 %v1223_v25, %v1026_v27  ;;  %v1266_v32 = vmax.f32 %v1265_v26, %v1139_v28 }
 0x2b2   : > { %v1029_v33 = vpop.f32.mrb[24].mxu0  ;;  %v1142_v35 = vpop.f32.mrb[24].mxu1 }
 0x2b3   : > { %v1030_v36 = vadd.f32 %v1029_v33, %v1972_v49  ;;  %v1143_v37 = vadd.f32 %v1142_v35, %v1974_v50  ;;  %v1031_v38 = vpop.f32.mrb[25].mxu0  ;;  %v1144_v39 = vpop.f32.mrb[25].mxu1 }
 0x2b4   : > { %v1032_v40 = vadd.f32 %v1031_v38, %v1976_v53  ;;  %v1145_v34 = vadd.f32 %v1144_v39, %v1978_v54  ;;  %v1033_v42 = vpop.f32.mrb[26].mxu0  ;;  %v1146_v44 = vpop.f32.mrb[26].mxu1 }
 0x2b5   : > { %v1204_v45 = vmax.f32 %v1203_v29, %v1030_v36  ;;  %v1246_v46 = vmax.f32 %v1245_v30, %v1143_v37  ;;  %v1034_v47 = vadd.f32 %v1033_v42, %v1972_v49  ;;  %v1147_v48 = vadd.f32 %v1146_v44, %v1974_v50  ;;  %v1035_v51 = vpop.f32.mrb[27].mxu0  ;;  %v1148_v52 = vpop.f32.mrb[27].mxu1 }
 0x2b6   : > { %v1225_v55 = vmax.f32 %v1224_v31, %v1032_v40  ;;  %v1267_v56 = vmax.f32 %v1266_v32, %v1145_v34  ;;  %v1036_v57 = vadd.f32 %v1035_v51, %v1976_v53  ;;  %v1149_v58 = vadd.f32 %v1148_v52, %v1978_v54 }
 0x2b7   : > { %v1205_v59 = vmax.f32 %v1204_v45, %v1034_v47  ;;  %v1247_v60 = vmax.f32 %v1246_v46, %v1147_v48 }
 0x2b8   : > { %v1226_v61 = vmax.f32 %v1225_v55, %v1036_v57  ;;  %v1268_v62 = vmax.f32 %v1267_v56, %v1149_v58 }
 0x2ba   : > { %v1039_v63 = vpop.f32.mrb[28].mxu0  ;;  %v1152_v0 = vpop.f32.mrb[28].mxu1 }
 0x2bb   : > { %v1040_v1 = vadd.f32 %v1039_v63, %v1972_v49  ;;  %v1153_v2 = vadd.f32 %v1152_v0, %v1974_v50  ;;  %v1041_v3 = vpop.f32.mrb[29].mxu0  ;;  %v1154_v4 = vpop.f32.mrb[29].mxu1 }
 0x2bc   : > { %v1042_v5 = vadd.f32 %v1041_v3, %v1976_v53  ;;  %v1155_v6 = vadd.f32 %v1154_v4, %v1978_v54  ;;  %v1043_v7 = vpop.f32.mrb[30].mxu0  ;;  %v1156_v8 = vpop.f32.mrb[30].mxu1 }
 0x2bd   : > { %v1206_v9 = vmax.f32 %v1205_v59, %v1040_v1  ;;  %v1248_v10 = vmax.f32 %v1247_v60, %v1153_v2  ;;  %v1044_v11 = vadd.f32 %v1043_v7, %v1972_v49  ;;  %v1157_v12 = vadd.f32 %v1156_v8, %v1974_v50  ;;  %v1045_v13 = vpop.f32.mrb[31].mxu0  ;;  %v1158_v14 = vpop.f32.mrb[31].mxu1 }
 0x2be   : > { %v1227_v15 = vmax.f32 %v1226_v61, %v1042_v5  ;;  %v1269_v16 = vmax.f32 %v1268_v62, %v1155_v6  ;;  %v1046_v17 = vadd.f32 %v1045_v13, %v1976_v53  ;;  %v1159_v18 = vadd.f32 %v1158_v14, %v1978_v54 }
 0x2bf   : > { %v1207_v19 = vmax.f32 %v1206_v9, %v1044_v11  ;;  %v1249_v20 = vmax.f32 %v1248_v10, %v1157_v12 }
 0x2c0   : > { %v1228_v21 = vmax.f32 %v1227_v15, %v1046_v17  ;;  %v1270_v22 = vmax.f32 %v1269_v16, %v1159_v18 }
 0x2c2   : > { %v1049_v23 = vpop.f32.mrb[32].mxu0  ;;  %v1162_v24 = vpop.f32.mrb[32].mxu1 }
 0x2c3   : > { %v1050_v25 = vadd.f32 %v1049_v23, %v1972_v49  ;;  %v1163_v26 = vadd.f32 %v1162_v24, %v1974_v50  ;;  %v1051_v27 = vpop.f32.mrb[33].mxu0  ;;  %v1164_v28 = vpop.f32.mrb[33].mxu1 }
 0x2c4   : > { %v1052_v29 = vadd.f32 %v1051_v27, %v1976_v53  ;;  %v1165_v30 = vadd.f32 %v1164_v28, %v1978_v54  ;;  %v1053_v31 = vpop.f32.mrb[34].mxu0  ;;  %v1166_v32 = vpop.f32.mrb[34].mxu1 }
 0x2c5   : > { %v1208_v33 = vmax.f32 %v1207_v19, %v1050_v25  ;;  %v1250_v35 = vmax.f32 %v1249_v20, %v1163_v26  ;;  %v1054_v36 = vadd.f32 %v1053_v31, %v1972_v49  ;;  %v1167_v37 = vadd.f32 %v1166_v32, %v1974_v50  ;;  %v1055_v38 = vpop.f32.mrb[35].mxu0  ;;  %v1168_v39 = vpop.f32.mrb[35].mxu1 }
 0x2c6   : > { %v1229_v40 = vmax.f32 %v1228_v21, %v1052_v29  ;;  %v1271_v34 = vmax.f32 %v1270_v22, %v1165_v30  ;;  %v1056_v42 = vadd.f32 %v1055_v38, %v1976_v53  ;;  %v1169_v44 = vadd.f32 %v1168_v39, %v1978_v54 }
 0x2c7   : > { %v1209_v45 = vmax.f32 %v1208_v33, %v1054_v36  ;;  %v1251_v46 = vmax.f32 %v1250_v35, %v1167_v37 }
 0x2c8   : > { %v1230_v47 = vmax.f32 %v1229_v40, %v1056_v42  ;;  %v1272_v48 = vmax.f32 %v1271_v34, %v1169_v44 }
 0x2ca   : > { %v1059_v51 = vpop.f32.mrb[36].mxu0  ;;  %v1172_v52 = vpop.f32.mrb[36].mxu1 }
 0x2cb   : > { %v1060_v55 = vadd.f32 %v1059_v51, %v1972_v49  ;;  %v1173_v56 = vadd.f32 %v1172_v52, %v1974_v50  ;;  %v1061_v57 = vpop.f32.mrb[37].mxu0  ;;  %v1174_v58 = vpop.f32.mrb[37].mxu1 }
 0x2cc   : > { %v1062_v59 = vadd.f32 %v1061_v57, %v1976_v53  ;;  %v1175_v60 = vadd.f32 %v1174_v58, %v1978_v54  ;;  %v1063_v61 = vpop.f32.mrb[38].mxu0  ;;  %v1176_v62 = vpop.f32.mrb[38].mxu1 }
 0x2cd   : > { %v1210_v63 = vmax.f32 %v1209_v45, %v1060_v55  ;;  %v1252_v0 = vmax.f32 %v1251_v46, %v1173_v56  ;;  %v1064_v1 = vadd.f32 %v1063_v61, %v1972_v49  ;;  %v1177_v2 = vadd.f32 %v1176_v62, %v1974_v50  ;;  %v1065_v3 = vpop.f32.mrb[39].mxu0  ;;  %v1178_v4 = vpop.f32.mrb[39].mxu1 }
 0x2ce   : > { %v1231_v5 = vmax.f32 %v1230_v47, %v1062_v59  ;;  %v1273_v6 = vmax.f32 %v1272_v48, %v1175_v60  ;;  %v1066_v7 = vadd.f32 %v1065_v3, %v1976_v53  ;;  %v1179_v8 = vadd.f32 %v1178_v4, %v1978_v54 }
 0x2cf   : > { %v1211_v9 = vmax.f32 %v1210_v63, %v1064_v1  ;;  %v1253_v10 = vmax.f32 %v1252_v0, %v1177_v2 }
 0x2d0   : > { %v1232_v11 = vmax.f32 %v1231_v5, %v1066_v7  ;;  %v1274_v12 = vmax.f32 %v1273_v6, %v1179_v8 }
 0x2d2   : > { %v1069_v13 = vpop.f32.mrb[40].mxu0  ;;  %v1182_v14 = vpop.f32.mrb[40].mxu1 }
 0x2d3   : > { %v1070_v15 = vadd.f32 %v1069_v13, %v1972_v49  ;;  %v1183_v16 = vadd.f32 %v1182_v14, %v1974_v50  ;;  %v1071_v17 = vpop.f32.mrb[41].mxu0  ;;  %v1184_v18 = vpop.f32.mrb[41].mxu1 }
 0x2d4   : > { %v1072_v19 = vadd.f32 %v1071_v17, %v1976_v53  ;;  %v1185_v20 = vadd.f32 %v1184_v18, %v1978_v54  ;;  %v1073_v21 = vpop.f32.mrb[42].mxu0  ;;  %v1186_v22 = vpop.f32.mrb[42].mxu1 }
 0x2d5   : > { %v1212_v23 = vmax.f32 %v1211_v9, %v1070_v15  ;;  %v1254_v24 = vmax.f32 %v1253_v10, %v1183_v16  ;;  %v1074_v25 = vadd.f32 %v1073_v21, %v1972_v49  ;;  %v1187_v26 = vadd.f32 %v1186_v22, %v1974_v50  ;;  %v1075_v27 = vpop.f32.mrb[43].mxu0  ;;  %v1188_v28 = vpop.f32.mrb[43].mxu1 }
 0x2d6   : > { %v1233_v29 = vmax.f32 %v1232_v11, %v1072_v19  ;;  %v1275_v30 = vmax.f32 %v1274_v12, %v1185_v20  ;;  %v1076_v31 = vadd.f32 %v1075_v27, %v1976_v53  ;;  %v1189_v32 = vadd.f32 %v1188_v28, %v1978_v54 }
 0x2d7   : > { %v1213_v33 = vmax.f32 %v1212_v23, %v1074_v25  ;;  %v1255_v35 = vmax.f32 %v1254_v24, %v1187_v26 }
 0x2d8   : > { %v1234_v36 = vmax.f32 %v1233_v29, %v1076_v31  ;;  %v1276_v37 = vmax.f32 %v1275_v30, %v1189_v32  ;;  %v1294_v32 = vld [vmem:[%s1954_s14] sm:$0xf] }
 0x2da   : > { %v1079_v38 = vpop.f32.mrb[44].mxu0  ;;  %v1192_v39 = vpop.f32.mrb[44].mxu1 }
 0x2db   : > { %v1080_v40 = vadd.f32 %v1079_v38, %v1972_v49  ;;  %v1193_v34 = vadd.f32 %v1192_v39, %v1974_v50  ;;  %v1081_v42 = vpop.f32.mrb[45].mxu0  ;;  %v1194_v44 = vpop.f32.mrb[45].mxu1 }
 0x2dc   : > { %v1082_v45 = vadd.f32 %v1081_v42, %v1976_v53  ;;  %v1195_v46 = vadd.f32 %v1194_v44, %v1978_v54  ;;  %v1083_v47 = vpop.f32.mrb[46].mxu0  ;;  %v1196_v48 = vpop.f32.mrb[46].mxu1 }
 0x2dd   : > { %v1214_v51 = vmax.f32 %v1213_v33, %v1080_v40  ;;  %v1256_v52 = vmax.f32 %v1255_v35, %v1193_v34  ;;  %v1084_v55 = vadd.f32 %v1083_v47, %v1972_v49  ;;  %v1197_v56 = vadd.f32 %v1196_v48, %v1974_v50  ;;  %v1085_v57 = vpop.f32.mrb[47].mxu0  ;;  %v1198_v58 = vpop.f32.mrb[47].mxu1 }
 0x2de   : > { %v1235_v59 = vmax.f32 %v1234_v36, %v1082_v45  ;;  %v1277_v60 = vmax.f32 %v1276_v37, %v1195_v46  ;;  %v1086_v61 = vadd.f32 %v1085_v57, %v1976_v53  ;;  %v1199_v62 = vadd.f32 %v1198_v58, %v1978_v54 }
 0x2df   : > { %v1215_v63 = vmax.f32 %v1214_v51, %v1084_v55  ;;  %v1257_v0 = vmax.f32 %v1256_v52, %v1197_v56  ;;  %v1674_v50 = vmov 1966171168  }
 0x2e0   : > { %v1236_v1 = vmax.f32 %v1235_v59, %v1086_v61  ;;  %v1278_v2 = vmax.f32 %v1277_v60, %v1199_v62  ;;  %v1302_v9 = vunpack.c.l.s4 %v1674_v50 }
 0x2e1   : > { %v1216_v3 = vrot.slane %v1215_v63, 4  ;;  %v1258_v4 = vrot.slane %v1257_v0, 4 }
 0x2e2   : > { %v1237_v5 = vrot.slane %v1236_v1, 4  ;;  %v1279_v6 = vrot.slane %v1278_v2, 4  ;;  %v1303_v16 = vunpack.c.0.s8 %v1302_v9 }
 0x2e3   : > { %v1217_v7 = vmax.f32 %v1215_v63, %v1216_v3  ;;  %v1259_v49 = vmax.f32 %v1257_v0, %v1258_v4 }
 0x2e4   : > { %v1238_v8 = vmax.f32 %v1236_v1, %v1237_v5  ;;  %v1280_v10 = vmax.f32 %v1278_v2, %v1279_v6  ;;  %v1306_v25 = vsub.s32 %v1303_v16, %v1963_v43 }
 0x2e5   : > { %v1218_v11 = vrot.slane %v1217_v7, 2  ;;  %v1260_v12 = vrot.slane %v1259_v49, 2 }
 0x2e6   : > { %v1239_v13 = vrot.slane %v1238_v8, 2  ;;  %v1281_v53 = vrot.slane %v1280_v10, 2 }
 0x2e7   : > { %v1219_v14 = vmax.f32 %v1217_v7, %v1218_v11  ;;  %v1261_v54 = vmax.f32 %v1259_v49, %v1260_v12 }
 0x2e8   : > { %v1240_v15 = vmax.f32 %v1238_v8, %v1239_v13  ;;  %v1282_v17 = vmax.f32 %v1280_v10, %v1281_v53 }
 0x2e9   : > { %v1220_v18 = vrot.slane %v1219_v14, 1  ;;  %v1262_v19 = vrot.slane %v1261_v54, 1 }
 0x2ea   : > { %v1241_v20 = vrot.slane %v1240_v15, 1  ;;  %v1283_v21 = vrot.slane %v1282_v17, 1 }
 0x2eb   : > { %v1221_v22 = vmax.f32 %v1219_v14, %v1220_v18  ;;  %v1263_v23 = vmax.f32 %v1261_v54, %v1262_v19 }
 0x2ec   : > { %v1242_v24 = vmax.f32 %v1240_v15, %v1241_v20  ;;  %v1284_v26 = vmax.f32 %v1282_v17, %v1283_v21 }
 0x2ee   : > { %v1299_v27 = vcombine.low %v1221_v22, %v1242_v24  ;;  %v1300_v28 = vcombine.low %v1263_v23, %v1284_v26 }
 0x2f0   : > { %v1307_v29 = vrot.slane %v1299_v27, %v1306_v25  ;;  %v1314_v30 = vrot.slane %v1300_v28, %v1306_v25 }
 0x2f2   : > { %v1315_v31 = vcombine.low %v1307_v29, %v1314_v30 }
 0x2f4   : > { %v1322_v33 = vrot.slane %v1315_v31, %v1306_v25 }
 0x2f6   : > { %v1324_v35 = vmax.f32 %v1294_v32, %v1322_v33 }
 0x2f8   : > { %1329 = vst.msk [vmem:[%s1954_s14] sm:$0xf] %vm1956_vm3, %v1324_v35 }
 0x2f9 PF: > { %s17_s26 = sadd.s32 1, %s1670_s26   ;;  %s2068_s24 = smov %s1666_s25 }
 0x2fa   : > { %p14_p5 = scmp.ge.s32.totalorder %s17_s26, 4   ;;  %s2069_s25 = smov %s2071_s27 }
 0x2fc   :  { %16 = sbr.rel (!%p14_p5) target bundleno = 2 (0x2), region = 82 }

// kernel: sgkpnet_forward.3
= control target key start
LH: loop header
LB: loop body
LE: loop exit
PB: predicated region body
PF: predicated region fallthrough
CT: control target
= control target key end

     0   :  { %s7500_s27 = smov 0   ;;  %s7502_s28 = smov 0   ;;  %s9810_s0 = inlined_call_operand.vmem [shape: f32[2,128,8], index: 0, kind: input, shape index: {}]   ;;  %s9811_s1 = inlined_call_operand.vmem [shape: f32[2,1,1024], index: 1, kind: input, shape index: {}]   ;;  %s9812_s2 = inlined_call_operand.vmem [shape: f32[8,96], index: 2, kind: input, shape index: {}]   ;;  %s9813_s3 = inlined_call_operand.vmem [shape: f32[1,96], index: 3, kind: input, shape index: {}]   ;;  %s9814_s4 = inlined_call_operand.vmem [shape: bf16[96,256], index: 4, kind: input, shape index: {}]   ;;  %s9815_s5 = inlined_call_operand.vmem [shape: f32[1,256], index: 5, kind: input, shape index: {}]   ;;  %s9816_s6 = inlined_call_operand.vmem [shape: bf16[96,1024], index: 6, kind: input, shape index: {}]   ;;  %s9817_s7 = inlined_call_operand.vmem [shape: bf16[256,1024], index: 7, kind: input, shape index: {}]   ;;  %s9818_s8 = inlined_call_operand.vmem [shape: bf16[512,256], index: 8, kind: input, shape index: {}]   ;;  %s9819_s9 = inlined_call_operand.vmem [shape: f32[1,256], index: 9, kind: input, shape index: {}]   ;;  %s9820_s10 = inlined_call_operand.vmem [shape: bf16[256,128], index: 10, kind: input, shape index: {}]   ;;  %s9821_s11 = inlined_call_operand.vmem [shape: f32[1,128], index: 11, kind: input, shape index: {}]   ;;  %s9822_s12 = inlined_call_operand.vmem [shape: bf16[512,256], index: 12, kind: input, shape index: {}]   ;;  %s9823_s13 = inlined_call_operand.vmem [shape: f32[1,256], index: 13, kind: input, shape index: {}]   ;;  %s9824_s14 = inlined_call_operand.vmem [shape: bf16[256,128], index: 14, kind: input, shape index: {}]   ;;  %s9825_s15 = inlined_call_operand.vmem [shape: f32[1,128], index: 15, kind: input, shape index: {}]   ;;  %s9826_s16 = inlined_call_operand.vmem [shape: bf16[256,128], index: 16, kind: input, shape index: {}]   ;;  %s9827_s17 = inlined_call_operand.vmem [shape: f32[1,128], index: 17, kind: input, shape index: {}]   ;;  %s9828_s18 = inlined_call_operand.vmem [shape: f32[2,128,128], index: 18, kind: output, shape index: {}]  }
   0x1   :  { %9829 = sst [smem:[#allocation2_spill]] %s9810_s0  ;;  %s7504_s29 = smov 0  }
   0x2   :  { %9830 = sst [smem:[#allocation3_spill]] %s9811_s1 }
   0x3   :  { %9831 = sst [smem:[#allocation4_spill]] %s9812_s2 }
   0x4 LB: > { %s40_s30 = sadd.s32 1, %s7398_s28  ;;  %p6012_p0 = scmp.ge.s32.totalorder %s7402_s29, 1  ;;  %s7402_s29 = sphi %s7504_s29, %s28_s29   ;;  %s7398_s28 = sphi %s7502_s28, %s9838_s28   ;;  %s7394_s27 = sphi %s7500_s27, %s9837_s27  }
   0x5   : > { %p42_p1 = scmp.ge.s32.totalorder %s40_s30, 2  ;;  %p542_p2 = scmp.lt.s32.totalorder %s7402_s29, 3 }
   0x7   : > { %s9840_s30 = smov (%p42_p1, %s40_s30), 0  ;;  %p543_p3 = pnand %p6012_p0, %p542_p2 }
   0x8   : > { %s9832_s1 = sld [smem:[#allocation4_spill]] (!%p543_p3)  ;;  %p609_p4 = scmp.lt.s32.totalorder (!%p543_p3), %s7394_s27, 1  ;;  %v6994_v1 = vld [vmem:[%s9814_s4 + $0x4] ss:$8 sps:$4 sm:$0xff] (!%p543_p3)   ;;  %v6996_v2 = vld [vmem:[%s9814_s4] ss:$8 sps:$4 sm:$0xff] (!%p543_p3)  }
   0x9   : > { %546 = sbr.rel (%p543_p3) target bundleno = 2267 (0x8db), region = 92  ;;  %v6997_v3 = vld [vmem:[%s9814_s4 + $0x14] ss:$8 sps:$4 sm:$0xff] (!%p543_p3)   ;;  %984 = vmatprep.subr.bf16.mxu1 (!%p543_p3), %v6994_v1  ;;  %vm657_vm0 = vcmask (!%p543_p3), 64512   ;;  %v6999_v4 = vld [vmem:[%s9814_s4 + $0x10] ss:$8 sps:$4 sm:$0xff] (!%p543_p3)  }
   0xa   : > { %985 = vmatpush1.bf16.msra.mxu1 (!%p543_p3), %v6996_v2  ;;  %s9833_s20 = sld [smem:[#allocation2_spill]] (!%p543_p3)  ;;  %v7000_v5 = vld [vmem:[%s9814_s4 + $0x24] ss:$8 sps:$4 sm:$0xff] (!%p543_p3)   ;;  %v7002_v9 = vld [vmem:[%s9814_s4 + $0x20] ss:$8 sps:$4 sm:$0xff] (!%p543_p3)   ;;  %v7404_v29 = vmov (!%p543_p3), 0  }
   0xb   : > { %986 = vmatprep.subr.bf16.mxu1 (!%p543_p3), %v6997_v3  ;;  %v7003_v11 = vld [vmem:[%s9814_s4 + $0x34] ss:$8 sps:$4 sm:$0xff] (!%p543_p3)   ;;  %v7005_v14 = vld [vmem:[%s9814_s4 + $0x30] ss:$8 sps:$4 sm:$0xff] (!%p543_p3)   ;;  %v7006_v25 = vld [vmem:[%s9814_s4 + $0x44] ss:$8 sps:$4 sm:$0xff] (!%p543_p3)   ;;  %1016 = vmatprep.mubr.bf16.mxu1 (!%p543_p3), %v7404_v29 }
   0xc   : > { %v7008_v26 = vld [vmem:[%s9814_s4 + $0x40] ss:$8 sps:$4 sm:$0xff] (!%p543_p3)   ;;  %v7009_v27 = vld [vmem:[%s9814_s4 + $0x54] ss:$8 sps:$4 sm:$0xff] (!%p543_p3)   ;;  %v7011_v28 = vld [vmem:[%s9814_s4 + $0x50] ss:$8 sps:$4 sm:$0xff] (!%p543_p3)  }
   0xd   : > { %v1194_v30 = vld [vmem:[%s9817_s7] sm:$0xff] (!%p543_p3)  ;;  %v7609_v32 = vld [vmem:[%s9817_s7 + $0x8] sm:$0xff] (!%p543_p3)  ;;  %vm959_vm1 = vcmask (!%p543_p3), 785408   ;;  %s9834_s23 = sld [smem:[#allocation3_spill]] (!%p543_p3) }
   0xe   : > { %v649_v0 = vld [vmem:[%s9832_s1] sm:$0xff] (!%p543_p3)  ;;  %987 = vmatpush1.bf16.msra.mxu1 (!%p543_p3), %v6999_v4  ;;  %v7614_v35 = vld [vmem:[%s9817_s7 + $0x28] sm:$0xff] (!%p543_p3) }
   0xf   : > { %6671 = vmatprep.subr.mxu0 (!%p543_p3), %v649_v0  ;;  %988 = vmatprep.subr.bf16.mxu1 (!%p543_p3), %v7000_v5  ;;  %v1198_v31 = vld [vmem:[%s9817_s7 + $0x20] sm:$0xff] (!%p543_p3)  ;;  %v6057_v38 = vcombine.low (!%p543_p3), %v7609_v32, %v7614_v35  ;;  %v6058_v39 = vcombine.high (!%p543_p3), %v7609_v32, %v7614_v35 }
  0x10   : > { %6672 = vmatpush3.msra.mxu0 %v649_v0  ;;  %s9842_s27 = smov (!%p609_p4, %s7394_s27), 1  ;;  %v6055_v33 = vcombine.low %v1194_v30, %v1198_v31  ;;  %v6056_v34 = vcombine.high %v1194_v30, %v1198_v31  ;;  %v1202_v36 = vld [vmem:[%s9817_s7 + $0x40] sm:$0xff] }
  0x11   : > { %s6460_s25 = sshll.u32 %s9842_s27, 7  ;;  %v1206_v37 = vld [vmem:[%s9817_s7 + $0x60] sm:$0xff] }
  0x12   : > { %s7541_s21 = scalar_lea.vmem %s9833_s20, %s6460_s25  ;;  %989 = vmatpush1.bf16.msra.mxu1 %v7002_v9  ;;  %v6064_v40 = vcombine.high %v1202_v36, %v1206_v37  ;;  %v1210_v41 = vld [vmem:[%s9817_s7 + $0x80] sm:$0xff]  ;;  %1962 = vmatprep.subr.bf16.mxu0 %v6056_v34  ;;  %v6063_v43 = vcombine.low %v1202_v36, %v1206_v37  ;;  %v1203_v34 = vld [vmem:[%s9817_s7 + $0x48] sm:$0xff]  ;;  %s6015_s20 = sshll.u32 %s9842_s27, 3 }
  0x13   : > { %v633_v6 = vld [vmem:[%s7541_s21] sm:$0xff]  ;;  %v634_v7 = vld [vmem:[%s7541_s21 + $0x8] sm:$0xff]  ;;  %v635_v8 = vld [vmem:[%s7541_s21 + $0x10] sm:$0xff]  ;;  %990 = vmatprep.subr.bf16.mxu1 %v7003_v11  ;;  %s621_s24 = scalar_lea.vmem %s9834_s23, %s6015_s20  ;;  %s9667_s23 = scalar_lea.vmem %s9828_s18, %s6460_s25 }
  0x14   : > { %6673 = vmatprep.mubr.msk.f32.mxu0 %vm657_vm0, %v633_v6  ;;  %v636_v10 = vld [vmem:[%s7541_s21 + $0x18] sm:$0xff]  ;;  %v637_v12 = vld [vmem:[%s7541_s21 + $0x20] sm:$0xff]  ;;  %v638_v13 = vld [vmem:[%s7541_s21 + $0x28] sm:$0xff] }
  0x15   : > { %6674 = vmatmul.mubr.msk.f32.vlgmr.msra.gmra.mrb[0].mxu0 %vm657_vm0, %v634_v7  ;;  %v639_v15 = vld [vmem:[%s7541_s21 + $0x30] sm:$0xff]  ;;  %v640_v16 = vld [vmem:[%s7541_s21 + $0x38] sm:$0xff]  ;;  %v641_v17 = vld [vmem:[%s7541_s21 + $0x40] sm:$0xff] }
  0x16   : > { %6676 = vmatprep.mubr.msk.f32.mxu0 %vm657_vm0, %v635_v8  ;;  %991 = vmatpush1.bf16.msra.mxu1 %v7005_v14  ;;  %v642_v18 = vld [vmem:[%s7541_s21 + $0x48] sm:$0xff]  ;;  %v643_v19 = vld [vmem:[%s7541_s21 + $0x50] sm:$0xff]  ;;  %v644_v20 = vld [vmem:[%s7541_s21 + $0x58] sm:$0xff] }
  0x17   : > { %v645_v21 = vld [vmem:[%s7541_s21 + $0x60] sm:$0xff]  ;;  %v646_v22 = vld [vmem:[%s7541_s21 + $0x68] sm:$0xff]  ;;  %v647_v23 = vld [vmem:[%s7541_s21 + $0x70] sm:$0xff]  ;;  %992 = vmatprep.subr.bf16.mxu1 %v7006_v25  ;;  %1963 = vmatpush1.bf16.msra.mxu0 %v6055_v33 }
  0x18   : > { %v648_v24 = vld [vmem:[%s7541_s21 + $0x78] sm:$0xff]  ;;  %v1214_v42 = vld [vmem:[%s9817_s7 + $0xa0] sm:$0xff]  ;;  %1964 = vmatprep.subr.bf16.mxu0 %v6064_v40  ;;  %v1207_v36 = vld [vmem:[%s9817_s7 + $0x68] sm:$0xff] }
  0x19   : > { %6677 = vmatmul.mubr.msk.f32.gmra.mrb[2].mxu0 %vm657_vm0, %v636_v10  ;;  %v6072_v44 = vcombine.high %v1210_v41, %v1214_v42  ;;  %v1218_v45 = vld [vmem:[%s9817_s7 + $0xc0] sm:$0xff]  ;;  %v6071_v47 = vcombine.low %v1210_v41, %v1214_v42 }
  0x1a   : > { %6679 = vmatprep.mubr.msk.f32.mxu0 %vm657_vm0, %v637_v12  ;;  %993 = vmatpush1.bf16.msra.mxu1 %v7008_v26  ;;  %v1222_v46 = vld [vmem:[%s9817_s7 + $0xe0] sm:$0xff] }
  0x1b   : > { %994 = vmatprep.subr.bf16.mxu1 %v7009_v27  ;;  %1965 = vmatpush1.bf16.msra.mxu0 %v6063_v43  ;;  %v6080_v48 = vcombine.high %v1218_v45, %v1222_v46  ;;  %v1226_v49 = vld [vmem:[%s9817_s7 + $0x100] sm:$0xff]  ;;  %v6079_v51 = vcombine.low %v1218_v45, %v1222_v46  ;;  %v1211_v46 = vld [vmem:[%s9817_s7 + $0x88] sm:$0xff] }
  0x1c   : > { %1966 = vmatprep.subr.bf16.mxu0 %v6072_v44  ;;  %v1230_v50 = vld [vmem:[%s9817_s7 + $0x120] sm:$0xff]  ;;  %v6066_v44 = vcombine.high %v1203_v34, %v1207_v36 }
  0x1d   : > { %6680 = vmatmul.mubr.msk.f32.gmra.mrb[4].mxu0 %vm657_vm0, %v638_v13  ;;  %v6088_v52 = vcombine.high %v1226_v49, %v1230_v50  ;;  %v1234_v53 = vld [vmem:[%s9817_s7 + $0x140] sm:$0xff]  ;;  %v6087_v55 = vcombine.low %v1226_v49, %v1230_v50 }
  0x1e   : > { %6682 = vmatprep.mubr.msk.f32.mxu0 %vm657_vm0, %v639_v15  ;;  %995 = vmatpush1.bf16.msra.mxu1 %v7011_v28  ;;  %v1238_v54 = vld [vmem:[%s9817_s7 + $0x160] sm:$0xff] }
  0x1f   : > { %2075 = vmatprep.subr.bf16.mxu1 %v6058_v39  ;;  %1967 = vmatpush1.bf16.msra.mxu0 %v6071_v47  ;;  %v6096_v56 = vcombine.high %v1234_v53, %v1238_v54  ;;  %v1242_v57 = vld [vmem:[%s9817_s7 + $0x180] sm:$0xff]  ;;  %v6095_v59 = vcombine.low %v1234_v53, %v1238_v54  ;;  %v1215_v47 = vld [vmem:[%s9817_s7 + $0xa8] sm:$0xff] }
  0x20   : > { %1968 = vmatprep.subr.bf16.mxu0 %v6080_v48  ;;  %v1246_v58 = vld [vmem:[%s9817_s7 + $0x1a0] sm:$0xff] }
  0x21   : > { %6683 = vmatmul.mubr.msk.f32.gmra.mrb[6].mxu0 %vm657_vm0, %v640_v16  ;;  %v6104_v60 = vcombine.high %v1242_v57, %v1246_v58  ;;  %v1250_v61 = vld [vmem:[%s9817_s7 + $0x1c0] sm:$0xff]  ;;  %v6103_v63 = vcombine.low %v1242_v57, %v1246_v58  ;;  %v1219_v57 = vld [vmem:[%s9817_s7 + $0xc8] sm:$0xff] }
  0x22   : > { %6685 = vmatprep.mubr.msk.f32.mxu0 %vm657_vm0, %v641_v17  ;;  %v1254_v62 = vld [vmem:[%s9817_s7 + $0x1e0] sm:$0xff]  ;;  %v1223_v58 = vld [vmem:[%s9817_s7 + $0xe8] sm:$0xff] }
  0x23   : > { %1969 = vmatpush1.bf16.msra.mxu0 %v6079_v51  ;;  %v6112_v0 = vcombine.high %v1250_v61, %v1254_v62  ;;  %v1258_v1 = vld [vmem:[%s9817_s7 + $0x200] sm:$0xff]  ;;  %v6111_v3 = vcombine.low %v1250_v61, %v1254_v62 }
  0x24   : > { %1970 = vmatprep.subr.bf16.mxu0 %v6088_v52  ;;  %v1262_v2 = vld [vmem:[%s9817_s7 + $0x220] sm:$0xff]  ;;  %v6065_v52 = vcombine.low %v1203_v34, %v1207_v36 }
  0x25   : > { %6686 = vmatmul.mubr.msk.f32.gmra.mrb[8].mxu0 %vm657_vm0, %v642_v18  ;;  %v6120_v4 = vcombine.high %v1258_v1, %v1262_v2  ;;  %v1266_v5 = vld [vmem:[%s9817_s7 + $0x240] sm:$0xff]  ;;  %v6119_v7 = vcombine.low %v1258_v1, %v1262_v2  ;;  %v1227_v1 = vld [vmem:[%s9817_s7 + $0x108] sm:$0xff] }
  0x26   : > { %6688 = vmatprep.mubr.msk.f32.mxu0 %vm657_vm0, %v643_v19  ;;  %v1270_v6 = vld [vmem:[%s9817_s7 + $0x260] sm:$0xff]  ;;  %v1231_v2 = vld [vmem:[%s9817_s7 + $0x128] sm:$0xff] }
  0x27   : > { %1971 = vmatpush1.bf16.msra.mxu0 %v6087_v55  ;;  %v6128_v8 = vcombine.high %v1266_v5, %v1270_v6  ;;  %v1274_v9 = vld [vmem:[%s9817_s7 + $0x280] sm:$0xff]  ;;  %v6127_v11 = vcombine.low %v1266_v5, %v1270_v6  ;;  %v6074_v55 = vcombine.high %v1211_v46, %v1215_v47 }
  0x28   : > { %1972 = vmatprep.subr.bf16.mxu0 %v6096_v56  ;;  %v1278_v10 = vld [vmem:[%s9817_s7 + $0x2a0] sm:$0xff] }
  0x29   : > { %6689 = vmatmul.mubr.msk.f32.gmra.mrb[10].mxu0 %vm657_vm0, %v644_v20  ;;  %v6136_v12 = vcombine.high %v1274_v9, %v1278_v10  ;;  %v1282_v13 = vld [vmem:[%s9817_s7 + $0x2c0] sm:$0xff]  ;;  %v6135_v15 = vcombine.low %v1274_v9, %v1278_v10  ;;  %v6090_v10 = vcombine.high %v1227_v1, %v1231_v2 }
  0x2a   : > { %6691 = vmatprep.mubr.msk.f32.mxu0 %vm657_vm0, %v645_v21  ;;  %v1286_v14 = vld [vmem:[%s9817_s7 + $0x2e0] sm:$0xff] }
  0x2b   : > { %1973 = vmatpush1.bf16.msra.mxu0 %v6095_v59  ;;  %v6144_v16 = vcombine.high %v1282_v13, %v1286_v14  ;;  %v1290_v17 = vld [vmem:[%s9817_s7 + $0x300] sm:$0xff]  ;;  %v6143_v19 = vcombine.low %v1282_v13, %v1286_v14  ;;  %v1239_v13 = vld [vmem:[%s9817_s7 + $0x168] sm:$0xff] }
  0x2c   : > { %1974 = vmatprep.subr.bf16.mxu0 %v6104_v60  ;;  %v1294_v18 = vld [vmem:[%s9817_s7 + $0x320] sm:$0xff] }
  0x2d   : > { %6692 = vmatmul.mubr.msk.f32.gmra.mrb[12].mxu0 %vm657_vm0, %v646_v22  ;;  %v6152_v20 = vcombine.high %v1290_v17, %v1294_v18  ;;  %v1298_v21 = vld [vmem:[%s9817_s7 + $0x340] sm:$0xff] }
  0x2e   : > { %6694 = vmatprep.mubr.msk.f32.mxu0 %vm657_vm0, %v647_v23  ;;  %v1302_v22 = vld [vmem:[%s9817_s7 + $0x360] sm:$0xff]  ;;  %v6151_v23 = vcombine.low %v1290_v17, %v1294_v18  ;;  %v6089_v18 = vcombine.low %v1227_v1, %v1231_v2 }
  0x2f   : > { %1975 = vmatpush1.bf16.msra.mxu0 %v6103_v63  ;;  %v6159_v25 = vcombine.low %v1298_v21, %v1302_v22  ;;  %v7701_v26 = vld [vmem:[%s9813_s3] ss:$0 sm:$0xff]  ;;  %v6082_v63 = vcombine.high %v1219_v57, %v1223_v58 }
  0x30   : > { %1976 = vmatprep.subr.bf16.mxu0 %v6112_v0 }
  0x31   : > { %6695 = vmatmul.mubr.msk.f32.gmra.mrb[14].mxu0 %vm657_vm0, %v648_v24  ;;  %v6160_v24 = vcombine.high %v1298_v21, %v1302_v22 }
  0x33   : > { %1977 = vmatpush1.bf16.msra.mxu0 %v6111_v3 }
  0x34   : > { %1978 = vmatprep.subr.bf16.mxu0 %v6120_v4 }
  0x37   : > { %1979 = vmatpush1.bf16.msra.mxu0 %v6119_v7  ;;  %v6081_v7 = vcombine.low %v1219_v57, %v1223_v58  ;;  %v1267_v57 = vld [vmem:[%s9817_s7 + $0x248] sm:$0xff] }
  0x38   : > { %1980 = vmatprep.subr.bf16.mxu0 %v6128_v8  ;;  %v1271_v58 = vld [vmem:[%s9817_s7 + $0x268] sm:$0xff] }
  0x3b   : > { %1981 = vmatpush1.bf16.msra.mxu0 %v6127_v11 }
  0x3c   : > { %1982 = vmatprep.subr.bf16.mxu0 %v6136_v12  ;;  %v1235_v12 = vld [vmem:[%s9817_s7 + $0x148] sm:$0xff] }
  0x3d   : > { %v6098_v21 = vcombine.high %v1235_v12, %v1239_v13 }
  0x3f   : > { %1983 = vmatpush1.bf16.msra.mxu0 %v6135_v15 }
  0x40   : > { %1984 = vmatprep.subr.bf16.mxu0 %v6144_v16 }
  0x43   : > { %1985 = vmatpush1.bf16.msra.mxu0 %v6143_v19 }
  0x44   : > { %1986 = vmatprep.subr.bf16.mxu0 %v6152_v20 }
  0x47   : > { %1987 = vmatpush1.bf16.msra.mxu0 %v6151_v23  ;;  %v1243_v23 = vld [vmem:[%s9817_s7 + $0x188] sm:$0xff] }
  0x48   : > { %1988 = vmatprep.subr.bf16.mxu0 %v6160_v24  ;;  %v1247_v24 = vld [vmem:[%s9817_s7 + $0x1a8] sm:$0xff] }
  0x49   : > { %v6106_v36 = vcombine.high %v1243_v23, %v1247_v24 }
  0x4b   : > { %1989 = vmatpush1.bf16.msra.mxu0 %v6159_v25 }
  0xe8   : > { %v6675_v27 = vpop.f32.mrb[0].mxu0 }
  0xe9   : > { %v778_v28 = vadd.f32 %v6675_v27, %v7701_v26  ;;  %v772_v30 = vpop.f32.mrb[1].mxu0 }
  0xea   : > { %v773_v31 = vadd.f32 %v7701_v26, %v772_v30 }
  0xeb   : > { %v852_v33 = vmax.f32 %v778_v28, 0.0 }
  0xec   : > { %v851_v37 = vmax.f32 %v773_v31, 0.0  ;;  %v6678_v39 = vpop.f32.mrb[2].mxu0  ;;  %v6097_v31 = vcombine.low %v1235_v12, %v1239_v13  ;;  %v1306_v13 = vld [vmem:[%s9817_s7 + $0x380] sm:$0xff] }
  0xed   : > { %v788_v40 = vadd.f32 %v6678_v39, %v7701_v26  ;;  %v782_v41 = vpop.f32.mrb[3].mxu0  ;;  %v1251_v39 = vld [vmem:[%s9817_s7 + $0x1c8] sm:$0xff] }
  0xee   : > { %v7712_v42 = vpack.c.bf16 %v852_v33, %v851_v37  ;;  %v783_v43 = vadd.f32 %v7701_v26, %v782_v41 }
  0xef   : > { %v854_v45 = vmax.f32 %v788_v40, 0.0  ;;  %v1255_v40 = vld [vmem:[%s9817_s7 + $0x1e8] sm:$0xff] }
  0xf0   : > { %v853_v48 = vmax.f32 %v783_v43, 0.0  ;;  %6047 = vmatmul.mubr.msk.bf16.vlgmr.msra.gmra.mrb[0].mxu1 %vm959_vm1, %v7712_v42  ;;  %v6681_v49 = vpop.f32.mrb[4].mxu0 }
  0xf1   : > { %v798_v50 = vadd.f32 %v6681_v49, %v7701_v26  ;;  %1026 = vmatprep.mubr.bf16.mxu1 %v7404_v29  ;;  %v792_v51 = vpop.f32.mrb[5].mxu0  ;;  %2076 = vmatpush1.bf16.msra.mxu1 %v6057_v38  ;;  %v6073_v38 = vcombine.low %v1211_v46, %v1215_v47  ;;  %v6105_v46 = vcombine.low %v1243_v23, %v1247_v24  ;;  %v1318_v23 = vld [vmem:[%s9817_s7 + $0x3e0] sm:$0xff]  ;;  %v1315_v24 = vld [vmem:[%s9817_s7 + $0x3c8] sm:$0xff] }
  0xf2   : > { %v7728_v53 = vpack.c.bf16 %v854_v45, %v853_v48  ;;  %v793_v54 = vadd.f32 %v7701_v26, %v792_v51  ;;  %2077 = vmatprep.subr.bf16.mxu1 %v6066_v44  ;;  %v6114_v49 = vcombine.high %v1251_v39, %v1255_v40  ;;  %v1259_v51 = vld [vmem:[%s9817_s7 + $0x208] sm:$0xff] }
  0xf3   : > { %v856_v56 = vmax.f32 %v798_v50, 0.0 }
  0xf4   : > { %v855_v59 = vmax.f32 %v793_v54, 0.0  ;;  %v6684_v60 = vpop.f32.mrb[6].mxu0 }
  0xf5   : > { %v808_v32 = vadd.f32 %v6684_v60, %v7701_v26  ;;  %v802_v35 = vpop.f32.mrb[7].mxu0  ;;  %2078 = vmatpush1.bf16.msra.mxu1 %v6065_v52  ;;  %v1263_v52 = vld [vmem:[%s9817_s7 + $0x228] sm:$0xff]  ;;  %v6130_v60 = vcombine.high %v1267_v57, %v1271_v58 }
  0xf6   : > { %v7738_v61 = vpack.c.bf16 %v856_v56, %v855_v59  ;;  %v803_v62 = vadd.f32 %v7701_v26, %v802_v35  ;;  %2079 = vmatprep.subr.bf16.mxu1 %v6074_v55  ;;  %v6113_v55 = vcombine.low %v1251_v39, %v1255_v40  ;;  %v6122_v56 = vcombine.high %v1259_v51, %v1263_v52  ;;  %v1279_v35 = vld [vmem:[%s9817_s7 + $0x2a8] sm:$0xff]  ;;  %v1201_v40 = vld [vmem:[%s9817_s7 + $0x38] sm:$0xff] }
  0xf7   : > { %v858_v0 = vmax.f32 %v808_v32, 0.0  ;;  %v6121_v59 = vcombine.low %v1259_v51, %v1263_v52  ;;  %v1275_v32 = vld [vmem:[%s9817_s7 + $0x288] sm:$0xff] }
  0xf8   : > { %6048 = vmatmul.mubr.msk.bf16.gmra.mrb[4].mxu1 %vm959_vm1, %v7728_v53  ;;  %v857_v3 = vmax.f32 %v803_v62, 0.0  ;;  %v6687_v4 = vpop.f32.mrb[8].mxu0  ;;  %v6138_v62 = vcombine.high %v1275_v32, %v1279_v35  ;;  %v6137_v1 = vcombine.low %v1275_v32, %v1279_v35 }
  0xf9   : > { %1036 = vmatprep.mubr.bf16.mxu1 %v7404_v29  ;;  %v818_v5 = vadd.f32 %v6687_v4, %v7701_v26  ;;  %v812_v6 = vpop.f32.mrb[9].mxu0  ;;  %2080 = vmatpush1.bf16.msra.mxu1 %v6073_v38  ;;  %v6129_v38 = vcombine.low %v1267_v57, %v1271_v58  ;;  %v1295_v4 = vld [vmem:[%s9817_s7 + $0x328] sm:$0xff] }
  0xfa   : > { %v7751_v8 = vpack.c.bf16 %v858_v0, %v857_v3  ;;  %v813_v9 = vadd.f32 %v7701_v26, %v812_v6  ;;  %2081 = vmatprep.subr.bf16.mxu1 %v6082_v63  ;;  %v1283_v63 = vld [vmem:[%s9817_s7 + $0x2c8] sm:$0xff] }
  0xfb   : > { %v860_v11 = vmax.f32 %v818_v5, 0.0  ;;  %v1287_v0 = vld [vmem:[%s9817_s7 + $0x2e8] sm:$0xff] }
  0xfc   : > { %v859_v14 = vmax.f32 %v813_v9, 0.0  ;;  %v6690_v15 = vpop.f32.mrb[10].mxu0  ;;  %v6146_v2 = vcombine.high %v1283_v63, %v1287_v0  ;;  %v1291_v3 = vld [vmem:[%s9817_s7 + $0x308] sm:$0xff]  ;;  %v6145_v5 = vcombine.low %v1283_v63, %v1287_v0 }
  0xfd   : > { %v828_v16 = vadd.f32 %v6690_v15, %v7701_v26  ;;  %v822_v17 = vpop.f32.mrb[11].mxu0  ;;  %2082 = vmatpush1.bf16.msra.mxu1 %v6081_v7  ;;  %v6154_v6 = vcombine.high %v1291_v3, %v1295_v4  ;;  %v1299_v7 = vld [vmem:[%s9817_s7 + $0x348] sm:$0xff] }
  0xfe   : > { %v7761_v19 = vpack.c.bf16 %v860_v11, %v859_v14  ;;  %v823_v20 = vadd.f32 %v7701_v26, %v822_v17  ;;  %2083 = vmatprep.subr.bf16.mxu1 %v6090_v10  ;;  %v1303_v9 = vld [vmem:[%s9817_s7 + $0x368] sm:$0xff]  ;;  %v6153_v10 = vcombine.low %v1291_v3, %v1295_v4  ;;  %v1310_v14 = vld [vmem:[%s9817_s7 + $0x3a0] sm:$0xff]  ;;  %v1209_v3 = vld [vmem:[%s9817_s7 + $0x78] sm:$0xff] }
  0xff   : > { %v862_v22 = vmax.f32 %v828_v16, 0.0  ;;  %v6162_v11 = vcombine.high %v1299_v7, %v1303_v9  ;;  %v6161_v12 = vcombine.low %v1299_v7, %v1303_v9  ;;  %v1307_v15 = vld [vmem:[%s9817_s7 + $0x388] sm:$0xff]  ;;  %v6168_v16 = vcombine.high %v1306_v13, %v1310_v14 }
 0x100   : > { %6049 = vmatmul.mubr.msk.bf16.gmra.mrb[8].mxu1 %vm959_vm1, %v7738_v61  ;;  %v861_v25 = vmax.f32 %v823_v20, 0.0  ;;  %v6693_v27 = vpop.f32.mrb[12].mxu0  ;;  %v1311_v17 = vld [vmem:[%s9817_s7 + $0x3a8] sm:$0xff] }
 0x101   : > { %1046 = vmatprep.mubr.bf16.mxu1 %v7404_v29  ;;  %v838_v28 = vadd.f32 %v6693_v27, %v7701_v26  ;;  %v832_v30 = vpop.f32.mrb[13].mxu0  ;;  %2084 = vmatpush1.bf16.msra.mxu1 %v6089_v18  ;;  %v6167_v18 = vcombine.low %v1306_v13, %v1310_v14  ;;  %v6169_v20 = vcombine.low %v1307_v15, %v1311_v17  ;;  %v1319_v27 = vld [vmem:[%s9817_s7 + $0x3e8] sm:$0xff] }
 0x102   : > { %v7774_v33 = vpack.c.bf16 %v862_v22, %v861_v25  ;;  %v833_v34 = vadd.f32 %v7701_v26, %v832_v30  ;;  %2085 = vmatprep.subr.bf16.mxu1 %v6098_v21  ;;  %v6170_v21 = vcombine.high %v1307_v15, %v1311_v17  ;;  %1990 = vmatprep.subr.bf16.mxu0 %v6168_v16  ;;  %v1314_v22 = vld [vmem:[%s9817_s7 + $0x3c0] sm:$0xff]  ;;  %v1216_v15 = vld [vmem:[%s9817_s7 + $0xb0] sm:$0xff]  ;;  %v1213_v16 = vld [vmem:[%s9817_s7 + $0x98] sm:$0xff] }
 0x103   : > { %v864_v37 = vmax.f32 %v838_v28, 0.0  ;;  %1991 = vmatpush1.bf16.msra.mxu0 %v6167_v18  ;;  %v6176_v25 = vcombine.high %v1314_v22, %v1318_v23  ;;  %v6175_v28 = vcombine.low %v1314_v22, %v1318_v23  ;;  %v6177_v30 = vcombine.low %v1315_v24, %v1319_v27  ;;  %v1217_v17 = vld [vmem:[%s9817_s7 + $0xb8] sm:$0xff] }
 0x104   : > { %v863_v41 = vmax.f32 %v833_v34, 0.0  ;;  %v6696_v43 = vpop.f32.mrb[14].mxu0  ;;  %v1196_v34 = vld [vmem:[%s9817_s7 + $0x10] sm:$0xff] }
 0x105   : > { %v848_v44 = vadd.f32 %v6696_v43, %v7701_v26  ;;  %v842_v45 = vpop.f32.mrb[15].mxu0  ;;  %2086 = vmatpush1.bf16.msra.mxu1 %v6097_v31  ;;  %v6178_v31 = vcombine.high %v1315_v24, %v1319_v27  ;;  %1992 = vmatprep.subr.bf16.mxu0 %v6176_v25 }
 0x106   : > { %v7784_v47 = vpack.c.bf16 %v864_v37, %v863_v41  ;;  %v843_v48 = vadd.f32 %v7701_v26, %v842_v45  ;;  %2087 = vmatprep.subr.bf16.mxu1 %v6106_v36  ;;  %v1200_v36 = vld [vmem:[%s9817_s7 + $0x30] sm:$0xff]  ;;  %v1197_v37 = vld [vmem:[%s9817_s7 + $0x18] sm:$0xff]  ;;  %v889_v45 = vlaneseq }
 0x107   : > { %v866_v50 = vmax.f32 %v848_v44, 0.0  ;;  %1993 = vmatpush1.bf16.msra.mxu0 %v6175_v28  ;;  %v6060_v39 = vcombine.high %v1196_v34, %v1200_v36  ;;  %v6059_v41 = vcombine.low %v1196_v34, %v1200_v36  ;;  %v6061_v43 = vcombine.low %v1197_v37, %v1201_v40  ;;  %v1224_v36 = vld [vmem:[%s9817_s7 + $0xf0] sm:$0xff] }
 0x108   : > { %6050 = vmatmul.mubr.msk.bf16.gmra.mrb[12].mxu1 %vm959_vm1, %v7751_v8  ;;  %v865_v54 = vmax.f32 %v843_v48, 0.0  ;;  %v6062_v44 = vcombine.high %v1197_v37, %v1201_v40  ;;  %v6078_v28 = vcombine.high %v1213_v16, %v1217_v17  ;;  %v1221_v37 = vld [vmem:[%s9817_s7 + $0xd8] sm:$0xff] }
 0x109   : > { %1056 = vmatprep.mubr.bf16.mxu1 %v7404_v29  ;;  %2088 = vmatpush1.bf16.msra.mxu1 %v6105_v46  ;;  %v7876_v46 = vshrl.u32 %v889_v45, 7 }
 0x10a   : > { %v7796_v26 = vpack.c.bf16 %v866_v50, %v865_v54  ;;  %2089 = vmatprep.subr.bf16.mxu1 %v6114_v49  ;;  %2188 = vmatprep.subr.bf16.mxu0 %v6060_v39  ;;  %v887_v49 = vld [vmem:[%s9815_s5] sm:$0x3]  ;;  %v1225_v39 = vld [vmem:[%s9817_s7 + $0xf8] sm:$0xff] }
 0x10b   : > { %v7879_v48 = vsub.s32 0, %v7876_v46  ;;  %v7885_v50 = vsub.s32 1, %v7876_v46 }
 0x10d   : > { %2090 = vmatpush1.bf16.msra.mxu1 %v6113_v55  ;;  %v7888_v51 = vrot.slane %v887_v49, %v7879_v48  ;;  %v7891_v52 = vrot.slane %v887_v49, %v7885_v50  ;;  %v6077_v49 = vcombine.low %v1213_v16, %v1217_v17 }
 0x10e   : > { %2091 = vmatprep.subr.bf16.mxu1 %v6122_v56 }
 0x110   : > { %6051 = vmatmul.mubr.msk.bf16.gmra.mrb[16].mxu1 %vm959_vm1, %v7761_v19 }
 0x111   : > { %1066 = vmatprep.mubr.bf16.mxu1 %v7404_v29  ;;  %2092 = vmatpush1.bf16.msra.mxu1 %v6121_v59 }
 0x112   : > { %2093 = vmatprep.subr.bf16.mxu1 %v6130_v60 }
 0x115   : > { %2094 = vmatpush1.bf16.msra.mxu1 %v6129_v38 }
 0x116   : > { %2095 = vmatprep.subr.bf16.mxu1 %v6138_v62  ;;  %v1204_v62 = vld [vmem:[%s9817_s7 + $0x50] sm:$0xff] }
 0x118   : > { %6052 = vmatmul.mubr.msk.bf16.gmra.mrb[20].mxu1 %vm959_vm1, %v7774_v33 }
 0x119   : > { %1076 = vmatprep.mubr.bf16.mxu1 %v7404_v29  ;;  %2096 = vmatpush1.bf16.msra.mxu1 %v6137_v1  ;;  %v1208_v1 = vld [vmem:[%s9817_s7 + $0x70] sm:$0xff] }
 0x11a   : > { %2097 = vmatprep.subr.bf16.mxu1 %v6146_v2  ;;  %v1205_v2 = vld [vmem:[%s9817_s7 + $0x58] sm:$0xff]  ;;  %v6067_v22 = vcombine.low %v1204_v62, %v1208_v1 }
 0x11b   : > { %v6069_v23 = vcombine.low %v1205_v2, %v1209_v3 }
 0x11d   : > { %2098 = vmatpush1.bf16.msra.mxu1 %v6145_v5 }
 0x11e   : > { %2099 = vmatprep.subr.bf16.mxu1 %v6154_v6 }
 0x120   : > { %6053 = vmatmul.mubr.msk.bf16.gmra.mrb[24].mxu1 %vm959_vm1, %v7784_v47 }
 0x121   : > { %1086 = vmatprep.mubr.bf16.mxu1 %v7404_v29  ;;  %2100 = vmatpush1.bf16.msra.mxu1 %v6153_v10  ;;  %v6068_v10 = vcombine.high %v1204_v62, %v1208_v1 }
 0x122   : > { %2101 = vmatprep.subr.bf16.mxu1 %v6162_v11  ;;  %v6070_v11 = vcombine.high %v1205_v2, %v1209_v3  ;;  %v6085_v2 = vcombine.low %v1221_v37, %v1225_v39 }
 0x125   : > { %2102 = vmatpush1.bf16.msra.mxu1 %v6161_v12  ;;  %v1212_v12 = vld [vmem:[%s9817_s7 + $0x90] sm:$0xff] }
 0x126   : > { %2103 = vmatprep.subr.bf16.mxu1 %v6170_v21  ;;  %v6076_v27 = vcombine.high %v1212_v12, %v1216_v15 }
 0x128   : > { %6054 = vmatmul.mubr.msk.bf16.gmra.mrb[28].mxu1 %vm959_vm1, %v7796_v26 }
 0x129   : > { %2104 = vmatpush1.bf16.msra.mxu1 %v6169_v20 }
 0x12a   : > { %2105 = vmatprep.subr.bf16.mxu1 %v6178_v31 }
 0x12d   : > { %2106 = vmatpush1.bf16.msra.mxu1 %v6177_v30  ;;  %v1220_v30 = vld [vmem:[%s9817_s7 + $0xd0] sm:$0xff] }
 0x12e   : > { %2301 = vmatprep.subr.bf16.mxu1 %v6062_v44  ;;  %v6075_v44 = vcombine.low %v1212_v12, %v1216_v15  ;;  %v6083_v1 = vcombine.low %v1220_v30, %v1224_v36  ;;  %v1241_v15 = vld [vmem:[%s9817_s7 + $0x178] sm:$0xff] }
 0x1c3   : > { %v1018_v54 = vpop.f32.mrb[0].mxu1 }
 0x1c4   : > { %v1019_v55 = vadd.f32 %v1018_v54, %v7888_v51  ;;  %v1020_v56 = vpop.f32.mrb[1].mxu1 }
 0x1c5   : > { %v1021_v57 = vadd.f32 %v1020_v56, %v7891_v52  ;;  %v1022_v58 = vpop.f32.mrb[2].mxu1  ;;  %v6084_v56 = vcombine.high %v1220_v30, %v1224_v36  ;;  %v1249_v36 = vld [vmem:[%s9817_s7 + $0x1b8] sm:$0xff] }
 0x1c6   : > { %v1023_v59 = vadd.f32 %v1022_v58, %v7888_v51  ;;  %v1024_v60 = vpop.f32.mrb[3].mxu1  ;;  %v1097_v35 = vmax.f32 %v1019_v55, 0.0  ;;  %v1228_v58 = vld [vmem:[%s9817_s7 + $0x110] sm:$0xff] }
 0x1c7   : > { %v1025_v32 = vadd.f32 %v1024_v60, %v7891_v52  ;;  %v1098_v63 = vmax.f32 %v1021_v57, 0.0  ;;  %v6086_v57 = vcombine.high %v1221_v37, %v1225_v39 }
 0x1c8   : > { %v1099_v38 = vmax.f32 %v1023_v59, 0.0 }
 0x1c9   : > { %v1100_v0 = vmax.f32 %v1025_v32, 0.0  ;;  %v1232_v32 = vld [vmem:[%s9817_s7 + $0x130] sm:$0xff] }
 0x1ca   : > { %v7909_v4 = vpack.c.bf16 %v1099_v38, %v1097_v35  ;;  %v1229_v35 = vld [vmem:[%s9817_s7 + $0x118] sm:$0xff] }
 0x1cb   : > { %v7911_v5 = vpack.c.bf16 %v1100_v0, %v1098_v63  ;;  %v1028_v6 = vpop.f32.mrb[4].mxu1  ;;  %v1233_v38 = vld [vmem:[%s9817_s7 + $0x138] sm:$0xff] }
 0x1cc   : > { %v1029_v7 = vadd.f32 %v1028_v6, %v7888_v51  ;;  %v1030_v9 = vpop.f32.mrb[5].mxu1 }
 0x1cd   : > { %v1031_v13 = vadd.f32 %v1030_v9, %v7891_v52  ;;  %v1032_v14 = vpop.f32.mrb[6].mxu1  ;;  %1994 = vmatprep.mubr.bf16.mxu0 %v7911_v5  ;;  %2107 = vmatprep.mubr.bf16.mxu1 %v7911_v5  ;;  %v6094_v9 = vcombine.high %v1229_v35, %v1233_v38 }
 0x1ce   : > { %v1033_v18 = vadd.f32 %v1032_v14, %v7888_v51  ;;  %v1034_v20 = vpop.f32.mrb[7].mxu1  ;;  %1995 = vmatmul.mubr.bf16.vlgmr.msra.gmra.mrb[16].mxu0 %v7909_v4  ;;  %2108 = vmatmul.mubr.bf16.vlgmr.msra.gmra.mrb[32].mxu1 %v7909_v4  ;;  %v1101_v24 = vmax.f32 %v1029_v7, 0.0  ;;  %v6092_v7 = vcombine.high %v1228_v58, %v1232_v32  ;;  %v1237_v14 = vld [vmem:[%s9817_s7 + $0x158] sm:$0xff] }
 0x1cf   : > { %v1035_v21 = vadd.f32 %v1034_v20, %v7891_v52  ;;  %2189 = vmatpush1.bf16.msra.mxu0 %v6059_v41  ;;  %2302 = vmatpush1.bf16.msra.mxu1 %v6061_v43  ;;  %v1102_v31 = vmax.f32 %v1031_v13, 0.0  ;;  %v1240_v13 = vld [vmem:[%s9817_s7 + $0x170] sm:$0xff]  ;;  %v6091_v20 = vcombine.low %v1228_v58, %v1232_v32 }
 0x1d0   : > { %v1103_v25 = vmax.f32 %v1033_v18, 0.0  ;;  %2190 = vmatprep.subr.bf16.mxu0 %v6068_v10  ;;  %2303 = vmatprep.subr.bf16.mxu1 %v6070_v11  ;;  %v1236_v10 = vld [vmem:[%s9817_s7 + $0x150] sm:$0xff] }
 0x1d1   : > { %v1104_v34 = vmax.f32 %v1035_v21, 0.0  ;;  %v6093_v21 = vcombine.low %v1229_v35, %v1233_v38  ;;  %v1252_v58 = vld [vmem:[%s9817_s7 + $0x1d0] sm:$0xff]  ;;  %v1253_v35 = vld [vmem:[%s9817_s7 + $0x1d8] sm:$0xff] }
 0x1d2   : > { %v7945_v40 = vpack.c.bf16 %v1103_v25, %v1101_v24  ;;  %v6100_v24 = vcombine.high %v1236_v10, %v1240_v13  ;;  %v6102_v25 = vcombine.high %v1237_v14, %v1241_v15  ;;  %v1256_v32 = vld [vmem:[%s9817_s7 + $0x1f0] sm:$0xff]  ;;  %v1257_v38 = vld [vmem:[%s9817_s7 + $0x1f8] sm:$0xff] }
 0x1d3   : > { %v7947_v41 = vpack.c.bf16 %v1104_v34, %v1102_v31  ;;  %2191 = vmatpush1.bf16.msra.mxu0 %v6067_v22  ;;  %v1038_v43 = vpop.f32.mrb[8].mxu1  ;;  %2304 = vmatpush1.bf16.msra.mxu1 %v6069_v23  ;;  %v1248_v31 = vld [vmem:[%s9817_s7 + $0x1b0] sm:$0xff]  ;;  %v1245_v34 = vld [vmem:[%s9817_s7 + $0x198] sm:$0xff] }
 0x1d4   : > { %v1039_v54 = vadd.f32 %v1038_v43, %v7888_v51  ;;  %v1040_v55 = vpop.f32.mrb[9].mxu1  ;;  %2192 = vmatprep.subr.bf16.mxu0 %v6076_v27  ;;  %2305 = vmatprep.subr.bf16.mxu1 %v6078_v28  ;;  %v1244_v27 = vld [vmem:[%s9817_s7 + $0x190] sm:$0xff] }
 0x1d5   : > { %v1041_v59 = vadd.f32 %v1040_v55, %v7891_v52  ;;  %v1042_v60 = vpop.f32.mrb[10].mxu1  ;;  %2004 = vmatprep.mubr.bf16.mxu0 %v7947_v41  ;;  %2117 = vmatprep.mubr.bf16.mxu1 %v7947_v41 }
 0x1d6   : > { %v1043_v62 = vadd.f32 %v1042_v60, %v7888_v51  ;;  %v1044_v63 = vpop.f32.mrb[11].mxu1  ;;  %2005 = vmatmul.mubr.bf16.gmra.mrb[20].mxu0 %v7945_v40  ;;  %2118 = vmatmul.mubr.bf16.gmra.mrb[36].mxu1 %v7945_v40  ;;  %v1105_v3 = vmax.f32 %v1039_v54, 0.0 }
 0x1d7   : > { %v1045_v0 = vadd.f32 %v1044_v63, %v7891_v52  ;;  %2193 = vmatpush1.bf16.msra.mxu0 %v6075_v44  ;;  %2306 = vmatpush1.bf16.msra.mxu1 %v6077_v49  ;;  %v1106_v11 = vmax.f32 %v1041_v59, 0.0  ;;  %v6099_v44 = vcombine.low %v1236_v10, %v1240_v13  ;;  %v6101_v49 = vcombine.low %v1237_v14, %v1241_v15  ;;  %v1260_v10 = vld [vmem:[%s9817_s7 + $0x210] sm:$0xff]  ;;  %v1261_v14 = vld [vmem:[%s9817_s7 + $0x218] sm:$0xff] }
 0x1d8   : > { %v1107_v6 = vmax.f32 %v1043_v62, 0.0  ;;  %2194 = vmatprep.subr.bf16.mxu0 %v6084_v56  ;;  %2307 = vmatprep.subr.bf16.mxu1 %v6086_v57  ;;  %v6108_v56 = vcombine.high %v1244_v27, %v1248_v31  ;;  %v6110_v57 = vcombine.high %v1245_v34, %v1249_v36  ;;  %v1264_v13 = vld [vmem:[%s9817_s7 + $0x230] sm:$0xff]  ;;  %v1265_v15 = vld [vmem:[%s9817_s7 + $0x238] sm:$0xff] }
 0x1d9   : > { %v1108_v12 = vmax.f32 %v1045_v0, 0.0 }
 0x1da   : > { %v7981_v16 = vpack.c.bf16 %v1107_v6, %v1105_v3 }
 0x1db   : > { %v7983_v17 = vpack.c.bf16 %v1108_v12, %v1106_v11  ;;  %2195 = vmatpush1.bf16.msra.mxu0 %v6083_v1  ;;  %v1048_v18 = vpop.f32.mrb[12].mxu1  ;;  %2308 = vmatpush1.bf16.msra.mxu1 %v6085_v2  ;;  %v6107_v1 = vcombine.low %v1244_v27, %v1248_v31  ;;  %v6109_v2 = vcombine.low %v1245_v34, %v1249_v36  ;;  %v1272_v36 = vld [vmem:[%s9817_s7 + $0x270] sm:$0xff] }
 0x1dc   : > { %v1049_v22 = vadd.f32 %v1048_v18, %v7888_v51  ;;  %v1050_v23 = vpop.f32.mrb[13].mxu1  ;;  %2196 = vmatprep.subr.bf16.mxu0 %v6092_v7  ;;  %2309 = vmatprep.subr.bf16.mxu1 %v6094_v9  ;;  %v6116_v7 = vcombine.high %v1252_v58, %v1256_v32  ;;  %v6118_v9 = vcombine.high %v1253_v35, %v1257_v38 }
 0x1dd   : > { %v1051_v28 = vadd.f32 %v1050_v23, %v7891_v52  ;;  %v1052_v30 = vpop.f32.mrb[14].mxu1  ;;  %2014 = vmatprep.mubr.bf16.mxu0 %v7983_v17  ;;  %2127 = vmatprep.mubr.bf16.mxu1 %v7983_v17  ;;  %v6117_v23 = vcombine.low %v1253_v35, %v1257_v38  ;;  %v6124_v27 = vcombine.high %v1260_v10, %v1264_v13  ;;  %v1280_v38 = vld [vmem:[%s9817_s7 + $0x2b0] sm:$0xff] }
 0x1de   : > { %v1053_v37 = vadd.f32 %v1052_v30, %v7888_v51  ;;  %v1054_v39 = vpop.f32.mrb[15].mxu1  ;;  %2015 = vmatmul.mubr.bf16.gmra.mrb[24].mxu0 %v7981_v16  ;;  %2128 = vmatmul.mubr.bf16.gmra.mrb[40].mxu1 %v7981_v16  ;;  %v1109_v54 = vmax.f32 %v1049_v22, 0.0  ;;  %v6115_v22 = vcombine.low %v1252_v58, %v1256_v32  ;;  %v1268_v30 = vld [vmem:[%s9817_s7 + $0x250] sm:$0xff] }
 0x1df   : > { %v1055_v43 = vadd.f32 %v1054_v39, %v7891_v52  ;;  %2197 = vmatpush1.bf16.msra.mxu0 %v6091_v20  ;;  %2310 = vmatpush1.bf16.msra.mxu1 %v6093_v21  ;;  %v1110_v59 = vmax.f32 %v1051_v28, 0.0  ;;  %v6126_v28 = vcombine.high %v1261_v14, %v1265_v15  ;;  %v1273_v39 = vld [vmem:[%s9817_s7 + $0x278] sm:$0xff]  ;;  %v6132_v58 = vcombine.high %v1268_v30, %v1272_v36 }
 0x1e0   : > { %v1111_v55 = vmax.f32 %v1053_v37, 0.0  ;;  %2198 = vmatprep.subr.bf16.mxu0 %v6100_v24  ;;  %2311 = vmatprep.subr.bf16.mxu1 %v6102_v25  ;;  %v1269_v37 = vld [vmem:[%s9817_s7 + $0x258] sm:$0xff] }
 0x1e1   : > { %v1112_v60 = vmax.f32 %v1055_v43, 0.0 }
 0x1e2   : > { %v8017_v62 = vpack.c.bf16 %v1111_v55, %v1109_v54  ;;  %v6123_v54 = vcombine.low %v1260_v10, %v1264_v13  ;;  %v6125_v55 = vcombine.low %v1261_v14, %v1265_v15  ;;  %v1284_v14 = vld [vmem:[%s9817_s7 + $0x2d0] sm:$0xff] }
 0x1e3   : > { %v8019_v63 = vpack.c.bf16 %v1112_v60, %v1110_v59  ;;  %2199 = vmatpush1.bf16.msra.mxu0 %v6099_v44  ;;  %v1058_v0 = vpop.f32.mrb[16].mxu1  ;;  %2312 = vmatpush1.bf16.msra.mxu1 %v6101_v49  ;;  %v6134_v59 = vcombine.high %v1269_v37, %v1273_v39  ;;  %v1276_v60 = vld [vmem:[%s9817_s7 + $0x290] sm:$0xff] }
 0x1e4   : > { %v1059_v3 = vadd.f32 %v1058_v0, %v7888_v51  ;;  %v1060_v6 = vpop.f32.mrb[17].mxu1  ;;  %2200 = vmatprep.subr.bf16.mxu0 %v6108_v56  ;;  %2313 = vmatprep.subr.bf16.mxu1 %v6110_v57  ;;  %v1277_v0 = vld [vmem:[%s9817_s7 + $0x298] sm:$0xff] }
 0x1e5   : > { %v1061_v11 = vadd.f32 %v1060_v6, %v7891_v52  ;;  %v1062_v12 = vpop.f32.mrb[18].mxu1  ;;  %2024 = vmatprep.mubr.bf16.mxu0 %v8019_v63  ;;  %2137 = vmatprep.mubr.bf16.mxu1 %v8019_v63 }
 0x1e6   : > { %v1063_v18 = vadd.f32 %v1062_v12, %v7888_v51  ;;  %v1064_v20 = vpop.f32.mrb[19].mxu1  ;;  %2025 = vmatmul.mubr.bf16.gmra.mrb[28].mxu0 %v8017_v62  ;;  %2138 = vmatmul.mubr.bf16.gmra.mrb[44].mxu1 %v8017_v62  ;;  %v1113_v24 = vmax.f32 %v1059_v3, 0.0  ;;  %v6140_v12 = vcombine.high %v1276_v60, %v1280_v38 }
 0x1e7   : > { %v1065_v21 = vadd.f32 %v1064_v20, %v7891_v52  ;;  %2201 = vmatpush1.bf16.msra.mxu0 %v6107_v1  ;;  %2314 = vmatpush1.bf16.msra.mxu1 %v6109_v2  ;;  %v1114_v31 = vmax.f32 %v1061_v11, 0.0  ;;  %v1281_v1 = vld [vmem:[%s9817_s7 + $0x2b8] sm:$0xff]  ;;  %v1288_v20 = vld [vmem:[%s9817_s7 + $0x2f0] sm:$0xff] }
 0x1e8   : > { %v1115_v25 = vmax.f32 %v1063_v18, 0.0  ;;  %2202 = vmatprep.subr.bf16.mxu0 %v6116_v7  ;;  %2315 = vmatprep.subr.bf16.mxu1 %v6118_v9  ;;  %v6131_v7 = vcombine.low %v1268_v30, %v1272_v36  ;;  %v6133_v9 = vcombine.low %v1269_v37, %v1273_v39  ;;  %v6142_v13 = vcombine.high %v1277_v0, %v1281_v1  ;;  %v1292_v37 = vld [vmem:[%s9817_s7 + $0x310] sm:$0xff] }
 0x1e9   : > { %v1116_v34 = vmax.f32 %v1065_v21, 0.0  ;;  %v1285_v21 = vld [vmem:[%s9817_s7 + $0x2d8] sm:$0xff] }
 0x1ea   : > { %v8053_v43 = vpack.c.bf16 %v1115_v25, %v1113_v24 }
 0x1eb   : > { %v8055_v44 = vpack.c.bf16 %v1116_v34, %v1114_v31  ;;  %2203 = vmatpush1.bf16.msra.mxu0 %v6115_v22  ;;  %v1068_v49 = vpop.f32.mrb[20].mxu1  ;;  %2316 = vmatpush1.bf16.msra.mxu1 %v6117_v23  ;;  %v1289_v22 = vld [vmem:[%s9817_s7 + $0x2f8] sm:$0xff]  ;;  %v6148_v34 = vcombine.high %v1284_v14, %v1288_v20 }
 0x1ec   : > { %v1069_v56 = vadd.f32 %v1068_v49, %v7888_v51  ;;  %v1070_v57 = vpop.f32.mrb[21].mxu1  ;;  %2204 = vmatprep.subr.bf16.mxu0 %v6124_v27  ;;  %2317 = vmatprep.subr.bf16.mxu1 %v6126_v28  ;;  %v6139_v27 = vcombine.low %v1276_v60, %v1280_v38  ;;  %v6141_v28 = vcombine.low %v1277_v0, %v1281_v1 }
 0x1ed   : > { %v1071_v32 = vadd.f32 %v1070_v57, %v7891_v52  ;;  %v1072_v35 = vpop.f32.mrb[22].mxu1  ;;  %2034 = vmatprep.mubr.bf16.mxu0 %v8055_v44  ;;  %2147 = vmatprep.mubr.bf16.mxu1 %v8055_v44  ;;  %v6150_v36 = vcombine.high %v1285_v21, %v1289_v22  ;;  %v6147_v60 = vcombine.low %v1284_v14, %v1288_v20 }
 0x1ee   : > { %v1073_v2 = vadd.f32 %v1072_v35, %v7888_v51  ;;  %v1074_v3 = vpop.f32.mrb[23].mxu1  ;;  %2035 = vmatmul.mubr.bf16.gmra.mrb[32].mxu0 %v8053_v43  ;;  %2148 = vmatmul.mubr.bf16.gmra.mrb[48].mxu1 %v8053_v43  ;;  %v1117_v10 = vmax.f32 %v1069_v56, 0.0  ;;  %v1297_v56 = vld [vmem:[%s9817_s7 + $0x338] sm:$0xff] }
 0x1ef   : > { %v1075_v6 = vadd.f32 %v1074_v3, %v7891_v52  ;;  %2205 = vmatpush1.bf16.msra.mxu0 %v6123_v54  ;;  %2318 = vmatpush1.bf16.msra.mxu1 %v6125_v55  ;;  %v1118_v15 = vmax.f32 %v1071_v32, 0.0  ;;  %v1296_v54 = vld [vmem:[%s9817_s7 + $0x330] sm:$0xff]  ;;  %v1293_v55 = vld [vmem:[%s9817_s7 + $0x318] sm:$0xff]  ;;  %v6149_v32 = vcombine.low %v1285_v21, %v1289_v22 }
 0x1f0   : > { %v1119_v11 = vmax.f32 %v1073_v2, 0.0  ;;  %2206 = vmatprep.subr.bf16.mxu0 %v6132_v58  ;;  %2319 = vmatprep.subr.bf16.mxu1 %v6134_v59  ;;  %v6156_v0 = vcombine.high %v1292_v37, %v1296_v54  ;;  %v6158_v1 = vcombine.high %v1293_v55, %v1297_v56  ;;  %v1300_v2 = vld [vmem:[%s9817_s7 + $0x350] sm:$0xff]  ;;  %v6155_v14 = vcombine.low %v1292_v37, %v1296_v54 }
 0x1f1   : > { %v1120_v18 = vmax.f32 %v1075_v6, 0.0 }
 0x1f2   : > { %v8089_v23 = vpack.c.bf16 %v1119_v11, %v1117_v10  ;;  %v1305_v10 = vld [vmem:[%s9817_s7 + $0x378] sm:$0xff] }
 0x1f3   : > { %v8091_v24 = vpack.c.bf16 %v1120_v18, %v1118_v15  ;;  %2207 = vmatpush1.bf16.msra.mxu0 %v6131_v7  ;;  %v1078_v25 = vpop.f32.mrb[24].mxu1  ;;  %2320 = vmatpush1.bf16.msra.mxu1 %v6133_v9  ;;  %v1304_v7 = vld [vmem:[%s9817_s7 + $0x370] sm:$0xff]  ;;  %v1301_v9 = vld [vmem:[%s9817_s7 + $0x358] sm:$0xff]  ;;  %v6157_v15 = vcombine.low %v1293_v55, %v1297_v56 }
 0x1f4   : > { %v1079_v30 = vadd.f32 %v1078_v25, %v7888_v51  ;;  %v1080_v31 = vpop.f32.mrb[25].mxu1  ;;  %2208 = vmatprep.subr.bf16.mxu0 %v6140_v12  ;;  %2321 = vmatprep.subr.bf16.mxu1 %v6142_v13  ;;  %v6164_v21 = vcombine.high %v1300_v2, %v1304_v7  ;;  %v6166_v22 = vcombine.high %v1301_v9, %v1305_v10  ;;  %v1308_v25 = vld [vmem:[%s9817_s7 + $0x390] sm:$0xff] }
 0x1f5   : > { %v1081_v39 = vadd.f32 %v1080_v31, %v7891_v52  ;;  %v1082_v49 = vpop.f32.mrb[26].mxu1  ;;  %2044 = vmatprep.mubr.bf16.mxu0 %v8091_v24  ;;  %2157 = vmatprep.mubr.bf16.mxu1 %v8091_v24  ;;  %v1309_v31 = vld [vmem:[%s9817_s7 + $0x398] sm:$0xff]  ;;  %v6165_v54 = vcombine.low %v1301_v9, %v1305_v10  ;;  %v1150_v9 = vld [vmem:[%s9816_s6 + $0x20] sm:$0xff]  ;;  %v1147_v10 = vld [vmem:[%s9816_s6 + $0x8] sm:$0xff] }
 0x1f6   : > { %v1083_v57 = vadd.f32 %v1082_v49, %v7888_v51  ;;  %v1084_v58 = vpop.f32.mrb[27].mxu1  ;;  %2045 = vmatmul.mubr.bf16.gmra.mrb[36].mxu0 %v8089_v23  ;;  %2158 = vmatmul.mubr.bf16.gmra.mrb[52].mxu1 %v8089_v23  ;;  %v1121_v35 = vmax.f32 %v1079_v30, 0.0  ;;  %v1312_v30 = vld [vmem:[%s9817_s7 + $0x3b0] sm:$0xff]  ;;  %v6163_v49 = vcombine.low %v1300_v2, %v1304_v7  ;;  %v1146_v7 = vld [vmem:[%s9816_s6] sm:$0xff] }
 0x1f7   : > { %v1085_v59 = vadd.f32 %v1084_v58, %v7891_v52  ;;  %2209 = vmatpush1.bf16.msra.mxu0 %v6139_v27  ;;  %2322 = vmatpush1.bf16.msra.mxu1 %v6141_v28  ;;  %v1122_v3 = vmax.f32 %v1081_v39, 0.0 }
 0x1f8   : > { %v1123_v38 = vmax.f32 %v1083_v57, 0.0  ;;  %2210 = vmatprep.subr.bf16.mxu0 %v6148_v34  ;;  %2323 = vmatprep.subr.bf16.mxu1 %v6150_v36  ;;  %v1313_v34 = vld [vmem:[%s9817_s7 + $0x3b8] sm:$0xff]  ;;  %v6172_v57 = vcombine.high %v1308_v25, %v1312_v30 }
 0x1f9   : > { %v1124_v6 = vmax.f32 %v1085_v59, 0.0  ;;  %v6174_v58 = vcombine.high %v1309_v31, %v1313_v34  ;;  %v6173_v2 = vcombine.low %v1309_v31, %v1313_v34  ;;  %v1166_v31 = vld [vmem:[%s9816_s6 + $0xa0] sm:$0xff] }
 0x1fa   : > { %v8125_v11 = vpack.c.bf16 %v1123_v38, %v1121_v35  ;;  %v1317_v35 = vld [vmem:[%s9817_s7 + $0x3d8] sm:$0xff] }
 0x1fb   : > { %v8127_v12 = vpack.c.bf16 %v1124_v6, %v1122_v3  ;;  %2211 = vmatpush1.bf16.msra.mxu0 %v6147_v60  ;;  %v1088_v13 = vpop.f32.mrb[28].mxu1  ;;  %2324 = vmatpush1.bf16.msra.mxu1 %v6149_v32  ;;  %v1321_v38 = vld [vmem:[%s9817_s7 + $0x3f8] sm:$0xff] }
 0x1fc   : > { %v1089_v18 = vadd.f32 %v1088_v13, %v7888_v51  ;;  %v1090_v20 = vpop.f32.mrb[29].mxu1  ;;  %2212 = vmatprep.subr.bf16.mxu0 %v6156_v0  ;;  %2325 = vmatprep.subr.bf16.mxu1 %v6158_v1  ;;  %v6171_v1 = vcombine.low %v1308_v25, %v1312_v30  ;;  %v6182_v6 = vcombine.high %v1317_v35, %v1321_v38  ;;  %v1151_v13 = vld [vmem:[%s9816_s6 + $0x28] sm:$0xff]  ;;  %v1162_v30 = vld [vmem:[%s9816_s6 + $0x80] sm:$0xff] }
 0x1fd   : > { %v1091_v27 = vadd.f32 %v1090_v20, %v7891_v52  ;;  %v1092_v28 = vpop.f32.mrb[30].mxu1  ;;  %2054 = vmatprep.mubr.bf16.mxu0 %v8127_v12  ;;  %2167 = vmatprep.mubr.bf16.mxu1 %v8127_v12  ;;  %v6186_v20 = vcombine.high %v1147_v10, %v1151_v13  ;;  %v6183_v25 = vcombine.low %v1146_v7, %v1150_v9 }
 0x1fe   : > { %v1093_v36 = vadd.f32 %v1092_v28, %v7888_v51  ;;  %v1094_v37 = vpop.f32.mrb[31].mxu1  ;;  %2055 = vmatmul.mubr.bf16.gmra.mrb[40].mxu0 %v8125_v11  ;;  %2168 = vmatmul.mubr.bf16.gmra.mrb[56].mxu1 %v8125_v11  ;;  %v1125_v55 = vmax.f32 %v1089_v18, 0.0  ;;  %v1316_v51 = vld [vmem:[%s9817_s7 + $0x3d0] sm:$0xff]  ;;  %v6184_v18 = vcombine.high %v1146_v7, %v1150_v9  ;;  %v6185_v34 = vcombine.low %v1147_v10, %v1151_v13  ;;  %v1190_v9 = vld [vmem:[%s9816_s6 + $0x160] sm:$0xff]  ;;  %v1191_v13 = vld [vmem:[%s9816_s6 + $0x168] sm:$0xff] }
 0x1ff   : > { %v1095_v39 = vadd.f32 %v1094_v37, %v7891_v52  ;;  %2213 = vmatpush1.bf16.msra.mxu0 %v6155_v14  ;;  %2326 = vmatpush1.bf16.msra.mxu1 %v6157_v15  ;;  %v1126_v59 = vmax.f32 %v1091_v27, 0.0  ;;  %v1320_v52 = vld [vmem:[%s9817_s7 + $0x3f0] sm:$0xff]  ;;  %v6181_v15 = vcombine.low %v1317_v35, %v1321_v38  ;;  %v1155_v27 = vld [vmem:[%s9816_s6 + $0x48] sm:$0xff]  ;;  %v1182_v35 = vld [vmem:[%s9816_s6 + $0x120] sm:$0xff] }
 0x200   : > { %v1127_v56 = vmax.f32 %v1093_v36, 0.0  ;;  %2214 = vmatprep.subr.bf16.mxu0 %v6164_v21  ;;  %2327 = vmatprep.subr.bf16.mxu1 %v6166_v22  ;;  %v6180_v3 = vcombine.high %v1316_v51, %v1320_v52  ;;  %v6179_v14 = vcombine.low %v1316_v51, %v1320_v52  ;;  %v1154_v21 = vld [vmem:[%s9816_s6 + $0x40] sm:$0xff] }
 0x201   : > { %v1128_v60 = vmax.f32 %v1095_v39, 0.0  ;;  %v1158_v22 = vld [vmem:[%s9816_s6 + $0x60] sm:$0xff]  ;;  %v1163_v39 = vld [vmem:[%s9816_s6 + $0x88] sm:$0xff] }
 0x202   : > { %v8152_v32 = vpack.c.bf16 %v1127_v56, %v1125_v55  ;;  %v6192_v28 = vcombine.high %v1154_v21, %v1158_v22  ;;  %v6191_v37 = vcombine.low %v1154_v21, %v1158_v22  ;;  %v1174_v56 = vld [vmem:[%s9816_s6 + $0xe0] sm:$0xff]  ;;  %v1148_v21 = vld [vmem:[%s9816_s6 + $0x10] sm:$0xff] }
 0x203   : > { %v8163_v0 = vpack.c.bf16 %v1128_v60, %v1126_v59  ;;  %2215 = vmatpush1.bf16.msra.mxu0 %v6163_v49  ;;  %2328 = vmatpush1.bf16.msra.mxu1 %v6165_v54  ;;  %v1167_v49 = vld [vmem:[%s9816_s6 + $0xa8] sm:$0xff]  ;;  %v6200_v54 = vcombine.high %v1162_v30, %v1166_v31  ;;  %v6199_v59 = vcombine.low %v1162_v30, %v1166_v31  ;;  %v1178_v52 = vld [vmem:[%s9816_s6 + $0x100] sm:$0xff]  ;;  %v1152_v22 = vld [vmem:[%s9816_s6 + $0x30] sm:$0xff] }
 0x204   : > { %2216 = vmatprep.subr.bf16.mxu0 %v6172_v57  ;;  %2329 = vmatprep.subr.bf16.mxu1 %v6174_v58  ;;  %v6202_v57 = vcombine.high %v1163_v39, %v1167_v49  ;;  %v1171_v58 = vld [vmem:[%s9816_s6 + $0xc8] sm:$0xff]  ;;  %v6201_v51 = vcombine.low %v1163_v39, %v1167_v49  ;;  %v6188_v30 = vcombine.high %v1148_v21, %v1152_v22  ;;  %v1165_v31 = vld [vmem:[%s9816_s6 + $0x98] sm:$0xff] }
 0x205   : > { %2064 = vmatprep.mubr.bf16.mxu0 %v8163_v0  ;;  %2177 = vmatprep.mubr.bf16.mxu1 %v8163_v0 }
 0x206   : > { %2065 = vmatmul.mubr.bf16.gmra.mrb[44].mxu0 %v8152_v32  ;;  %2178 = vmatmul.mubr.bf16.gmra.mrb[60].mxu1 %v8152_v32 }
 0x207   : > { %2217 = vmatpush1.bf16.msra.mxu0 %v6171_v1  ;;  %2220 = vmatprep.mubr.bf16.mxu0 %v7911_v5  ;;  %v1179_v1 = vld [vmem:[%s9816_s6 + $0x108] sm:$0xff] }
 0x208   : > { %2330 = vmatpush1.bf16.msra.mxu1 %v6173_v2  ;;  %2333 = vmatprep.mubr.bf16.mxu1 %v7911_v5  ;;  %v1159_v5 = vld [vmem:[%s9816_s6 + $0x68] sm:$0xff] }
 0x209   : > { %2218 = vmatprep.subr.bf16.mxu0 %v6180_v3  ;;  %2331 = vmatprep.subr.bf16.mxu1 %v6182_v6  ;;  %v6194_v36 = vcombine.high %v1155_v27, %v1159_v5  ;;  %v6193_v55 = vcombine.low %v1155_v27, %v1159_v5  ;;  %v1183_v2 = vld [vmem:[%s9816_s6 + $0x128] sm:$0xff]  ;;  %v6216_v6 = vcombine.high %v1178_v52, %v1182_v35  ;;  %v1153_v27 = vld [vmem:[%s9816_s6 + $0x38] sm:$0xff] }
 0x20a   : > { %v6218_v10 = vcombine.high %v1179_v1, %v1183_v2 }
 0x20b   : > { %2219 = vmatpush1.bf16.msra.mxu0 %v6179_v14  ;;  %v6215_v14 = vcombine.low %v1178_v52, %v1182_v35  ;;  %v1181_v52 = vld [vmem:[%s9816_s6 + $0x118] sm:$0xff] }
 0x20c   : > { %2332 = vmatpush1.bf16.msra.mxu1 %v6181_v15  ;;  %2654 = vmatprep.subr.bf16.mxu0 %v6184_v18  ;;  %v6217_v18 = vcombine.low %v1179_v1, %v1183_v2  ;;  %v1185_v35 = vld [vmem:[%s9816_s6 + $0x138] sm:$0xff] }
 0x20d   : > { %2767 = vmatprep.subr.bf16.mxu1 %v6186_v20 }
 0x20e   : > { %2221 = vmatmul.mubr.bf16.vlgmr.msra.gmra.mrb[48].mxu0 %v7909_v4 }
 0x20f   : > { %2334 = vmatmul.mubr.bf16.vlgmr.msra.gmra.mrb[64].mxu1 %v7909_v4  ;;  %2655 = vmatpush1.bf16.msra.mxu0 %v6183_v25  ;;  %v1170_v4 = vld [vmem:[%s9816_s6 + $0xc0] sm:$0xff]  ;;  %v1149_v25 = vld [vmem:[%s9816_s6 + $0x18] sm:$0xff] }
 0x210   : > { %2230 = vmatprep.mubr.bf16.mxu0 %v7947_v41  ;;  %2343 = vmatprep.mubr.bf16.mxu1 %v7947_v41  ;;  %v1175_v41 = vld [vmem:[%s9816_s6 + $0xe8] sm:$0xff]  ;;  %v6208_v60 = vcombine.high %v1170_v4, %v1174_v56  ;;  %v6207_v3 = vcombine.low %v1170_v4, %v1174_v56  ;;  %v1173_v4 = vld [vmem:[%s9816_s6 + $0xd8] sm:$0xff] }
 0x211   : > { %2656 = vmatprep.subr.bf16.mxu0 %v6192_v28  ;;  %2768 = vmatpush1.bf16.msra.mxu1 %v6185_v34  ;;  %v6210_v38 = vcombine.high %v1171_v58, %v1175_v41  ;;  %v6209_v7 = vcombine.low %v1171_v58, %v1175_v41  ;;  %v1169_v34 = vld [vmem:[%s9816_s6 + $0xb8] sm:$0xff] }
 0x212   : > { %2769 = vmatprep.subr.bf16.mxu1 %v6194_v36  ;;  %v6206_v49 = vcombine.high %v1165_v31, %v1169_v34  ;;  %v1177_v56 = vld [vmem:[%s9816_s6 + $0xf8] sm:$0xff]  ;;  %v6205_v58 = vcombine.low %v1165_v31, %v1169_v34  ;;  %v7050_v31 = vld [vmem:[%s9818_s8 + $0xc4] ss:$8 sps:$4 sm:$0xff]   ;;  %v7048_v34 = vld [vmem:[%s9818_s8 + $0xc0] ss:$8 sps:$4 sm:$0xff]  }
 0x213   : > { %2657 = vmatpush1.bf16.msra.mxu0 %v6191_v37  ;;  %v6213_v1 = vcombine.low %v1173_v4, %v1177_v56 }
 0x214   : > { %2658 = vmatprep.subr.bf16.mxu0 %v6200_v54  ;;  %v1172_v54 = vld [vmem:[%s9816_s6 + $0xd0] sm:$0xff] }
 0x215   : > { %2770 = vmatpush1.bf16.msra.mxu1 %v6193_v55  ;;  %v1176_v55 = vld [vmem:[%s9816_s6 + $0xf0] sm:$0xff] }
 0x216   : > { %2231 = vmatmul.mubr.bf16.gmra.mrb[52].mxu0 %v7945_v40  ;;  %2771 = vmatprep.subr.bf16.mxu1 %v6202_v57  ;;  %v6212_v41 = vcombine.high %v1172_v54, %v1176_v55 }
 0x217   : > { %2344 = vmatmul.mubr.bf16.gmra.mrb[68].mxu1 %v7945_v40  ;;  %2240 = vmatprep.mubr.bf16.mxu0 %v7983_v17  ;;  %v1186_v40 = vld [vmem:[%s9816_s6 + $0x140] sm:$0xff] }
 0x218   : > { %2353 = vmatprep.mubr.bf16.mxu1 %v7983_v17  ;;  %2659 = vmatpush1.bf16.msra.mxu0 %v6199_v59  ;;  %v1187_v17 = vld [vmem:[%s9816_s6 + $0x148] sm:$0xff]  ;;  %v6224_v15 = vcombine.high %v1186_v40, %v1190_v9  ;;  %v6223_v5 = vcombine.low %v1186_v40, %v1190_v9  ;;  %v6214_v59 = vcombine.high %v1173_v4, %v1177_v56  ;;  %v1189_v40 = vld [vmem:[%s9816_s6 + $0x158] sm:$0xff] }
 0x219   : > { %2660 = vmatprep.subr.bf16.mxu0 %v6208_v60  ;;  %2772 = vmatpush1.bf16.msra.mxu1 %v6201_v51  ;;  %v6226_v20 = vcombine.high %v1187_v17, %v1191_v13  ;;  %v6225_v28 = vcombine.low %v1187_v17, %v1191_v13  ;;  %v1180_v60 = vld [vmem:[%s9816_s6 + $0x110] sm:$0xff]  ;;  %v1193_v9 = vld [vmem:[%s9816_s6 + $0x178] sm:$0xff]  ;;  %v6221_v17 = vcombine.low %v1181_v52, %v1185_v35 }
 0x21a   : > { %2773 = vmatprep.subr.bf16.mxu1 %v6210_v38  ;;  %v1184_v51 = vld [vmem:[%s9816_s6 + $0x130] sm:$0xff]  ;;  %v6211_v38 = vcombine.low %v1172_v54, %v1176_v55  ;;  %v8544_v54 = vld [vmem:[%s621_s24] sm:$0xff]  ;;  %v3121_v55 = vsub.s32 3, %v7876_v46 }
 0x21b   : > { %v6220_v2 = vcombine.high %v1180_v60, %v1184_v51  ;;  %v8550_v4 = vrot.slane %v8544_v54, %v7879_v48 }
 0x21c   : > { %2661 = vmatpush1.bf16.msra.mxu0 %v6207_v3  ;;  %v6222_v3 = vcombine.high %v1181_v52, %v1185_v35 }
 0x21d   : > { %2662 = vmatprep.subr.bf16.mxu0 %v6216_v6  ;;  %2774 = vmatpush1.bf16.msra.mxu1 %v6209_v7  ;;  %v1188_v6 = vld [vmem:[%s9816_s6 + $0x150] sm:$0xff] }
 0x21e   : > { %2241 = vmatmul.mubr.bf16.gmra.mrb[56].mxu0 %v7981_v16  ;;  %2775 = vmatprep.subr.bf16.mxu1 %v6218_v10  ;;  %v1192_v7 = vld [vmem:[%s9816_s6 + $0x170] sm:$0xff]  ;;  %v6219_v10 = vcombine.low %v1180_v60, %v1184_v51 }
 0x21f   : > { %2354 = vmatmul.mubr.bf16.gmra.mrb[72].mxu1 %v7981_v16  ;;  %2250 = vmatprep.mubr.bf16.mxu0 %v8019_v63  ;;  %v6190_v16 = vcombine.high %v1149_v25, %v1153_v27  ;;  %v6228_v13 = vcombine.high %v1188_v6, %v1192_v7 }
 0x220   : > { %2363 = vmatprep.mubr.bf16.mxu1 %v8019_v63  ;;  %2663 = vmatpush1.bf16.msra.mxu0 %v6215_v14  ;;  %v1160_v63 = vld [vmem:[%s9816_s6 + $0x70] sm:$0xff]  ;;  %v6230_v14 = vcombine.high %v1189_v40, %v1193_v9 }
 0x221   : > { %2664 = vmatprep.subr.bf16.mxu0 %v6224_v15  ;;  %2776 = vmatpush1.bf16.msra.mxu1 %v6217_v18  ;;  %v6227_v15 = vcombine.low %v1188_v6, %v1192_v7  ;;  %v6229_v18 = vcombine.low %v1189_v40, %v1193_v9  ;;  %v7108_v40 = vld [vmem:[%s9820_s10 + $0x40] sm:$0xff]  }
 0x222   : > { %2777 = vmatprep.subr.bf16.mxu1 %v6226_v20  ;;  %v7014_v20 = vld [vmem:[%s9818_s8 + $0x4] ss:$8 sps:$4 sm:$0xff]  }
 0x223   : > { %v7109_v9 = vld [vmem:[%s9820_s10] sm:$0xff]  }
 0x224   : > { %2665 = vmatpush1.bf16.msra.mxu0 %v6223_v5  ;;  %v7018_v5 = vld [vmem:[%s9818_s8 + $0x20] ss:$8 sps:$4 sm:$0xff]  }
 0x225   : > { %2778 = vmatpush1.bf16.msra.mxu1 %v6225_v28  ;;  %2880 = vmatprep.subr.bf16.mxu0 %v6188_v30  ;;  %v7021_v28 = vld [vmem:[%s9818_s8 + $0x30] ss:$8 sps:$4 sm:$0xff]   ;;  %v7026_v30 = vld [vmem:[%s9818_s8 + $0x44] ss:$8 sps:$4 sm:$0xff]  }
 0x226   : > { %2251 = vmatmul.mubr.bf16.gmra.mrb[60].mxu0 %v8017_v62  ;;  %2993 = vmatprep.subr.bf16.mxu1 %v6190_v16  ;;  %v7024_v16 = vld [vmem:[%s9818_s8 + $0x40] ss:$8 sps:$4 sm:$0xff]  }
 0x227   : > { %2364 = vmatmul.mubr.bf16.gmra.mrb[76].mxu1 %v8017_v62  ;;  %2260 = vmatprep.mubr.bf16.mxu0 %v8055_v44  ;;  %v1156_v62 = vld [vmem:[%s9816_s6 + $0x50] sm:$0xff] }
 0x228   : > { %2373 = vmatprep.mubr.bf16.mxu1 %v8055_v44  ;;  %v1161_v44 = vld [vmem:[%s9816_s6 + $0x78] sm:$0xff]  ;;  %v6195_v36 = vcombine.low %v1156_v62, %v1160_v63 }
 0x22e   : > { %2261 = vmatmul.mubr.bf16.gmra.mrb[64].mxu0 %v8053_v43 }
 0x22f   : > { %2374 = vmatmul.mubr.bf16.gmra.mrb[80].mxu1 %v8053_v43  ;;  %2270 = vmatprep.mubr.bf16.mxu0 %v8091_v24  ;;  %v1157_v43 = vld [vmem:[%s9816_s6 + $0x58] sm:$0xff] }
 0x230   : > { %2383 = vmatprep.mubr.bf16.mxu1 %v8091_v24  ;;  %v6189_v24 = vcombine.low %v1149_v25, %v1153_v27  ;;  %v6197_v37 = vcombine.low %v1157_v43, %v1161_v44  ;;  %v7015_v25 = vld [vmem:[%s9818_s8 + $0x10] ss:$8 sps:$4 sm:$0xff]   ;;  %v7020_v27 = vld [vmem:[%s9818_s8 + $0x24] ss:$8 sps:$4 sm:$0xff]  }
 0x236   : > { %2271 = vmatmul.mubr.bf16.gmra.mrb[68].mxu0 %v8089_v23 }
 0x237   : > { %2384 = vmatmul.mubr.bf16.gmra.mrb[84].mxu1 %v8089_v23  ;;  %2280 = vmatprep.mubr.bf16.mxu0 %v8127_v12  ;;  %v6187_v23 = vcombine.low %v1148_v21, %v1152_v22  ;;  %v7012_v21 = vld [vmem:[%s9818_s8] ss:$8 sps:$4 sm:$0xff]   ;;  %v7017_v22 = vld [vmem:[%s9818_s8 + $0x14] ss:$8 sps:$4 sm:$0xff]  }
 0x238   : > { %2393 = vmatprep.mubr.bf16.mxu1 %v8127_v12  ;;  %v6198_v12 = vcombine.high %v1157_v43, %v1161_v44  ;;  %v7030_v43 = vld [vmem:[%s9818_s8 + $0x60] ss:$8 sps:$4 sm:$0xff]   ;;  %v7033_v44 = vld [vmem:[%s9818_s8 + $0x70] ss:$8 sps:$4 sm:$0xff]  }
 0x23e   : > { %2281 = vmatmul.mubr.bf16.gmra.mrb[72].mxu0 %v8125_v11 }
 0x23f   : > { %2394 = vmatmul.mubr.bf16.gmra.mrb[88].mxu1 %v8125_v11  ;;  %2290 = vmatprep.mubr.bf16.mxu0 %v8163_v0  ;;  %v6196_v11 = vcombine.high %v1156_v62, %v1160_v63  ;;  %v7027_v62 = vld [vmem:[%s9818_s8 + $0x50] ss:$8 sps:$4 sm:$0xff]   ;;  %v7032_v63 = vld [vmem:[%s9818_s8 + $0x64] ss:$8 sps:$4 sm:$0xff]  }
 0x240   : > { %2403 = vmatprep.mubr.bf16.mxu1 %v8163_v0  ;;  %v1168_v0 = vld [vmem:[%s9816_s6 + $0xb0] sm:$0xff] }
 0x246   : > { %2291 = vmatmul.mubr.bf16.gmra.mrb[76].mxu0 %v8152_v32 }
 0x247   : > { %2404 = vmatmul.mubr.bf16.gmra.mrb[92].mxu1 %v8152_v32  ;;  %2686 = vmatprep.mubr.bf16.mxu0 %v7404_v29  ;;  %v1164_v32 = vld [vmem:[%s9816_s6 + $0x90] sm:$0xff] }
 0x248   : > { %2799 = vmatprep.mubr.bf16.mxu1 %v7404_v29  ;;  %v6204_v39 = vcombine.high %v1164_v32, %v1168_v0  ;;  %v6203_v57 = vcombine.low %v1164_v32, %v1168_v0  ;;  %v7042_v32 = vld [vmem:[%s9818_s8 + $0xa0] ss:$8 sps:$4 sm:$0xff]   ;;  %v7045_v0 = vld [vmem:[%s9818_s8 + $0xb0] ss:$8 sps:$4 sm:$0xff]  }
 0x24e   : > { %6231 = vmatmul.mubr.msk.bf16.vlgmr.msra.gmra.mrb[16].mxu0 %vm959_vm1, %v7712_v42 }
 0x24f   : > { %6239 = vmatmul.mubr.msk.bf16.vlgmr.msra.gmra.mrb[32].mxu1 %vm959_vm1, %v7712_v42  ;;  %2696 = vmatprep.mubr.bf16.mxu0 %v7404_v29 }
 0x250   : > { %2809 = vmatprep.mubr.bf16.mxu1 %v7404_v29  ;;  %2881 = vmatpush1.bf16.msra.mxu0 %v6187_v23  ;;  %v7038_v23 = vld [vmem:[%s9818_s8 + $0x84] ss:$8 sps:$4 sm:$0xff]  }
 0x251   : > { %2994 = vmatpush1.bf16.msra.mxu1 %v6189_v24  ;;  %2882 = vmatprep.subr.bf16.mxu0 %v6196_v11  ;;  %v7036_v24 = vld [vmem:[%s9818_s8 + $0x80] ss:$8 sps:$4 sm:$0xff]   ;;  %v7039_v11 = vld [vmem:[%s9818_s8 + $0x90] ss:$8 sps:$4 sm:$0xff]  }
 0x252   : > { %2995 = vmatprep.subr.bf16.mxu1 %v6198_v12  ;;  %v7044_v12 = vld [vmem:[%s9818_s8 + $0xa4] ss:$8 sps:$4 sm:$0xff]  }
 0x254   : > { %2883 = vmatpush1.bf16.msra.mxu0 %v6195_v36  ;;  %v7051_v36 = vld [vmem:[%s9818_s8 + $0xd0] ss:$8 sps:$4 sm:$0xff]  }
 0x255   : > { %2996 = vmatpush1.bf16.msra.mxu1 %v6197_v37  ;;  %2884 = vmatprep.subr.bf16.mxu0 %v6204_v39  ;;  %v7056_v37 = vld [vmem:[%s9818_s8 + $0xe4] ss:$8 sps:$4 sm:$0xff]   ;;  %v7057_v39 = vld [vmem:[%s9818_s8 + $0xf0] ss:$8 sps:$4 sm:$0xff]  }
 0x256   : > { %6232 = vmatmul.mubr.msk.bf16.gmra.mrb[20].mxu0 %vm959_vm1, %v7728_v53  ;;  %2997 = vmatprep.subr.bf16.mxu1 %v6206_v49  ;;  %v7062_v49 = vld [vmem:[%s9818_s8 + $0x104] ss:$8 sps:$4 sm:$0xff]  }
 0x257   : > { %6240 = vmatmul.mubr.msk.bf16.gmra.mrb[36].mxu1 %vm959_vm1, %v7728_v53  ;;  %2706 = vmatprep.mubr.bf16.mxu0 %v7404_v29 }
 0x258   : > { %2819 = vmatprep.mubr.bf16.mxu1 %v7404_v29  ;;  %2885 = vmatpush1.bf16.msra.mxu0 %v6203_v57  ;;  %v8557_v57 = vrot.slane %v8544_v54, %v7885_v50 }
 0x259   : > { %2998 = vmatpush1.bf16.msra.mxu1 %v6205_v58  ;;  %2886 = vmatprep.subr.bf16.mxu0 %v6212_v41  ;;  %v8560_v58 = vrot.slane %v8544_v54, %v3121_v55 }
 0x25a   : > { %2999 = vmatprep.subr.bf16.mxu1 %v6214_v59 }
 0x25c   : > { %2887 = vmatpush1.bf16.msra.mxu0 %v6211_v38 }
 0x25d   : > { %3000 = vmatpush1.bf16.msra.mxu1 %v6213_v1  ;;  %2888 = vmatprep.subr.bf16.mxu0 %v6220_v2 }
 0x25e   : > { %6233 = vmatmul.mubr.msk.bf16.gmra.mrb[24].mxu0 %vm959_vm1, %v7738_v61  ;;  %3001 = vmatprep.subr.bf16.mxu1 %v6222_v3 }
 0x25f   : > { %6241 = vmatmul.mubr.msk.bf16.gmra.mrb[40].mxu1 %vm959_vm1, %v7738_v61  ;;  %2716 = vmatprep.mubr.bf16.mxu0 %v7404_v29 }
 0x260   : > { %2829 = vmatprep.mubr.bf16.mxu1 %v7404_v29  ;;  %2889 = vmatpush1.bf16.msra.mxu0 %v6219_v10  ;;  %v7110_v10 = vld [vmem:[%s9820_s10 + $0x48] sm:$0xff]  }
 0x261   : > { %3002 = vmatpush1.bf16.msra.mxu1 %v6221_v17  ;;  %2890 = vmatprep.subr.bf16.mxu0 %v6228_v13 }
 0x262   : > { %3003 = vmatprep.subr.bf16.mxu1 %v6230_v14 }
 0x264   : > { %2891 = vmatpush1.bf16.msra.mxu0 %v6227_v15 }
 0x265   : > { %3004 = vmatpush1.bf16.msra.mxu1 %v6229_v18  ;;  %3863 = vmatprep.subr.bf16.mxu0 %v7014_v20 }
 0x266   : > { %6234 = vmatmul.mubr.msk.bf16.gmra.mrb[28].mxu0 %vm959_vm1, %v7751_v8  ;;  %6479 = vmatprep.subr.bf16.mxu1 %v7108_v40 }
 0x267   : > { %6242 = vmatmul.mubr.msk.bf16.gmra.mrb[44].mxu1 %vm959_vm1, %v7751_v8  ;;  %2726 = vmatprep.mubr.bf16.mxu0 %v7404_v29 }
 0x268   : > { %2839 = vmatprep.mubr.bf16.mxu1 %v7404_v29 }
 0x26e   : > { %6235 = vmatmul.mubr.msk.bf16.gmra.mrb[32].mxu0 %vm959_vm1, %v7761_v19 }
 0x26f   : > { %6243 = vmatmul.mubr.msk.bf16.gmra.mrb[48].mxu1 %vm959_vm1, %v7761_v19  ;;  %2736 = vmatprep.mubr.bf16.mxu0 %v7404_v29 }
 0x270   : > { %2849 = vmatprep.mubr.bf16.mxu1 %v7404_v29 }
 0x276   : > { %6236 = vmatmul.mubr.msk.bf16.gmra.mrb[36].mxu0 %vm959_vm1, %v7774_v33 }
 0x277   : > { %6244 = vmatmul.mubr.msk.bf16.gmra.mrb[52].mxu1 %vm959_vm1, %v7774_v33  ;;  %2746 = vmatprep.mubr.bf16.mxu0 %v7404_v29 }
 0x278   : > { %2859 = vmatprep.mubr.bf16.mxu1 %v7404_v29 }
 0x27e   : > { %6237 = vmatmul.mubr.msk.bf16.gmra.mrb[40].mxu0 %vm959_vm1, %v7784_v47 }
 0x27f   : > { %6245 = vmatmul.mubr.msk.bf16.gmra.mrb[56].mxu1 %vm959_vm1, %v7784_v47  ;;  %2756 = vmatprep.mubr.bf16.mxu0 %v7404_v29 }
 0x280   : > { %2869 = vmatprep.mubr.bf16.mxu1 %v7404_v29 }
 0x286   : > { %6238 = vmatmul.mubr.msk.bf16.gmra.mrb[44].mxu0 %vm959_vm1, %v7796_v26 }
 0x287   : > { %6246 = vmatmul.mubr.msk.bf16.gmra.mrb[60].mxu1 %vm959_vm1, %v7796_v26  ;;  %2912 = vmatprep.mubr.bf16.mxu0 %v7404_v29 }
 0x288   : > { %3025 = vmatprep.mubr.bf16.mxu1 %v7404_v29 }
 0x28e   : > { %6247 = vmatmul.mubr.msk.bf16.vlgmr.msra.gmra.mrb[48].mxu0 %vm959_vm1, %v7712_v42 }
 0x28f   : > { %6255 = vmatmul.mubr.msk.bf16.vlgmr.msra.gmra.mrb[64].mxu1 %vm959_vm1, %v7712_v42  ;;  %2922 = vmatprep.mubr.bf16.mxu0 %v7404_v29  ;;  %v7023_v42 = vld [vmem:[%s9818_s8 + $0x34] ss:$8 sps:$4 sm:$0xff]  }
 0x290   : > { %3035 = vmatprep.mubr.bf16.mxu1 %v7404_v29  ;;  %3864 = vmatpush1.bf16.msra.mxu0 %v7012_v21 }
 0x291   : > { %3865 = vmatprep.subr.bf16.mxu0 %v7017_v22  ;;  %6480 = vmatpush3.bf16.msra.mxu1 %v7109_v9 }
 0x292   : > { %6481 = vmatprep.subr.bf16.mxu1 %v7110_v10  ;;  %v7066_v10 = vld [vmem:[%s9818_s8 + $0x120] ss:$8 sps:$4 sm:$0xff]  }
 0x294   : > { %3866 = vmatpush1.bf16.msra.mxu0 %v7015_v25 }
 0x295   : > { %3867 = vmatprep.subr.bf16.mxu0 %v7020_v27 }
 0x296   : > { %6248 = vmatmul.mubr.msk.bf16.gmra.mrb[52].mxu0 %vm959_vm1, %v7728_v53 }
 0x297   : > { %6256 = vmatmul.mubr.msk.bf16.gmra.mrb[68].mxu1 %vm959_vm1, %v7728_v53  ;;  %2932 = vmatprep.mubr.bf16.mxu0 %v7404_v29  ;;  %v7029_v53 = vld [vmem:[%s9818_s8 + $0x54] ss:$8 sps:$4 sm:$0xff]  }
 0x298   : > { %3045 = vmatprep.mubr.bf16.mxu1 %v7404_v29  ;;  %3868 = vmatpush1.bf16.msra.mxu0 %v7018_v5  ;;  %v7111_v5 = vld [vmem:[%s9820_s10 + $0x8] sm:$0xff]  }
 0x299   : > { %3869 = vmatprep.subr.bf16.mxu0 %v7023_v42  ;;  %6482 = vmatpush3.bf16.msra.mxu1 %v7111_v5 }
 0x29c   : > { %3870 = vmatpush1.bf16.msra.mxu0 %v7021_v28 }
 0x29d   : > { %3871 = vmatprep.subr.bf16.mxu0 %v7026_v30 }
 0x29e   : > { %6249 = vmatmul.mubr.msk.bf16.gmra.mrb[56].mxu0 %vm959_vm1, %v7738_v61 }
 0x29f   : > { %6257 = vmatmul.mubr.msk.bf16.gmra.mrb[72].mxu1 %vm959_vm1, %v7738_v61  ;;  %2942 = vmatprep.mubr.bf16.mxu0 %v7404_v29  ;;  %v7035_v61 = vld [vmem:[%s9818_s8 + $0x74] ss:$8 sps:$4 sm:$0xff]  }
 0x2a0   : > { %3055 = vmatprep.mubr.bf16.mxu1 %v7404_v29  ;;  %3872 = vmatpush1.bf16.msra.mxu0 %v7024_v16  ;;  %v7112_v16 = vld [vmem:[%s9820_s10 + $0x50] sm:$0xff]  }
 0x2a1   : > { %3873 = vmatprep.subr.bf16.mxu0 %v7029_v53  ;;  %6483 = vmatprep.subr.bf16.mxu1 %v7112_v16  ;;  %v7118_v16 = vld [vmem:[%s9820_s10 + $0x68] sm:$0xff]  }
 0x2a4   : > { %3874 = vmatpush1.bf16.msra.mxu0 %v7027_v62 }
 0x2a5   : > { %3875 = vmatprep.subr.bf16.mxu0 %v7032_v63 }
 0x2a6   : > { %6250 = vmatmul.mubr.msk.bf16.gmra.mrb[60].mxu0 %vm959_vm1, %v7751_v8 }
 0x2a7   : > { %6258 = vmatmul.mubr.msk.bf16.gmra.mrb[76].mxu1 %vm959_vm1, %v7751_v8  ;;  %2952 = vmatprep.mubr.bf16.mxu0 %v7404_v29  ;;  %v7041_v8 = vld [vmem:[%s9818_s8 + $0x94] ss:$8 sps:$4 sm:$0xff]  }
 0x2a8   : > { %3065 = vmatprep.mubr.bf16.mxu1 %v7404_v29  ;;  %3876 = vmatpush1.bf16.msra.mxu0 %v7030_v43  ;;  %v7060_v43 = vld [vmem:[%s9818_s8 + $0x100] ss:$8 sps:$4 sm:$0xff]  }
 0x2a9   : > { %3877 = vmatprep.subr.bf16.mxu0 %v7035_v61 }
 0x2ac   : > { %3878 = vmatpush1.bf16.msra.mxu0 %v7033_v44 }
 0x2ad   : > { %3879 = vmatprep.subr.bf16.mxu0 %v7038_v23 }
 0x2ae   : > { %6251 = vmatmul.mubr.msk.bf16.gmra.mrb[64].mxu0 %vm959_vm1, %v7761_v19 }
 0x2af   : > { %6259 = vmatmul.mubr.msk.bf16.gmra.mrb[80].mxu1 %vm959_vm1, %v7761_v19  ;;  %2962 = vmatprep.mubr.bf16.mxu0 %v7404_v29  ;;  %v7047_v19 = vld [vmem:[%s9818_s8 + $0xb4] ss:$8 sps:$4 sm:$0xff]  }
 0x2b0   : > { %3075 = vmatprep.mubr.bf16.mxu1 %v7404_v29  ;;  %3880 = vmatpush1.bf16.msra.mxu0 %v7036_v24 }
 0x2b1   : > { %3881 = vmatprep.subr.bf16.mxu0 %v7041_v8  ;;  %v7065_v8 = vld [vmem:[%s9818_s8 + $0x114] ss:$8 sps:$4 sm:$0xff]  }
 0x2b4   : > { %3882 = vmatpush1.bf16.msra.mxu0 %v7039_v11 }
 0x2b5   : > { %3883 = vmatprep.subr.bf16.mxu0 %v7044_v12 }
 0x2b6   : > { %6252 = vmatmul.mubr.msk.bf16.gmra.mrb[68].mxu0 %vm959_vm1, %v7774_v33 }
 0x2b7   : > { %6260 = vmatmul.mubr.msk.bf16.gmra.mrb[84].mxu1 %vm959_vm1, %v7774_v33  ;;  %2972 = vmatprep.mubr.bf16.mxu0 %v7404_v29  ;;  %v7053_v33 = vld [vmem:[%s9818_s8 + $0xd4] ss:$8 sps:$4 sm:$0xff]  }
 0x2b8   : > { %3085 = vmatprep.mubr.bf16.mxu1 %v7404_v29  ;;  %3884 = vmatpush1.bf16.msra.mxu0 %v7042_v32 }
 0x2b9   : > { %3885 = vmatprep.subr.bf16.mxu0 %v7047_v19 }
 0x2bc   : > { %3886 = vmatpush1.bf16.msra.mxu0 %v7045_v0  ;;  %v7113_v0 = vld [vmem:[%s9820_s10 + $0x10] sm:$0xff]  }
 0x2bd   : > { %3887 = vmatprep.subr.bf16.mxu0 %v7050_v31  ;;  %6484 = vmatpush3.bf16.msra.mxu1 %v7113_v0 }
 0x2be   : > { %6253 = vmatmul.mubr.msk.bf16.gmra.mrb[72].mxu0 %vm959_vm1, %v7784_v47 }
 0x2bf   : > { %6261 = vmatmul.mubr.msk.bf16.gmra.mrb[88].mxu1 %vm959_vm1, %v7784_v47  ;;  %2982 = vmatprep.mubr.bf16.mxu0 %v7404_v29  ;;  %v7054_v47 = vld [vmem:[%s9818_s8 + $0xe0] ss:$8 sps:$4 sm:$0xff]  }
 0x2c0   : > { %3095 = vmatprep.mubr.bf16.mxu1 %v7404_v29  ;;  %3888 = vmatpush1.bf16.msra.mxu0 %v7048_v34  ;;  %v7059_v29 = vld [vmem:[%s9818_s8 + $0xf4] ss:$8 sps:$4 sm:$0xff]  }
 0x2c1   : > { %3889 = vmatprep.subr.bf16.mxu0 %v7053_v33 }
 0x2c4   : > { %3890 = vmatpush1.bf16.msra.mxu0 %v7051_v36 }
 0x2c5   : > { %3891 = vmatprep.subr.bf16.mxu0 %v7056_v37  ;;  %v7114_v37 = vld [vmem:[%s9820_s10 + $0x58] sm:$0xff]  }
 0x2c6   : > { %6254 = vmatmul.mubr.msk.bf16.gmra.mrb[76].mxu0 %vm959_vm1, %v7796_v26  ;;  %6485 = vmatprep.subr.bf16.mxu1 %v7114_v37  ;;  %v7120_v37 = vld [vmem:[%s9820_s10 + $0x70] sm:$0xff]  }
 0x2c7   : > { %6262 = vmatmul.mubr.msk.bf16.gmra.mrb[92].mxu1 %vm959_vm1, %v7796_v26  ;;  %v3117_v26 = vsub.s32 2, %v7876_v46 }
 0x2c8   : > { %3892 = vmatpush1.bf16.msra.mxu0 %v7054_v47 }
 0x2c9   : > { %3893 = vmatprep.subr.bf16.mxu0 %v7059_v29  ;;  %v8553_v56 = vrot.slane %v8544_v54, %v3117_v26 }
 0x2cc   : > { %3894 = vmatpush1.bf16.msra.mxu0 %v7057_v39 }
 0x2cd   : > { %3976 = vmatprep.subr.bf16.mxu0 %v7062_v49  ;;  %v7063_v49 = vld [vmem:[%s9818_s8 + $0x110] ss:$8 sps:$4 sm:$0xff]  }
 0x321   : > { %v2688_v41 = vpop.f32.mrb[16].mxu0 }
 0x322   : > { %v3147_v59 = vadd.f32 %v8550_v4, %v2688_v41  ;;  %v2801_v60 = vpop.f32.mrb[32].mxu1  ;;  %v2690_v51 = vpop.f32.mrb[17].mxu0 }
 0x323   : > { %v3149_v52 = vadd.f32 %v8553_v56, %v2801_v60  ;;  %v3148_v35 = vadd.f32 %v8557_v57, %v2690_v51  ;;  %v2803_v38 = vpop.f32.mrb[33].mxu1  ;;  %v2692_v1 = vpop.f32.mrb[18].mxu0 }
 0x324   : > { %v3150_v2 = vadd.f32 %v8560_v58, %v2803_v38  ;;  %v3155_v3 = vadd.f32 %v8550_v4, %v2692_v1  ;;  %v2805_v6 = vpop.f32.mrb[34].mxu1  ;;  %v2694_v7 = vpop.f32.mrb[19].mxu0  ;;  %v3275_v15 = vmax.f32 %v3147_v59, 0.0  ;;  %v7068_v59 = vld [vmem:[%s9818_s8 + $0x124] ss:$8 sps:$4 sm:$0xff]   ;;  %v7115_v38 = vld [vmem:[%s9820_s10 + $0x18] sm:$0xff]  }
 0x325   : > { %v3157_v17 = vadd.f32 %v8553_v56, %v2805_v6  ;;  %v3156_v13 = vadd.f32 %v8557_v57, %v2694_v7  ;;  %v2807_v14 = vpop.f32.mrb[35].mxu1  ;;  %v3277_v21 = vmax.f32 %v3149_v52, 0.0  ;;  %v3276_v22 = vmax.f32 %v3148_v35, 0.0  ;;  %v7116_v6 = vld [vmem:[%s9820_s10 + $0x60] sm:$0xff]   ;;  %6486 = vmatpush3.bf16.msra.mxu1 %v7115_v38 }
 0x326   : > { %v3283_v18 = vmax.f32 %v3155_v3, 0.0  ;;  %v3158_v20 = vadd.f32 %v8560_v58, %v2807_v14  ;;  %v3278_v42 = vmax.f32 %v3150_v2, 0.0  ;;  %6487 = vmatprep.subr.bf16.mxu1 %v7116_v6 }
 0x327   : > { %v3285_v25 = vmax.f32 %v3157_v17, 0.0  ;;  %v3284_v27 = vmax.f32 %v3156_v13, 0.0 }
 0x328   : > { %v3403_v28 = vpack.c.bf16 %v3283_v18, %v3275_v15  ;;  %v3286_v30 = vmax.f32 %v3158_v20, 0.0  ;;  %v7071_v18 = vld [vmem:[%s9818_s8 + $0x134] ss:$8 sps:$4 sm:$0xff]  }
 0x329   : > { %v8585_v53 = vpack.c.bf16 %v3285_v25, %v3277_v21  ;;  %v3404_v62 = vpack.c.bf16 %v3284_v27, %v3276_v22  ;;  %v2698_v63 = vpop.f32.mrb[20].mxu0  ;;  %v7117_v27 = vld [vmem:[%s9820_s10 + $0x20] sm:$0xff]  }
 0x32a   : > { %v8590_v61 = vpack.c.bf16 %v3286_v30, %v3278_v42  ;;  %v3163_v44 = vadd.f32 %v8550_v4, %v2698_v63  ;;  %v2811_v23 = vpop.f32.mrb[36].mxu1  ;;  %v2700_v24 = vpop.f32.mrb[21].mxu0  ;;  %6488 = vmatpush3.bf16.msra.mxu1 %v7117_v27 }
 0x32b   : > { %v3165_v11 = vadd.f32 %v8553_v56, %v2811_v23  ;;  %v3164_v12 = vadd.f32 %v8557_v57, %v2700_v24  ;;  %v2813_v32 = vpop.f32.mrb[37].mxu1  ;;  %v2702_v19 = vpop.f32.mrb[22].mxu0  ;;  %3895 = vmatprep.mubr.bf16.mxu0 %v3404_v62  ;;  %6489 = vmatprep.subr.bf16.mxu1 %v7118_v16 }
 0x32c   : > { %v3166_v31 = vadd.f32 %v8560_v58, %v2813_v32  ;;  %v3171_v34 = vadd.f32 %v8550_v4, %v2702_v19  ;;  %v2815_v33 = vpop.f32.mrb[38].mxu1  ;;  %v2704_v36 = vpop.f32.mrb[23].mxu0  ;;  %3896 = vmatmul.mubr.bf16.vlgmr.msra.gmra.mrb[80].mxu0 %v3403_v28  ;;  %v3291_v26 = vmax.f32 %v3163_v44, 0.0  ;;  %v7069_v44 = vld [vmem:[%s9818_s8 + $0x130] ss:$8 sps:$4 sm:$0xff]  }
 0x32d   : > { %v3173_v47 = vadd.f32 %v8553_v56, %v2815_v33  ;;  %v3172_v29 = vadd.f32 %v8557_v57, %v2704_v36  ;;  %v2817_v39 = vpop.f32.mrb[39].mxu1  ;;  %3977 = vmatpush1.bf16.msra.mxu0 %v7060_v43  ;;  %v3293_v60 = vmax.f32 %v3165_v11, 0.0  ;;  %v3292_v51 = vmax.f32 %v3164_v12, 0.0  ;;  %v7074_v11 = vld [vmem:[%s9818_s8 + $0x144] ss:$8 sps:$4 sm:$0xff]  }
 0x32e   : > { %v3299_v55 = vmax.f32 %v3171_v34, 0.0  ;;  %v3174_v41 = vadd.f32 %v8560_v58, %v2817_v39  ;;  %3978 = vmatprep.subr.bf16.mxu0 %v7065_v8  ;;  %v3294_v1 = vmax.f32 %v3166_v31, 0.0  ;;  %v7119_v31 = vld [vmem:[%s9820_s10 + $0x28] sm:$0xff]  }
 0x32f   : > { %v3301_v52 = vmax.f32 %v3173_v47, 0.0  ;;  %v3300_v35 = vmax.f32 %v3172_v29, 0.0  ;;  %6490 = vmatpush3.bf16.msra.mxu1 %v7119_v31 }
 0x330   : > { %v3411_v2 = vpack.c.bf16 %v3299_v55, %v3291_v26  ;;  %v3302_v3 = vmax.f32 %v3174_v41, 0.0  ;;  %6491 = vmatprep.subr.bf16.mxu1 %v7120_v37 }
 0x331   : > { %v8621_v7 = vpack.c.bf16 %v3301_v52, %v3293_v60  ;;  %v3412_v40 = vpack.c.bf16 %v3300_v35, %v3292_v51  ;;  %3979 = vmatpush1.bf16.msra.mxu0 %v7063_v49  ;;  %v2708_v9 = vpop.f32.mrb[24].mxu0  ;;  %v7072_v49 = vld [vmem:[%s9818_s8 + $0x140] ss:$8 sps:$4 sm:$0xff]   ;;  %v7077_v60 = vld [vmem:[%s9818_s8 + $0x154] ss:$8 sps:$4 sm:$0xff]  }
 0x332   : > { %v8626_v17 = vpack.c.bf16 %v3302_v3, %v3294_v1  ;;  %v3179_v13 = vadd.f32 %v8550_v4, %v2708_v9  ;;  %v2821_v14 = vpop.f32.mrb[40].mxu1  ;;  %v2710_v15 = vpop.f32.mrb[25].mxu0  ;;  %3980 = vmatprep.subr.bf16.mxu0 %v7068_v59  ;;  %v7121_v1 = vld [vmem:[%s9820_s10 + $0x30] sm:$0xff]  }
 0x333   : > { %v3181_v20 = vadd.f32 %v8553_v56, %v2821_v14  ;;  %v3180_v21 = vadd.f32 %v8557_v57, %v2710_v15  ;;  %v2823_v22 = vpop.f32.mrb[41].mxu1  ;;  %v2712_v25 = vpop.f32.mrb[26].mxu0  ;;  %3905 = vmatprep.mubr.bf16.mxu0 %v3412_v40  ;;  %v7075_v14 = vld [vmem:[%s9818_s8 + $0x150] ss:$8 sps:$4 sm:$0xff]   ;;  %6492 = vmatpush3.bf16.msra.mxu1 %v7121_v1 }
 0x334   : > { %v3182_v5 = vadd.f32 %v8560_v58, %v2823_v22  ;;  %v3187_v42 = vadd.f32 %v8550_v4, %v2712_v25  ;;  %v2825_v28 = vpop.f32.mrb[42].mxu1  ;;  %v2714_v30 = vpop.f32.mrb[27].mxu0  ;;  %3906 = vmatmul.mubr.bf16.gmra.mrb[84].mxu0 %v3411_v2  ;;  %v3307_v23 = vmax.f32 %v3179_v13, 0.0 }
 0x335   : > { %v3189_v62 = vadd.f32 %v8553_v56, %v2825_v28  ;;  %v3188_v63 = vadd.f32 %v8557_v57, %v2714_v30  ;;  %v2827_v43 = vpop.f32.mrb[43].mxu1  ;;  %3981 = vmatpush1.bf16.msra.mxu0 %v7066_v10  ;;  %v3309_v12 = vmax.f32 %v3181_v20, 0.0  ;;  %v3308_v32 = vmax.f32 %v3180_v21, 0.0  ;;  %v7080_v21 = vld [vmem:[%s9818_s8 + $0x164] ss:$8 sps:$4 sm:$0xff]  }
 0x336   : > { %v3315_v24 = vmax.f32 %v3187_v42, 0.0  ;;  %v3190_v8 = vadd.f32 %v8560_v58, %v2827_v43  ;;  %3982 = vmatprep.subr.bf16.mxu0 %v7071_v18  ;;  %v3310_v34 = vmax.f32 %v3182_v5, 0.0  ;;  %v7078_v43 = vld [vmem:[%s9818_s8 + $0x160] ss:$8 sps:$4 sm:$0xff]  }
 0x337   : > { %v3317_v19 = vmax.f32 %v3189_v62, 0.0  ;;  %v3316_v0 = vmax.f32 %v3188_v63, 0.0 }
 0x338   : > { %v3419_v33 = vpack.c.bf16 %v3315_v24, %v3307_v23  ;;  %v3318_v36 = vmax.f32 %v3190_v8, 0.0 }
 0x339   : > { %v8657_v47 = vpack.c.bf16 %v3317_v19, %v3309_v12  ;;  %v3420_v29 = vpack.c.bf16 %v3316_v0, %v3308_v32  ;;  %3983 = vmatpush1.bf16.msra.mxu0 %v7069_v44  ;;  %v2718_v39 = vpop.f32.mrb[28].mxu0 }
 0x33a   : > { %v8662_v26 = vpack.c.bf16 %v3318_v36, %v3310_v34  ;;  %v3195_v55 = vadd.f32 %v8550_v4, %v2718_v39  ;;  %v2831_v41 = vpop.f32.mrb[44].mxu1  ;;  %v2720_v59 = vpop.f32.mrb[29].mxu0  ;;  %3984 = vmatprep.subr.bf16.mxu0 %v7074_v11  ;;  %v7083_v11 = vld [vmem:[%s9818_s8 + $0x174] ss:$8 sps:$4 sm:$0xff]  }
 0x33b   : > { %v3197_v51 = vadd.f32 %v8553_v56, %v2831_v41  ;;  %v3196_v52 = vadd.f32 %v8557_v57, %v2720_v59  ;;  %v2833_v35 = vpop.f32.mrb[45].mxu1  ;;  %v2722_v38 = vpop.f32.mrb[30].mxu0  ;;  %3915 = vmatprep.mubr.bf16.mxu0 %v3420_v29 }
 0x33c   : > { %v3198_v2 = vadd.f32 %v8560_v58, %v2833_v35  ;;  %v3203_v3 = vadd.f32 %v8550_v4, %v2722_v38  ;;  %v2835_v6 = vpop.f32.mrb[46].mxu1  ;;  %v2724_v40 = vpop.f32.mrb[31].mxu0  ;;  %3916 = vmatmul.mubr.bf16.gmra.mrb[88].mxu0 %v3419_v33  ;;  %v3323_v15 = vmax.f32 %v3195_v55, 0.0 }
 0x33d   : > { %v3205_v9 = vadd.f32 %v8553_v56, %v2835_v6  ;;  %v3204_v10 = vadd.f32 %v8557_v57, %v2724_v40  ;;  %v2837_v13 = vpop.f32.mrb[47].mxu1  ;;  %3985 = vmatpush1.bf16.msra.mxu0 %v7072_v49  ;;  %v3325_v22 = vmax.f32 %v3197_v51, 0.0  ;;  %v3324_v25 = vmax.f32 %v3196_v52, 0.0  ;;  %v7081_v49 = vld [vmem:[%s9818_s8 + $0x170] ss:$8 sps:$4 sm:$0xff]  }
 0x33e   : > { %v3331_v18 = vmax.f32 %v3203_v3, 0.0  ;;  %v3206_v20 = vadd.f32 %v8560_v58, %v2837_v13  ;;  %3986 = vmatprep.subr.bf16.mxu0 %v7077_v60  ;;  %v3326_v42 = vmax.f32 %v3198_v2, 0.0  ;;  %v7086_v60 = vld [vmem:[%s9818_s8 + $0x184] ss:$8 sps:$4 sm:$0xff]  }
 0x33f   : > { %v3333_v27 = vmax.f32 %v3205_v9, 0.0  ;;  %v3332_v5 = vmax.f32 %v3204_v10, 0.0  ;;  %v7084_v10 = vld [vmem:[%s9818_s8 + $0x180] ss:$8 sps:$4 sm:$0xff]  }
 0x340   : > { %v3427_v28 = vpack.c.bf16 %v3331_v18, %v3323_v15  ;;  %v3334_v30 = vmax.f32 %v3206_v20, 0.0  ;;  %v7089_v20 = vld [vmem:[%s9818_s8 + $0x194] ss:$8 sps:$4 sm:$0xff]  }
 0x341   : > { %v8684_v16 = vpack.c.bf16 %v3333_v27, %v3325_v22  ;;  %v3428_v62 = vpack.c.bf16 %v3332_v5, %v3324_v25  ;;  %3987 = vmatpush1.bf16.msra.mxu0 %v7075_v14  ;;  %v2728_v63 = vpop.f32.mrb[32].mxu0 }
 0x342   : > { %v8689_v44 = vpack.c.bf16 %v3334_v30, %v3326_v42  ;;  %v3211_v23 = vadd.f32 %v8550_v4, %v2728_v63  ;;  %v2841_v24 = vpop.f32.mrb[48].mxu1  ;;  %v2730_v8 = vpop.f32.mrb[33].mxu0  ;;  %3988 = vmatprep.subr.bf16.mxu0 %v7080_v21 }
 0x343   : > { %v3213_v12 = vadd.f32 %v8553_v56, %v2841_v24  ;;  %v3212_v32 = vadd.f32 %v8557_v57, %v2730_v8  ;;  %v2843_v19 = vpop.f32.mrb[49].mxu1  ;;  %v2732_v0 = vpop.f32.mrb[34].mxu0  ;;  %3925 = vmatprep.mubr.bf16.mxu0 %v3428_v62 }
 0x344   : > { %v3214_v31 = vadd.f32 %v8560_v58, %v2843_v19  ;;  %v3219_v34 = vadd.f32 %v8550_v4, %v2732_v0  ;;  %v2845_v33 = vpop.f32.mrb[50].mxu1  ;;  %v2734_v36 = vpop.f32.mrb[35].mxu0  ;;  %3926 = vmatmul.mubr.bf16.gmra.mrb[92].mxu0 %v3427_v28  ;;  %v3339_v55 = vmax.f32 %v3211_v23, 0.0  ;;  %v7087_v23 = vld [vmem:[%s9818_s8 + $0x190] ss:$8 sps:$4 sm:$0xff]  }
 0x345   : > { %v3221_v37 = vadd.f32 %v8553_v56, %v2845_v33  ;;  %v3220_v29 = vadd.f32 %v8557_v57, %v2734_v36  ;;  %v2847_v39 = vpop.f32.mrb[51].mxu1  ;;  %3989 = vmatpush1.bf16.msra.mxu0 %v7078_v43  ;;  %v3341_v51 = vmax.f32 %v3213_v12, 0.0  ;;  %v3340_v52 = vmax.f32 %v3212_v32, 0.0  ;;  %v7092_v12 = vld [vmem:[%s9818_s8 + $0x1a4] ss:$8 sps:$4 sm:$0xff]  }
 0x346   : > { %v3347_v41 = vmax.f32 %v3219_v34, 0.0  ;;  %v3222_v59 = vadd.f32 %v8560_v58, %v2847_v39  ;;  %3990 = vmatprep.subr.bf16.mxu0 %v7083_v11  ;;  %v3342_v1 = vmax.f32 %v3214_v31, 0.0 }
 0x347   : > { %v3349_v35 = vmax.f32 %v3221_v37, 0.0  ;;  %v3348_v38 = vmax.f32 %v3220_v29, 0.0 }
 0x348   : > { %v3435_v2 = vpack.c.bf16 %v3347_v41, %v3339_v55  ;;  %v3350_v3 = vmax.f32 %v3222_v59, 0.0 }
 0x349   : > { %v8708_v6 = vpack.c.bf16 %v3349_v35, %v3341_v51  ;;  %v3436_v40 = vpack.c.bf16 %v3348_v38, %v3340_v52  ;;  %3991 = vmatpush1.bf16.msra.mxu0 %v7081_v49  ;;  %v2738_v9 = vpop.f32.mrb[36].mxu0  ;;  %v7090_v49 = vld [vmem:[%s9818_s8 + $0x1a0] ss:$8 sps:$4 sm:$0xff]   ;;  %v7095_v51 = vld [vmem:[%s9818_s8 + $0x1b4] ss:$8 sps:$4 sm:$0xff]  }
 0x34a   : > { %v8713_v13 = vpack.c.bf16 %v3350_v3, %v3342_v1  ;;  %v3227_v14 = vadd.f32 %v8550_v4, %v2738_v9  ;;  %v2851_v15 = vpop.f32.mrb[52].mxu1  ;;  %v2740_v18 = vpop.f32.mrb[37].mxu0  ;;  %3992 = vmatprep.subr.bf16.mxu0 %v7086_v60 }
 0x34b   : > { %v3229_v21 = vadd.f32 %v8553_v56, %v2851_v15  ;;  %v3228_v22 = vadd.f32 %v8557_v57, %v2740_v18  ;;  %v2853_v25 = vpop.f32.mrb[53].mxu1  ;;  %v2742_v27 = vpop.f32.mrb[38].mxu0  ;;  %3935 = vmatprep.mubr.bf16.mxu0 %v3436_v40  ;;  %v7093_v18 = vld [vmem:[%s9818_s8 + $0x1b0] ss:$8 sps:$4 sm:$0xff]  }
 0x34c   : > { %v3230_v5 = vadd.f32 %v8560_v58, %v2853_v25  ;;  %v3235_v42 = vadd.f32 %v8550_v4, %v2742_v27  ;;  %v2855_v28 = vpop.f32.mrb[54].mxu1  ;;  %v2744_v30 = vpop.f32.mrb[39].mxu0  ;;  %3936 = vmatmul.mubr.bf16.gmra.mrb[96].mxu0 %v3435_v2  ;;  %v3355_v24 = vmax.f32 %v3227_v14, 0.0  ;;  %v7098_v25 = vld [vmem:[%s9818_s8 + $0x1c4] ss:$8 sps:$4 sm:$0xff]  }
 0x34d   : > { %v3237_v62 = vadd.f32 %v8553_v56, %v2855_v28  ;;  %v3236_v63 = vadd.f32 %v8557_v57, %v2744_v30  ;;  %v2857_v43 = vpop.f32.mrb[55].mxu1  ;;  %3993 = vmatpush1.bf16.msra.mxu0 %v7084_v10  ;;  %v3357_v32 = vmax.f32 %v3229_v21, 0.0  ;;  %v3356_v19 = vmax.f32 %v3228_v22, 0.0 }
 0x34e   : > { %v3363_v8 = vmax.f32 %v3235_v42, 0.0  ;;  %v3238_v11 = vadd.f32 %v8560_v58, %v2857_v43  ;;  %3994 = vmatprep.subr.bf16.mxu0 %v7089_v20  ;;  %v3358_v34 = vmax.f32 %v3230_v5, 0.0 }
 0x34f   : > { %v3365_v0 = vmax.f32 %v3237_v62, 0.0  ;;  %v3364_v31 = vmax.f32 %v3236_v63, 0.0 }
 0x350   : > { %v3443_v33 = vpack.c.bf16 %v3363_v8, %v3355_v24  ;;  %v3366_v36 = vmax.f32 %v3238_v11, 0.0  ;;  %v7096_v8 = vld [vmem:[%s9818_s8 + $0x1c0] ss:$8 sps:$4 sm:$0xff]   ;;  %v3125_v11 = vsub.s32 4, %v7876_v46 }
 0x351   : > { %v8732_v37 = vpack.c.bf16 %v3365_v0, %v3357_v32  ;;  %v3444_v29 = vpack.c.bf16 %v3364_v31, %v3356_v19  ;;  %3995 = vmatpush1.bf16.msra.mxu0 %v7087_v23  ;;  %v2748_v39 = vpop.f32.mrb[40].mxu0 }
 0x352   : > { %v8737_v55 = vpack.c.bf16 %v3366_v36, %v3358_v34  ;;  %v3243_v41 = vadd.f32 %v8550_v4, %v2748_v39  ;;  %v2861_v59 = vpop.f32.mrb[56].mxu1  ;;  %v2750_v60 = vpop.f32.mrb[41].mxu0  ;;  %3996 = vmatprep.subr.bf16.mxu0 %v7092_v12  ;;  %v3133_v12 = vsub.s32 6, %v7876_v46  ;;  %v7101_v34 = vld [vmem:[%s9818_s8 + $0x1d4] ss:$8 sps:$4 sm:$0xff]  }
 0x353   : > { %v3245_v52 = vadd.f32 %v8553_v56, %v2861_v59  ;;  %v3244_v35 = vadd.f32 %v8557_v57, %v2750_v60  ;;  %v2863_v38 = vpop.f32.mrb[57].mxu1  ;;  %v2752_v1 = vpop.f32.mrb[42].mxu0  ;;  %3945 = vmatprep.mubr.bf16.mxu0 %v3444_v29 }
 0x354   : > { %v3246_v2 = vadd.f32 %v8560_v58, %v2863_v38  ;;  %v3251_v3 = vadd.f32 %v8550_v4, %v2752_v1  ;;  %v2865_v40 = vpop.f32.mrb[58].mxu1  ;;  %v2754_v9 = vpop.f32.mrb[43].mxu0  ;;  %3946 = vmatmul.mubr.bf16.gmra.mrb[100].mxu0 %v3443_v33  ;;  %v3371_v20 = vmax.f32 %v3243_v41, 0.0  ;;  %v3129_v33 = vsub.s32 5, %v7876_v46 }
 0x355   : > { %v3253_v10 = vadd.f32 %v8553_v56, %v2865_v40  ;;  %v3252_v14 = vadd.f32 %v8557_v57, %v2754_v9  ;;  %v2867_v15 = vpop.f32.mrb[59].mxu1  ;;  %3997 = vmatpush1.bf16.msra.mxu0 %v7090_v49  ;;  %v3373_v27 = vmax.f32 %v3245_v52, 0.0  ;;  %v3372_v5 = vmax.f32 %v3244_v35, 0.0 }
 0x356   : > { %v3379_v21 = vmax.f32 %v3251_v3, 0.0  ;;  %v3254_v22 = vadd.f32 %v8560_v58, %v2867_v15  ;;  %3998 = vmatprep.subr.bf16.mxu0 %v7095_v51  ;;  %v3374_v30 = vmax.f32 %v3246_v2, 0.0  ;;  %v3137_v52 = vsub.s32 7, %v7876_v46  ;;  %v7099_v2 = vld [vmem:[%s9818_s8 + $0x1d0] ss:$8 sps:$4 sm:$0xff]  }
 0x357   : > { %v3381_v42 = vmax.f32 %v3253_v10, 0.0  ;;  %v3380_v28 = vmax.f32 %v3252_v14, 0.0  ;;  %v8781_v3 = vrot.slane %v8544_v54, %v3125_v11 }
 0x358   : > { %v3451_v62 = vpack.c.bf16 %v3379_v21, %v3371_v20  ;;  %v3382_v63 = vmax.f32 %v3254_v22, 0.0 }
 0x359   : > { %v8756_v43 = vpack.c.bf16 %v3381_v42, %v3373_v27  ;;  %v3452_v23 = vpack.c.bf16 %v3380_v28, %v3372_v5  ;;  %3999 = vmatpush1.bf16.msra.mxu0 %v7093_v18  ;;  %v2758_v24 = vpop.f32.mrb[44].mxu0  ;;  %v7102_v42 = vld [vmem:[%s9818_s8 + $0x1e0] ss:$8 sps:$4 sm:$0xff]  }
 0x35a   : > { %v8763_v32 = vpack.c.bf16 %v3382_v63, %v3374_v30  ;;  %v3259_v19 = vadd.f32 %v8550_v4, %v2758_v24  ;;  %v2871_v0 = vpop.f32.mrb[60].mxu1  ;;  %v2760_v31 = vpop.f32.mrb[45].mxu0  ;;  %4000 = vmatprep.subr.bf16.mxu0 %v7098_v25  ;;  %v8794_v25 = vrot.slane %v8544_v54, %v3137_v52 }
 0x35b   : > { %v3261_v36 = vadd.f32 %v8553_v56, %v2871_v0  ;;  %v3260_v29 = vadd.f32 %v8557_v57, %v2760_v31  ;;  %v2873_v39 = vpop.f32.mrb[61].mxu1  ;;  %v2762_v49 = vpop.f32.mrb[46].mxu0  ;;  %3955 = vmatprep.mubr.bf16.mxu0 %v3452_v23 }
 0x35c   : > { %v3262_v41 = vadd.f32 %v8560_v58, %v2873_v39  ;;  %v3267_v59 = vadd.f32 %v8550_v4, %v2762_v49  ;;  %v2875_v60 = vpop.f32.mrb[62].mxu1  ;;  %v2764_v51 = vpop.f32.mrb[47].mxu0  ;;  %3956 = vmatmul.mubr.bf16.gmra.mrb[104].mxu0 %v3451_v62  ;;  %v8784_v4 = vrot.slane %v8544_v54, %v3133_v12  ;;  %v3387_v40 = vmax.f32 %v3259_v19, 0.0 }
 0x35d   : > { %v3269_v35 = vadd.f32 %v8553_v56, %v2875_v60  ;;  %v3268_v38 = vadd.f32 %v8557_v57, %v2764_v51  ;;  %v2877_v1 = vpop.f32.mrb[63].mxu1  ;;  %4001 = vmatpush1.bf16.msra.mxu0 %v7096_v8  ;;  %v8788_v56 = vrot.slane %v8544_v54, %v3129_v33  ;;  %v7104_v57 = vld [vmem:[%s9818_s8 + $0x1e4] ss:$8 sps:$4 sm:$0xff]   ;;  %v3389_v10 = vmax.f32 %v3261_v36, 0.0  ;;  %v7107_v54 = vld [vmem:[%s9818_s8 + $0x1f4] ss:$8 sps:$4 sm:$0xff]  }
 0x35e   : > { %v3395_v9 = vmax.f32 %v3267_v59, 0.0  ;;  %v3270_v46 = vadd.f32 %v8560_v58, %v2877_v1  ;;  %4002 = vmatprep.subr.bf16.mxu0 %v7101_v34  ;;  %v3388_v14 = vmax.f32 %v3260_v29, 0.0  ;;  %v3390_v20 = vmax.f32 %v3262_v41, 0.0  ;;  %v7105_v29 = vld [vmem:[%s9818_s8 + $0x1f0] ss:$8 sps:$4 sm:$0xff]  }
 0x35f   : > { %v3397_v15 = vmax.f32 %v3269_v35, 0.0  ;;  %v3396_v18 = vmax.f32 %v3268_v38, 0.0 }
 0x360   : > { %v3459_v21 = vpack.c.bf16 %v3395_v9, %v3387_v40  ;;  %v3398_v22 = vmax.f32 %v3270_v46, 0.0 }
 0x361   : > { %v8796_v27 = vpack.c.bf16 %v3397_v15, %v3389_v10  ;;  %v3460_v58 = vpack.c.bf16 %v3396_v18, %v3388_v14  ;;  %4003 = vmatpush1.bf16.msra.mxu0 %v7099_v2  ;;  %v2914_v5 = vpop.f32.mrb[48].mxu0 }
 0x362   : > { %v8801_v28 = vpack.c.bf16 %v3398_v22, %v3390_v20  ;;  %v3151_v30 = vadd.f32 %v8781_v3, %v2914_v5  ;;  %v3027_v62 = vpop.f32.mrb[64].mxu1  ;;  %v2916_v63 = vpop.f32.mrb[49].mxu0  ;;  %4004 = vmatprep.subr.bf16.mxu0 %v7104_v57 }
 0x363   : > { %v3153_v23 = vadd.f32 %v8784_v4, %v3027_v62  ;;  %v3152_v24 = vadd.f32 %v8788_v56, %v2916_v63  ;;  %v3029_v8 = vpop.f32.mrb[65].mxu1  ;;  %v2918_v11 = vpop.f32.mrb[50].mxu0  ;;  %3965 = vmatprep.mubr.bf16.mxu0 %v3460_v58 }
 0x364   : > { %v3154_v12 = vadd.f32 %v8794_v25, %v3029_v8  ;;  %v3159_v19 = vadd.f32 %v8781_v3, %v2918_v11  ;;  %v3031_v0 = vpop.f32.mrb[66].mxu1  ;;  %v2920_v31 = vpop.f32.mrb[51].mxu0  ;;  %3966 = vmatmul.mubr.bf16.gmra.mrb[108].mxu0 %v3459_v21  ;;  %v3279_v39 = vmax.f32 %v3151_v30, 0.0 }
 0x365   : > { %v3161_v34 = vadd.f32 %v8784_v4, %v3031_v0  ;;  %v3160_v33 = vadd.f32 %v8788_v56, %v2920_v31  ;;  %v3033_v36 = vpop.f32.mrb[67].mxu1  ;;  %4005 = vmatpush1.bf16.msra.mxu0 %v7102_v42  ;;  %4008 = vmatprep.mubr.bf16.mxu0 %v8590_v61  ;;  %v3281_v59 = vmax.f32 %v3153_v23, 0.0  ;;  %v3280_v60 = vmax.f32 %v3152_v24, 0.0 }
 0x366   : > { %v3287_v49 = vmax.f32 %v3159_v19, 0.0  ;;  %v3162_v41 = vadd.f32 %v8794_v25, %v3033_v36  ;;  %4006 = vmatprep.subr.bf16.mxu0 %v7107_v54  ;;  %v3282_v35 = vmax.f32 %v3154_v12, 0.0 }
 0x367   : > { %v3289_v51 = vmax.f32 %v3161_v34, 0.0  ;;  %v3288_v52 = vmax.f32 %v3160_v33, 0.0 }
 0x368   : > { %v8818_v38 = vpack.c.bf16 %v3287_v49, %v3279_v39  ;;  %v3290_v1 = vmax.f32 %v3162_v41, 0.0 }
 0x369   : > { %v8820_v2 = vpack.c.bf16 %v3289_v51, %v3281_v59  ;;  %v8822_v61 = vpack.c.bf16 %v3288_v52, %v3280_v60  ;;  %4007 = vmatpush1.bf16.msra.mxu0 %v7105_v29  ;;  %v2924_v40 = vpop.f32.mrb[52].mxu0 }
 0x36a   : > { %v8824_v9 = vpack.c.bf16 %v3290_v1, %v3282_v35  ;;  %v3167_v46 = vadd.f32 %v8781_v3, %v2924_v40  ;;  %v3037_v57 = vpop.f32.mrb[68].mxu1  ;;  %v2926_v10 = vpop.f32.mrb[53].mxu0 }
 0x36b   : > { %v3169_v14 = vadd.f32 %v8784_v4, %v3037_v57  ;;  %v3168_v15 = vadd.f32 %v8788_v56, %v2926_v10  ;;  %v3039_v18 = vpop.f32.mrb[69].mxu1  ;;  %v2928_v20 = vpop.f32.mrb[54].mxu0 }
 0x36c   : > { %v3170_v21 = vadd.f32 %v8794_v25, %v3039_v18  ;;  %v3175_v22 = vadd.f32 %v8781_v3, %v2928_v20  ;;  %v3041_v58 = vpop.f32.mrb[70].mxu1  ;;  %v2930_v5 = vpop.f32.mrb[55].mxu0  ;;  %4009 = vmatmul.mubr.bf16.vlgmr.msra.gmra.mrb[80].mxu0 %v8585_v53  ;;  %v3295_v63 = vmax.f32 %v3167_v46, 0.0 }
 0x36d   : > { %v3177_v42 = vadd.f32 %v8784_v4, %v3041_v58  ;;  %v3176_v30 = vadd.f32 %v8788_v56, %v2930_v5  ;;  %v3043_v62 = vpop.f32.mrb[71].mxu1  ;;  %4018 = vmatprep.mubr.bf16.mxu0 %v8626_v17  ;;  %v3297_v24 = vmax.f32 %v3169_v14, 0.0  ;;  %v3296_v8 = vmax.f32 %v3168_v15, 0.0 }
 0x36e   : > { %v3303_v54 = vmax.f32 %v3175_v22, 0.0  ;;  %v3178_v23 = vadd.f32 %v8794_v25, %v3043_v62  ;;  %v3298_v19 = vmax.f32 %v3170_v21, 0.0 }
 0x36f   : > { %v3305_v11 = vmax.f32 %v3177_v42, 0.0  ;;  %v3304_v12 = vmax.f32 %v3176_v30, 0.0 }
 0x370   : > { %v8836_v0 = vpack.c.bf16 %v3303_v54, %v3295_v63  ;;  %v3306_v31 = vmax.f32 %v3178_v23, 0.0 }
 0x371   : > { %v8838_v53 = vpack.c.bf16 %v3305_v11, %v3297_v24  ;;  %v8840_v34 = vpack.c.bf16 %v3304_v12, %v3296_v8  ;;  %v2934_v33 = vpop.f32.mrb[56].mxu0 }
 0x372   : > { %v8842_v36 = vpack.c.bf16 %v3306_v31, %v3298_v19  ;;  %v3183_v17 = vadd.f32 %v8781_v3, %v2934_v33  ;;  %v3047_v29 = vpop.f32.mrb[72].mxu1  ;;  %v2936_v39 = vpop.f32.mrb[57].mxu0 }
 0x373   : > { %v3185_v49 = vadd.f32 %v8784_v4, %v3047_v29  ;;  %v3184_v41 = vadd.f32 %v8788_v56, %v2936_v39  ;;  %v3049_v59 = vpop.f32.mrb[73].mxu1  ;;  %v2938_v60 = vpop.f32.mrb[58].mxu0 }
 0x374   : > { %v3186_v51 = vadd.f32 %v8794_v25, %v3049_v59  ;;  %v3191_v52 = vadd.f32 %v8781_v3, %v2938_v60  ;;  %v3051_v35 = vpop.f32.mrb[74].mxu1  ;;  %v2940_v1 = vpop.f32.mrb[59].mxu0  ;;  %4019 = vmatmul.mubr.bf16.gmra.mrb[84].mxu0 %v8621_v7  ;;  %v3311_v10 = vmax.f32 %v3183_v17, 0.0 }
 0x375   : > { %v3193_v40 = vadd.f32 %v8784_v4, %v3051_v35  ;;  %v3192_v46 = vadd.f32 %v8788_v56, %v2940_v1  ;;  %v3053_v57 = vpop.f32.mrb[75].mxu1  ;;  %4028 = vmatprep.mubr.bf16.mxu0 %v8662_v26  ;;  %v3313_v18 = vmax.f32 %v3185_v49, 0.0  ;;  %v3312_v20 = vmax.f32 %v3184_v41, 0.0 }
 0x376   : > { %v3319_v14 = vmax.f32 %v3191_v52, 0.0  ;;  %v3194_v15 = vadd.f32 %v8794_v25, %v3053_v57  ;;  %v3314_v58 = vmax.f32 %v3186_v51, 0.0 }
 0x377   : > { %v3321_v21 = vmax.f32 %v3193_v40, 0.0  ;;  %v3320_v22 = vmax.f32 %v3192_v46, 0.0 }
 0x378   : > { %v8854_v5 = vpack.c.bf16 %v3319_v14, %v3311_v10  ;;  %v3322_v42 = vmax.f32 %v3194_v15, 0.0 }
 0x379   : > { %v8856_v7 = vpack.c.bf16 %v3321_v21, %v3313_v18  ;;  %v8858_v30 = vpack.c.bf16 %v3320_v22, %v3312_v20  ;;  %v2944_v62 = vpop.f32.mrb[60].mxu0 }
 0x37a   : > { %v8860_v63 = vpack.c.bf16 %v3322_v42, %v3314_v58  ;;  %v3199_v26 = vadd.f32 %v8781_v3, %v2944_v62  ;;  %v3057_v54 = vpop.f32.mrb[76].mxu1  ;;  %v2946_v23 = vpop.f32.mrb[61].mxu0 }
 0x37b   : > { %v3201_v24 = vadd.f32 %v8784_v4, %v3057_v54  ;;  %v3200_v8 = vadd.f32 %v8788_v56, %v2946_v23  ;;  %v3059_v11 = vpop.f32.mrb[77].mxu1  ;;  %v2948_v12 = vpop.f32.mrb[62].mxu0 }
 0x37c   : > { %v3202_v19 = vadd.f32 %v8794_v25, %v3059_v11  ;;  %v3207_v31 = vadd.f32 %v8781_v3, %v2948_v12  ;;  %v3061_v33 = vpop.f32.mrb[78].mxu1  ;;  %v2950_v17 = vpop.f32.mrb[63].mxu0  ;;  %4029 = vmatmul.mubr.bf16.gmra.mrb[88].mxu0 %v8657_v47  ;;  %v3327_v41 = vmax.f32 %v3199_v26, 0.0 }
 0x37d   : > { %v3209_v29 = vadd.f32 %v8784_v4, %v3061_v33  ;;  %v3208_v39 = vadd.f32 %v8788_v56, %v2950_v17  ;;  %v3063_v49 = vpop.f32.mrb[79].mxu1  ;;  %4038 = vmatprep.mubr.bf16.mxu0 %v8689_v44  ;;  %v3329_v51 = vmax.f32 %v3201_v24, 0.0  ;;  %v3328_v52 = vmax.f32 %v3200_v8, 0.0 }
 0x37e   : > { %v3335_v59 = vmax.f32 %v3207_v31, 0.0  ;;  %v3210_v60 = vadd.f32 %v8794_v25, %v3063_v49  ;;  %v3330_v40 = vmax.f32 %v3202_v19, 0.0 }
 0x37f   : > { %v3337_v35 = vmax.f32 %v3209_v29, 0.0  ;;  %v3336_v1 = vmax.f32 %v3208_v39, 0.0 }
 0x380   : > { %v8872_v46 = vpack.c.bf16 %v3335_v59, %v3327_v41  ;;  %v3338_v57 = vmax.f32 %v3210_v60, 0.0 }
 0x381   : > { %v8874_v47 = vpack.c.bf16 %v3337_v35, %v3329_v51  ;;  %v8876_v10 = vpack.c.bf16 %v3336_v1, %v3328_v52  ;;  %v2954_v14 = vpop.f32.mrb[64].mxu0 }
 0x382   : > { %v8878_v15 = vpack.c.bf16 %v3338_v57, %v3330_v40  ;;  %v3215_v44 = vadd.f32 %v8781_v3, %v2954_v14  ;;  %v3067_v18 = vpop.f32.mrb[80].mxu1  ;;  %v2956_v20 = vpop.f32.mrb[65].mxu0 }
 0x383   : > { %v3217_v21 = vadd.f32 %v8784_v4, %v3067_v18  ;;  %v3216_v22 = vadd.f32 %v8788_v56, %v2956_v20  ;;  %v3069_v58 = vpop.f32.mrb[81].mxu1  ;;  %v2958_v42 = vpop.f32.mrb[66].mxu0 }
 0x384   : > { %v3218_v62 = vadd.f32 %v8794_v25, %v3069_v58  ;;  %v3223_v26 = vadd.f32 %v8781_v3, %v2958_v42  ;;  %v3071_v54 = vpop.f32.mrb[82].mxu1  ;;  %v2960_v23 = vpop.f32.mrb[67].mxu0  ;;  %4039 = vmatmul.mubr.bf16.gmra.mrb[92].mxu0 %v8684_v16  ;;  %v3343_v12 = vmax.f32 %v3215_v44, 0.0 }
 0x385   : > { %v3225_v24 = vadd.f32 %v8784_v4, %v3071_v54  ;;  %v3224_v8 = vadd.f32 %v8788_v56, %v2960_v23  ;;  %v3073_v11 = vpop.f32.mrb[83].mxu1  ;;  %4048 = vmatprep.mubr.bf16.mxu0 %v8713_v13  ;;  %v3345_v33 = vmax.f32 %v3217_v21, 0.0  ;;  %v3344_v17 = vmax.f32 %v3216_v22, 0.0 }
 0x386   : > { %v3351_v19 = vmax.f32 %v3223_v26, 0.0  ;;  %v3226_v31 = vadd.f32 %v8794_v25, %v3073_v11  ;;  %v3346_v49 = vmax.f32 %v3218_v62, 0.0 }
 0x387   : > { %v3353_v29 = vmax.f32 %v3225_v24, 0.0  ;;  %v3352_v39 = vmax.f32 %v3224_v8, 0.0 }
 0x388   : > { %v8890_v41 = vpack.c.bf16 %v3351_v19, %v3343_v12  ;;  %v3354_v59 = vmax.f32 %v3226_v31, 0.0 }
 0x389   : > { %v8892_v16 = vpack.c.bf16 %v3353_v29, %v3345_v33  ;;  %v8894_v60 = vpack.c.bf16 %v3352_v39, %v3344_v17  ;;  %v2964_v51 = vpop.f32.mrb[68].mxu0 }
 0x38a   : > { %v8896_v52 = vpack.c.bf16 %v3354_v59, %v3346_v49  ;;  %v3231_v13 = vadd.f32 %v8781_v3, %v2964_v51  ;;  %v3077_v35 = vpop.f32.mrb[84].mxu1  ;;  %v2966_v1 = vpop.f32.mrb[69].mxu0 }
 0x38b   : > { %v3233_v40 = vadd.f32 %v8784_v4, %v3077_v35  ;;  %v3232_v57 = vadd.f32 %v8788_v56, %v2966_v1  ;;  %v3079_v14 = vpop.f32.mrb[85].mxu1  ;;  %v2968_v44 = vpop.f32.mrb[70].mxu0 }
 0x38c   : > { %v3234_v18 = vadd.f32 %v8794_v25, %v3079_v14  ;;  %v3239_v20 = vadd.f32 %v8781_v3, %v2968_v44  ;;  %v3081_v21 = vpop.f32.mrb[86].mxu1  ;;  %v2970_v22 = vpop.f32.mrb[71].mxu0  ;;  %4049 = vmatmul.mubr.bf16.gmra.mrb[96].mxu0 %v8708_v6  ;;  %v3359_v26 = vmax.f32 %v3231_v13, 0.0 }
 0x38d   : > { %v3241_v58 = vadd.f32 %v8784_v4, %v3081_v21  ;;  %v3240_v42 = vadd.f32 %v8788_v56, %v2970_v22  ;;  %v3083_v62 = vpop.f32.mrb[87].mxu1  ;;  %4058 = vmatprep.mubr.bf16.mxu0 %v8737_v55  ;;  %v3361_v24 = vmax.f32 %v3233_v40, 0.0  ;;  %v3360_v8 = vmax.f32 %v3232_v57, 0.0 }
 0x38e   : > { %v3367_v54 = vmax.f32 %v3239_v20, 0.0  ;;  %v3242_v23 = vadd.f32 %v8794_v25, %v3083_v62  ;;  %v3362_v19 = vmax.f32 %v3234_v18, 0.0 }
 0x38f   : > { %v3369_v11 = vmax.f32 %v3241_v58, 0.0  ;;  %v3368_v12 = vmax.f32 %v3240_v42, 0.0 }
 0x390   : > { %v8908_v31 = vpack.c.bf16 %v3367_v54, %v3359_v26  ;;  %v3370_v33 = vmax.f32 %v3242_v23, 0.0 }
 0x391   : > { %v8910_v6 = vpack.c.bf16 %v3369_v11, %v3361_v24  ;;  %v8912_v17 = vpack.c.bf16 %v3368_v12, %v3360_v8  ;;  %v2974_v29 = vpop.f32.mrb[72].mxu0 }
 0x392   : > { %v8914_v39 = vpack.c.bf16 %v3370_v33, %v3362_v19  ;;  %v3247_v55 = vadd.f32 %v8781_v3, %v2974_v29  ;;  %v3087_v49 = vpop.f32.mrb[88].mxu1  ;;  %v2976_v59 = vpop.f32.mrb[73].mxu0 }
 0x393   : > { %v3249_v51 = vadd.f32 %v8784_v4, %v3087_v49  ;;  %v3248_v13 = vadd.f32 %v8788_v56, %v2976_v59  ;;  %v3089_v35 = vpop.f32.mrb[89].mxu1  ;;  %v2978_v1 = vpop.f32.mrb[74].mxu0 }
 0x394   : > { %v3250_v40 = vadd.f32 %v8794_v25, %v3089_v35  ;;  %v3255_v57 = vadd.f32 %v8781_v3, %v2978_v1  ;;  %v3091_v14 = vpop.f32.mrb[90].mxu1  ;;  %v2980_v44 = vpop.f32.mrb[75].mxu0  ;;  %4059 = vmatmul.mubr.bf16.gmra.mrb[100].mxu0 %v8732_v37  ;;  %v3375_v22 = vmax.f32 %v3247_v55, 0.0 }
 0x395   : > { %v3257_v18 = vadd.f32 %v8784_v4, %v3091_v14  ;;  %v3256_v20 = vadd.f32 %v8788_v56, %v2980_v44  ;;  %v3093_v21 = vpop.f32.mrb[91].mxu1  ;;  %4068 = vmatprep.mubr.bf16.mxu0 %v8763_v32  ;;  %v3377_v62 = vmax.f32 %v3249_v51, 0.0  ;;  %v3376_v26 = vmax.f32 %v3248_v13, 0.0 }
 0x396   : > { %v3383_v58 = vmax.f32 %v3255_v57, 0.0  ;;  %v3258_v42 = vadd.f32 %v8794_v25, %v3093_v21  ;;  %v3378_v24 = vmax.f32 %v3250_v40, 0.0 }
 0x397   : > { %v3385_v54 = vmax.f32 %v3257_v18, 0.0  ;;  %v3384_v23 = vmax.f32 %v3256_v20, 0.0 }
 0x398   : > { %v8926_v8 = vpack.c.bf16 %v3383_v58, %v3375_v22  ;;  %v3386_v11 = vmax.f32 %v3258_v42, 0.0 }
 0x399   : > { %v8928_v37 = vpack.c.bf16 %v3385_v54, %v3377_v62  ;;  %v8930_v12 = vpack.c.bf16 %v3384_v23, %v3376_v26  ;;  %v2984_v19 = vpop.f32.mrb[76].mxu0 }
 0x39a   : > { %v8932_v33 = vpack.c.bf16 %v3386_v11, %v3378_v24  ;;  %v3263_v32 = vadd.f32 %v8781_v3, %v2984_v19  ;;  %v3097_v29 = vpop.f32.mrb[92].mxu1  ;;  %v2986_v55 = vpop.f32.mrb[77].mxu0  ;;  %v7126_v24 = vld [vmem:[%s9822_s12 + $0x4] ss:$8 sps:$4 sm:$0xff]   ;;  %v3531_v11 = vld [vmem:[%s9819_s9] sm:$0x3] }
 0x39b   : > { %v3265_v49 = vadd.f32 %v8784_v4, %v3097_v29  ;;  %v3264_v59 = vadd.f32 %v8788_v56, %v2986_v55  ;;  %v3099_v51 = vpop.f32.mrb[93].mxu1  ;;  %v2988_v13 = vpop.f32.mrb[78].mxu0  ;;  %v8969_v19 = vrot.slane %v3531_v11, %v7885_v50 }
 0x39c   : > { %v3266_v35 = vadd.f32 %v8794_v25, %v3099_v51  ;;  %v3271_v1 = vadd.f32 %v8781_v3, %v2988_v13  ;;  %v3101_v40 = vpop.f32.mrb[94].mxu1  ;;  %v2990_v57 = vpop.f32.mrb[79].mxu0  ;;  %4069 = vmatmul.mubr.bf16.gmra.mrb[104].mxu0 %v8756_v43  ;;  %v3391_v20 = vmax.f32 %v3263_v32, 0.0 }
 0x39d   : > { %v3273_v14 = vadd.f32 %v8784_v4, %v3101_v40  ;;  %v3272_v44 = vadd.f32 %v8788_v56, %v2990_v57  ;;  %v3103_v18 = vpop.f32.mrb[95].mxu1  ;;  %4078 = vmatprep.mubr.bf16.mxu0 %v8801_v28  ;;  %v3393_v58 = vmax.f32 %v3265_v49, 0.0  ;;  %v3392_v42 = vmax.f32 %v3264_v59, 0.0  ;;  %v7123_v28 = vld [vmem:[%s9820_s10 + $0x38] sm:$0xff]  }
 0x39e   : > { %v3399_v21 = vmax.f32 %v3271_v1, 0.0  ;;  %v3274_v22 = vadd.f32 %v8794_v25, %v3103_v18  ;;  %v3394_v3 = vmax.f32 %v3266_v35, 0.0  ;;  %v7122_v25 = vld [vmem:[%s9820_s10 + $0x78] sm:$0xff]  }
 0x39f   : > { %v3401_v62 = vmax.f32 %v3273_v14, 0.0  ;;  %v3400_v26 = vmax.f32 %v3272_v44, 0.0  ;;  %6493 = vmatprep.subr.bf16.mxu1 %v7122_v25 }
 0x3a0   : > { %v8944_v54 = vpack.c.bf16 %v3399_v21, %v3391_v20  ;;  %v3402_v23 = vmax.f32 %v3274_v22, 0.0  ;;  %6494 = vmatpush3.bf16.msra.mxu1 %v7123_v28  ;;  %v7124_v21 = vld [vmem:[%s9822_s12] ss:$8 sps:$4 sm:$0xff]   ;;  %v7127_v28 = vld [vmem:[%s9822_s12 + $0x10] ss:$8 sps:$4 sm:$0xff]  }
 0x3a1   : > { %v8946_v43 = vpack.c.bf16 %v3401_v62, %v3393_v58  ;;  %v8948_v4 = vpack.c.bf16 %v3400_v26, %v3392_v42  ;;  %4789 = vmatprep.subr.bf16.mxu1 %v7126_v24  ;;  %v7129_v42 = vld [vmem:[%s9822_s12 + $0x14] ss:$8 sps:$4 sm:$0xff]  }
 0x3a2   : > { %v8950_v56 = vpack.c.bf16 %v3402_v23, %v3394_v3 }
 0x3a4   : > { %4079 = vmatmul.mubr.bf16.gmra.mrb[108].mxu0 %v8796_v27  ;;  %v8966_v27 = vrot.slane %v3531_v11, %v7879_v48 }
 0x43f   : > { %v4010_v32 = vpop.f32.mrb[80].mxu0 }
 0x440   : > { %v6713_v29 = vadd.f32 %v4010_v32, %v8966_v27  ;;  %v4012_v55 = vpop.f32.mrb[81].mxu0  ;;  %v7132_v32 = vld [vmem:[%s9822_s12 + $0x24] ss:$8 sps:$4 sm:$0xff]  }
 0x441   : > { %v6714_v49 = vadd.f32 %v4012_v55, %v8969_v19  ;;  %v4014_v59 = vpop.f32.mrb[82].mxu0 }
 0x442   : > { %v6715_v51 = vadd.f32 %v4014_v59, %v8966_v27  ;;  %v4016_v13 = vpop.f32.mrb[83].mxu0  ;;  %v4089_v1 = vmax.f32 %v6713_v29, 0.0 }
 0x443   : > { %v6716_v35 = vadd.f32 %v4016_v13, %v8969_v19  ;;  %v4090_v57 = vmax.f32 %v6714_v49, 0.0  ;;  %v7130_v13 = vld [vmem:[%s9822_s12 + $0x20] ss:$8 sps:$4 sm:$0xff]  }
 0x444   : > { %v4091_v40 = vmax.f32 %v6715_v51, 0.0 }
 0x445   : > { %v4092_v14 = vmax.f32 %v6716_v35, 0.0 }
 0x446   : > { %v4121_v44 = vpack.c.bf16 %v4091_v40, %v4089_v1  ;;  %v7135_v40 = vld [vmem:[%s9822_s12 + $0x34] ss:$8 sps:$4 sm:$0xff]  }
 0x447   : > { %v4122_v18 = vpack.c.bf16 %v4092_v14, %v4090_v57  ;;  %v4020_v20 = vpop.f32.mrb[84].mxu0 }
 0x448   : > { %v6717_v22 = vadd.f32 %v4020_v20, %v8966_v27  ;;  %v4022_v58 = vpop.f32.mrb[85].mxu0 }
 0x449   : > { %v6718_v62 = vadd.f32 %v4022_v58, %v8969_v19  ;;  %v4024_v26 = vpop.f32.mrb[86].mxu0  ;;  %4304 = vmatprep.mubr.bf16.mxu1 %v4122_v18 }
 0x44a   : > { %v6719_v3 = vadd.f32 %v4024_v26, %v8966_v27  ;;  %v4026_v23 = vpop.f32.mrb[87].mxu0  ;;  %4305 = vmatmul.mubr.bf16.vlgmr.msra.gmra.mrb[96].mxu1 %v4121_v44  ;;  %v4093_v24 = vmax.f32 %v6717_v22, 0.0 }
 0x44b   : > { %v6720_v25 = vadd.f32 %v4026_v23, %v8969_v19  ;;  %4790 = vmatpush1.bf16.msra.mxu1 %v7124_v21  ;;  %v4094_v29 = vmax.f32 %v6718_v62, 0.0  ;;  %v7133_v21 = vld [vmem:[%s9822_s12 + $0x30] ss:$8 sps:$4 sm:$0xff]  }
 0x44c   : > { %v4095_v11 = vmax.f32 %v6719_v3, 0.0  ;;  %4791 = vmatprep.subr.bf16.mxu1 %v7129_v42  ;;  %v7138_v42 = vld [vmem:[%s9822_s12 + $0x44] ss:$8 sps:$4 sm:$0xff]  }
 0x44d   : > { %v4096_v55 = vmax.f32 %v6720_v25, 0.0 }
 0x44e   : > { %v4123_v49 = vpack.c.bf16 %v4095_v11, %v4093_v24 }
 0x44f   : > { %v4124_v59 = vpack.c.bf16 %v4096_v55, %v4094_v29  ;;  %4792 = vmatpush1.bf16.msra.mxu1 %v7127_v28  ;;  %v4030_v51 = vpop.f32.mrb[88].mxu0  ;;  %v7136_v28 = vld [vmem:[%s9822_s12 + $0x40] ss:$8 sps:$4 sm:$0xff]  }
 0x450   : > { %v6721_v35 = vadd.f32 %v4030_v51, %v8966_v27  ;;  %v4032_v1 = vpop.f32.mrb[89].mxu0  ;;  %4793 = vmatprep.subr.bf16.mxu1 %v7132_v32  ;;  %v7141_v32 = vld [vmem:[%s9822_s12 + $0x54] ss:$8 sps:$4 sm:$0xff]  }
 0x451   : > { %v6722_v57 = vadd.f32 %v4032_v1, %v8969_v19  ;;  %v4034_v14 = vpop.f32.mrb[90].mxu0  ;;  %4312 = vmatprep.mubr.bf16.mxu1 %v4124_v59 }
 0x452   : > { %v6723_v44 = vadd.f32 %v4034_v14, %v8966_v27  ;;  %v4036_v18 = vpop.f32.mrb[91].mxu0  ;;  %4313 = vmatmul.mubr.bf16.gmra.mrb[100].mxu1 %v4123_v49  ;;  %v4097_v22 = vmax.f32 %v6721_v35, 0.0 }
 0x453   : > { %v6724_v20 = vadd.f32 %v4036_v18, %v8969_v19  ;;  %4794 = vmatpush1.bf16.msra.mxu1 %v7130_v13  ;;  %v4098_v62 = vmax.f32 %v6722_v57, 0.0  ;;  %v7139_v13 = vld [vmem:[%s9822_s12 + $0x50] ss:$8 sps:$4 sm:$0xff]  }
 0x454   : > { %v4099_v58 = vmax.f32 %v6723_v44, 0.0  ;;  %4795 = vmatprep.subr.bf16.mxu1 %v7135_v40  ;;  %v7144_v40 = vld [vmem:[%s9822_s12 + $0x64] ss:$8 sps:$4 sm:$0xff]  }
 0x455   : > { %v4100_v26 = vmax.f32 %v6724_v20, 0.0 }
 0x456   : > { %v4125_v3 = vpack.c.bf16 %v4099_v58, %v4097_v22 }
 0x457   : > { %v4126_v23 = vpack.c.bf16 %v4100_v26, %v4098_v62  ;;  %4796 = vmatpush1.bf16.msra.mxu1 %v7133_v21  ;;  %v4040_v25 = vpop.f32.mrb[92].mxu0  ;;  %v7142_v21 = vld [vmem:[%s9822_s12 + $0x60] ss:$8 sps:$4 sm:$0xff]  }
 0x458   : > { %v6725_v24 = vadd.f32 %v4040_v25, %v8966_v27  ;;  %v4042_v11 = vpop.f32.mrb[93].mxu0  ;;  %4797 = vmatprep.subr.bf16.mxu1 %v7138_v42  ;;  %v7147_v42 = vld [vmem:[%s9822_s12 + $0x74] ss:$8 sps:$4 sm:$0xff]  }
 0x459   : > { %v6726_v29 = vadd.f32 %v4042_v11, %v8969_v19  ;;  %v4044_v55 = vpop.f32.mrb[94].mxu0  ;;  %4320 = vmatprep.mubr.bf16.mxu1 %v4126_v23 }
 0x45a   : > { %v6727_v49 = vadd.f32 %v4044_v55, %v8966_v27  ;;  %v4046_v59 = vpop.f32.mrb[95].mxu0  ;;  %4321 = vmatmul.mubr.bf16.gmra.mrb[104].mxu1 %v4125_v3  ;;  %v4101_v35 = vmax.f32 %v6725_v24, 0.0 }
 0x45b   : > { %v6728_v51 = vadd.f32 %v4046_v59, %v8969_v19  ;;  %4798 = vmatpush1.bf16.msra.mxu1 %v7136_v28  ;;  %v4102_v57 = vmax.f32 %v6726_v29, 0.0  ;;  %v7145_v28 = vld [vmem:[%s9822_s12 + $0x70] ss:$8 sps:$4 sm:$0xff]  }
 0x45c   : > { %v4103_v1 = vmax.f32 %v6727_v49, 0.0  ;;  %4799 = vmatprep.subr.bf16.mxu1 %v7141_v32  ;;  %v7150_v32 = vld [vmem:[%s9822_s12 + $0x84] ss:$8 sps:$4 sm:$0xff]  }
 0x45d   : > { %v4104_v14 = vmax.f32 %v6728_v51, 0.0 }
 0x45e   : > { %v4127_v44 = vpack.c.bf16 %v4103_v1, %v4101_v35 }
 0x45f   : > { %v4128_v18 = vpack.c.bf16 %v4104_v14, %v4102_v57  ;;  %4800 = vmatpush1.bf16.msra.mxu1 %v7139_v13  ;;  %v4050_v20 = vpop.f32.mrb[96].mxu0  ;;  %v7148_v13 = vld [vmem:[%s9822_s12 + $0x80] ss:$8 sps:$4 sm:$0xff]  }
 0x460   : > { %v6729_v22 = vadd.f32 %v4050_v20, %v8966_v27  ;;  %v4052_v58 = vpop.f32.mrb[97].mxu0  ;;  %4801 = vmatprep.subr.bf16.mxu1 %v7144_v40  ;;  %v7153_v40 = vld [vmem:[%s9822_s12 + $0x94] ss:$8 sps:$4 sm:$0xff]  }
 0x461   : > { %v6730_v62 = vadd.f32 %v4052_v58, %v8969_v19  ;;  %v4054_v26 = vpop.f32.mrb[98].mxu0  ;;  %4328 = vmatprep.mubr.bf16.mxu1 %v4128_v18 }
 0x462   : > { %v6731_v3 = vadd.f32 %v4054_v26, %v8966_v27  ;;  %v4056_v23 = vpop.f32.mrb[99].mxu0  ;;  %4329 = vmatmul.mubr.bf16.gmra.mrb[108].mxu1 %v4127_v44  ;;  %v4105_v24 = vmax.f32 %v6729_v22, 0.0 }
 0x463   : > { %v6732_v25 = vadd.f32 %v4056_v23, %v8969_v19  ;;  %4802 = vmatpush1.bf16.msra.mxu1 %v7142_v21  ;;  %v4106_v29 = vmax.f32 %v6730_v62, 0.0  ;;  %v7151_v21 = vld [vmem:[%s9822_s12 + $0x90] ss:$8 sps:$4 sm:$0xff]  }
 0x464   : > { %v4107_v11 = vmax.f32 %v6731_v3, 0.0  ;;  %4803 = vmatprep.subr.bf16.mxu1 %v7147_v42  ;;  %v7156_v42 = vld [vmem:[%s9822_s12 + $0xa4] ss:$8 sps:$4 sm:$0xff]  }
 0x465   : > { %v4108_v55 = vmax.f32 %v6732_v25, 0.0 }
 0x466   : > { %v4129_v49 = vpack.c.bf16 %v4107_v11, %v4105_v24 }
 0x467   : > { %v4130_v59 = vpack.c.bf16 %v4108_v55, %v4106_v29  ;;  %4804 = vmatpush1.bf16.msra.mxu1 %v7145_v28  ;;  %v4060_v51 = vpop.f32.mrb[100].mxu0  ;;  %v7154_v28 = vld [vmem:[%s9822_s12 + $0xa0] ss:$8 sps:$4 sm:$0xff]  }
 0x468   : > { %v6733_v35 = vadd.f32 %v4060_v51, %v8966_v27  ;;  %v4062_v1 = vpop.f32.mrb[101].mxu0  ;;  %4805 = vmatprep.subr.bf16.mxu1 %v7150_v32  ;;  %v7159_v32 = vld [vmem:[%s9822_s12 + $0xb4] ss:$8 sps:$4 sm:$0xff]  }
 0x469   : > { %v6734_v57 = vadd.f32 %v4062_v1, %v8969_v19  ;;  %v4064_v14 = vpop.f32.mrb[102].mxu0  ;;  %4336 = vmatprep.mubr.bf16.mxu1 %v4130_v59 }
 0x46a   : > { %v6735_v44 = vadd.f32 %v4064_v14, %v8966_v27  ;;  %v4066_v18 = vpop.f32.mrb[103].mxu0  ;;  %4337 = vmatmul.mubr.bf16.gmra.mrb[112].mxu1 %v4129_v49  ;;  %v4109_v22 = vmax.f32 %v6733_v35, 0.0 }
 0x46b   : > { %v6736_v20 = vadd.f32 %v4066_v18, %v8969_v19  ;;  %4806 = vmatpush1.bf16.msra.mxu1 %v7148_v13  ;;  %v4110_v62 = vmax.f32 %v6734_v57, 0.0  ;;  %v7157_v13 = vld [vmem:[%s9822_s12 + $0xb0] ss:$8 sps:$4 sm:$0xff]  }
 0x46c   : > { %v4111_v58 = vmax.f32 %v6735_v44, 0.0  ;;  %4807 = vmatprep.subr.bf16.mxu1 %v7153_v40  ;;  %v7162_v40 = vld [vmem:[%s9822_s12 + $0xc4] ss:$8 sps:$4 sm:$0xff]  }
 0x46d   : > { %v4112_v26 = vmax.f32 %v6736_v20, 0.0 }
 0x46e   : > { %v4131_v3 = vpack.c.bf16 %v4111_v58, %v4109_v22 }
 0x46f   : > { %v4132_v23 = vpack.c.bf16 %v4112_v26, %v4110_v62  ;;  %4808 = vmatpush1.bf16.msra.mxu1 %v7151_v21  ;;  %v4070_v25 = vpop.f32.mrb[104].mxu0  ;;  %v7160_v21 = vld [vmem:[%s9822_s12 + $0xc0] ss:$8 sps:$4 sm:$0xff]  }
 0x470   : > { %v6737_v24 = vadd.f32 %v4070_v25, %v8966_v27  ;;  %v4072_v11 = vpop.f32.mrb[105].mxu0  ;;  %4809 = vmatprep.subr.bf16.mxu1 %v7156_v42  ;;  %v7165_v42 = vld [vmem:[%s9822_s12 + $0xd4] ss:$8 sps:$4 sm:$0xff]  }
 0x471   : > { %v6738_v29 = vadd.f32 %v4072_v11, %v8969_v19  ;;  %v4074_v55 = vpop.f32.mrb[106].mxu0  ;;  %4344 = vmatprep.mubr.bf16.mxu1 %v4132_v23 }
 0x472   : > { %v6739_v49 = vadd.f32 %v4074_v55, %v8966_v27  ;;  %v4076_v59 = vpop.f32.mrb[107].mxu0  ;;  %4345 = vmatmul.mubr.bf16.gmra.mrb[116].mxu1 %v4131_v3  ;;  %v4113_v35 = vmax.f32 %v6737_v24, 0.0 }
 0x473   : > { %v6740_v51 = vadd.f32 %v4076_v59, %v8969_v19  ;;  %4810 = vmatpush1.bf16.msra.mxu1 %v7154_v28  ;;  %v4114_v57 = vmax.f32 %v6738_v29, 0.0  ;;  %v7163_v28 = vld [vmem:[%s9822_s12 + $0xd0] ss:$8 sps:$4 sm:$0xff]   ;;  %v7171_v59 = vld [vmem:[%s9822_s12 + $0xf4] ss:$8 sps:$4 sm:$0xff]  }
 0x474   : > { %v4115_v1 = vmax.f32 %v6739_v49, 0.0  ;;  %4811 = vmatprep.subr.bf16.mxu1 %v7159_v32  ;;  %v7168_v32 = vld [vmem:[%s9822_s12 + $0xe4] ss:$8 sps:$4 sm:$0xff]  }
 0x475   : > { %v4116_v14 = vmax.f32 %v6740_v51, 0.0  ;;  %v7169_v51 = vld [vmem:[%s9822_s12 + $0xf0] ss:$8 sps:$4 sm:$0xff]  }
 0x476   : > { %v4133_v44 = vpack.c.bf16 %v4115_v1, %v4113_v35  ;;  %v7172_v35 = vld [vmem:[%s9822_s12 + $0x100] ss:$8 sps:$4 sm:$0xff]   ;;  %v7177_v1 = vld [vmem:[%s9822_s12 + $0x114] ss:$8 sps:$4 sm:$0xff]  }
 0x477   : > { %v4134_v18 = vpack.c.bf16 %v4116_v14, %v4114_v57  ;;  %4812 = vmatpush1.bf16.msra.mxu1 %v7157_v13  ;;  %v4080_v20 = vpop.f32.mrb[108].mxu0  ;;  %v7174_v13 = vld [vmem:[%s9822_s12 + $0x104] ss:$8 sps:$4 sm:$0xff]   ;;  %v7178_v57 = vld [vmem:[%s9822_s12 + $0x120] ss:$8 sps:$4 sm:$0xff]  }
 0x478   : > { %v6741_v22 = vadd.f32 %v4080_v20, %v8966_v27  ;;  %v4082_v58 = vpop.f32.mrb[109].mxu0  ;;  %4813 = vmatprep.subr.bf16.mxu1 %v7162_v40  ;;  %v7180_v40 = vld [vmem:[%s9822_s12 + $0x124] ss:$8 sps:$4 sm:$0xff]   ;;  %v7190_v20 = vld [vmem:[%s9822_s12 + $0x160] ss:$8 sps:$4 sm:$0xff]  }
 0x479   : > { %v6742_v62 = vadd.f32 %v4082_v58, %v8969_v19  ;;  %v4084_v26 = vpop.f32.mrb[110].mxu0  ;;  %4352 = vmatprep.mubr.bf16.mxu1 %v4134_v18  ;;  %v7186_v14 = vld [vmem:[%s9822_s12 + $0x144] ss:$8 sps:$4 sm:$0xff]  }
 0x47a   : > { %v6743_v3 = vadd.f32 %v4084_v26, %v8966_v27  ;;  %v4086_v23 = vpop.f32.mrb[111].mxu0  ;;  %4353 = vmatmul.mubr.bf16.gmra.mrb[120].mxu1 %v4133_v44  ;;  %v4117_v24 = vmax.f32 %v6741_v22, 0.0  ;;  %v7184_v44 = vld [vmem:[%s9822_s12 + $0x140] ss:$8 sps:$4 sm:$0xff]   ;;  %v7192_v18 = vld [vmem:[%s9822_s12 + $0x164] ss:$8 sps:$4 sm:$0xff]  }
 0x47b   : > { %v6744_v25 = vadd.f32 %v4086_v23, %v8969_v19  ;;  %4814 = vmatpush1.bf16.msra.mxu1 %v7160_v21  ;;  %v4118_v29 = vmax.f32 %v6742_v62, 0.0  ;;  %v7166_v19 = vld [vmem:[%s9822_s12 + $0xe0] ss:$8 sps:$4 sm:$0xff]   ;;  %v7198_v21 = vld [vmem:[%s9822_s12 + $0x184] ss:$8 sps:$4 sm:$0xff]  }
 0x47c   : > { %v4119_v11 = vmax.f32 %v6743_v3, 0.0  ;;  %4815 = vmatprep.subr.bf16.mxu1 %v7165_v42  ;;  %v7196_v22 = vld [vmem:[%s9822_s12 + $0x180] ss:$8 sps:$4 sm:$0xff]   ;;  %v7204_v58 = vld [vmem:[%s9822_s12 + $0x1a4] ss:$8 sps:$4 sm:$0xff]  }
 0x47d   : > { %v4120_v55 = vmax.f32 %v6744_v25, 0.0  ;;  %v7202_v42 = vld [vmem:[%s9822_s12 + $0x1a0] ss:$8 sps:$4 sm:$0xff]   ;;  %v7210_v62 = vld [vmem:[%s9822_s12 + $0x1c4] ss:$8 sps:$4 sm:$0xff]  }
 0x47e   : > { %v4135_v49 = vpack.c.bf16 %v4119_v11, %v4117_v24  ;;  %v7208_v26 = vld [vmem:[%s9822_s12 + $0x1c0] ss:$8 sps:$4 sm:$0xff]   ;;  %v7216_v3 = vld [vmem:[%s9822_s12 + $0x1e4] ss:$8 sps:$4 sm:$0xff]  }
 0x47f   : > { %v4136_v27 = vpack.c.bf16 %v4120_v55, %v4118_v29  ;;  %4816 = vmatpush1.bf16.msra.mxu1 %v7163_v28  ;;  %v7214_v23 = vld [vmem:[%s9822_s12 + $0x1e0] ss:$8 sps:$4 sm:$0xff]  }
 0x480   : > { %4817 = vmatprep.subr.bf16.mxu1 %v7168_v32  ;;  %v7230_v25 = vld [vmem:[%s9824_s14 + $0x68] sm:$0xff]  }
 0x481   : > { %4360 = vmatprep.mubr.bf16.mxu1 %v4136_v27  ;;  %v7231_v28 = vld [vmem:[%s9824_s14 + $0x28] sm:$0xff]  }
 0x482   : > { %4361 = vmatmul.mubr.bf16.gmra.mrb[124].mxu1 %v4135_v49 }
 0x483   : > { %4818 = vmatpush1.bf16.msra.mxu1 %v7166_v19  ;;  %4821 = vmatprep.mubr.bf16.mxu1 %v8822_v61  ;;  %v7175_v61 = vld [vmem:[%s9822_s12 + $0x110] ss:$8 sps:$4 sm:$0xff]  }
 0x484   : > { %4819 = vmatprep.subr.bf16.mxu1 %v7171_v59 }
 0x487   : > { %4820 = vmatpush1.bf16.msra.mxu1 %v7169_v51 }
 0x488   : > { %4902 = vmatprep.subr.bf16.mxu1 %v7174_v13 }
 0x48a   : > { %4822 = vmatmul.mubr.bf16.vlgmr.msra.gmra.mrb[128].mxu1 %v8818_v38  ;;  %v7183_v38 = vld [vmem:[%s9822_s12 + $0x134] ss:$8 sps:$4 sm:$0xff]  }
 0x48b   : > { %4903 = vmatpush1.bf16.msra.mxu1 %v7172_v35  ;;  %4831 = vmatprep.mubr.bf16.mxu1 %v8840_v34  ;;  %v7181_v34 = vld [vmem:[%s9822_s12 + $0x130] ss:$8 sps:$4 sm:$0xff]  }
 0x48c   : > { %4904 = vmatprep.subr.bf16.mxu1 %v7177_v1 }
 0x48f   : > { %4905 = vmatpush1.bf16.msra.mxu1 %v7175_v61 }
 0x490   : > { %4906 = vmatprep.subr.bf16.mxu1 %v7180_v40 }
 0x492   : > { %4832 = vmatmul.mubr.bf16.gmra.mrb[132].mxu1 %v8836_v0  ;;  %v7189_v0 = vld [vmem:[%s9822_s12 + $0x154] ss:$8 sps:$4 sm:$0xff]  }
 0x493   : > { %4907 = vmatpush1.bf16.msra.mxu1 %v7178_v57  ;;  %4841 = vmatprep.mubr.bf16.mxu1 %v8858_v30  ;;  %v7187_v30 = vld [vmem:[%s9822_s12 + $0x150] ss:$8 sps:$4 sm:$0xff]  }
 0x494   : > { %4908 = vmatprep.subr.bf16.mxu1 %v7183_v38 }
 0x497   : > { %4909 = vmatpush1.bf16.msra.mxu1 %v7181_v34 }
 0x498   : > { %4910 = vmatprep.subr.bf16.mxu1 %v7186_v14 }
 0x49a   : > { %4842 = vmatmul.mubr.bf16.gmra.mrb[136].mxu1 %v8854_v5  ;;  %v7195_v5 = vld [vmem:[%s9822_s12 + $0x174] ss:$8 sps:$4 sm:$0xff]  }
 0x49b   : > { %4911 = vmatpush1.bf16.msra.mxu1 %v7184_v44  ;;  %4851 = vmatprep.mubr.bf16.mxu1 %v8876_v10  ;;  %v7193_v10 = vld [vmem:[%s9822_s12 + $0x170] ss:$8 sps:$4 sm:$0xff]  }
 0x49c   : > { %4912 = vmatprep.subr.bf16.mxu1 %v7189_v0 }
 0x49f   : > { %4913 = vmatpush1.bf16.msra.mxu1 %v7187_v30 }
 0x4a0   : > { %4914 = vmatprep.subr.bf16.mxu1 %v7192_v18 }
 0x4a2   : > { %4852 = vmatmul.mubr.bf16.gmra.mrb[140].mxu1 %v8872_v46  ;;  %v7201_v46 = vld [vmem:[%s9822_s12 + $0x194] ss:$8 sps:$4 sm:$0xff]  }
 0x4a3   : > { %4915 = vmatpush1.bf16.msra.mxu1 %v7190_v20  ;;  %4861 = vmatprep.mubr.bf16.mxu1 %v8894_v60  ;;  %v7199_v60 = vld [vmem:[%s9822_s12 + $0x190] ss:$8 sps:$4 sm:$0xff]  }
 0x4a4   : > { %4916 = vmatprep.subr.bf16.mxu1 %v7195_v5 }
 0x4a7   : > { %4917 = vmatpush1.bf16.msra.mxu1 %v7193_v10 }
 0x4a8   : > { %4918 = vmatprep.subr.bf16.mxu1 %v7198_v21 }
 0x4aa   : > { %4862 = vmatmul.mubr.bf16.gmra.mrb[144].mxu1 %v8890_v41  ;;  %v7207_v41 = vld [vmem:[%s9822_s12 + $0x1b4] ss:$8 sps:$4 sm:$0xff]  }
 0x4ab   : > { %4919 = vmatpush1.bf16.msra.mxu1 %v7196_v22  ;;  %4871 = vmatprep.mubr.bf16.mxu1 %v8912_v17  ;;  %v7205_v17 = vld [vmem:[%s9822_s12 + $0x1b0] ss:$8 sps:$4 sm:$0xff]  }
 0x4ac   : > { %4920 = vmatprep.subr.bf16.mxu1 %v7201_v46 }
 0x4af   : > { %4921 = vmatpush1.bf16.msra.mxu1 %v7199_v60 }
 0x4b0   : > { %4922 = vmatprep.subr.bf16.mxu1 %v7204_v58 }
 0x4b2   : > { %4872 = vmatmul.mubr.bf16.gmra.mrb[148].mxu1 %v8908_v31  ;;  %v7213_v31 = vld [vmem:[%s9822_s12 + $0x1d4] ss:$8 sps:$4 sm:$0xff]  }
 0x4b3   : > { %4923 = vmatpush1.bf16.msra.mxu1 %v7202_v42  ;;  %4881 = vmatprep.mubr.bf16.mxu1 %v8930_v12  ;;  %v7211_v12 = vld [vmem:[%s9822_s12 + $0x1d0] ss:$8 sps:$4 sm:$0xff]  }
 0x4b4   : > { %4924 = vmatprep.subr.bf16.mxu1 %v7207_v41 }
 0x4b7   : > { %4925 = vmatpush1.bf16.msra.mxu1 %v7205_v17 }
 0x4b8   : > { %4926 = vmatprep.subr.bf16.mxu1 %v7210_v62 }
 0x4ba   : > { %4882 = vmatmul.mubr.bf16.gmra.mrb[152].mxu1 %v8926_v8  ;;  %v7219_v8 = vld [vmem:[%s9822_s12 + $0x1f4] ss:$8 sps:$4 sm:$0xff]  }
 0x4bb   : > { %4927 = vmatpush1.bf16.msra.mxu1 %v7208_v26  ;;  %4891 = vmatprep.mubr.bf16.mxu1 %v8948_v4  ;;  %v7217_v4 = vld [vmem:[%s9822_s12 + $0x1f0] ss:$8 sps:$4 sm:$0xff]  }
 0x4bc   : > { %4928 = vmatprep.subr.bf16.mxu1 %v7213_v31 }
 0x4bf   : > { %4929 = vmatpush1.bf16.msra.mxu1 %v7211_v12 }
 0x4c0   : > { %4930 = vmatprep.subr.bf16.mxu1 %v7216_v3 }
 0x4c2   : > { %4892 = vmatmul.mubr.bf16.gmra.mrb[156].mxu1 %v8944_v54  ;;  %v7221_v54 = vld [vmem:[%s9824_s14] sm:$0xff]  }
 0x4c3   : > { %4931 = vmatpush1.bf16.msra.mxu1 %v7214_v23  ;;  %4934 = vmatprep.mubr.bf16.mxu1 %v8824_v9  ;;  %v7220_v9 = vld [vmem:[%s9824_s14 + $0x40] sm:$0xff]  }
 0x4c4   : > { %4932 = vmatprep.subr.bf16.mxu1 %v7219_v8  ;;  %6543 = vmatprep.subr.bf16.mxu0 %v7220_v9 }
 0x4c5   : > { %6544 = vmatpush3.bf16.msra.mxu0 %v7221_v54 }
 0x4c7   : > { %4933 = vmatpush1.bf16.msra.mxu1 %v7217_v4 }
 0x4c8   : > { %6697 = vmatprep.subr.bf16.mxu1 %v7220_v9 }
 0x4ca   : > { %4935 = vmatmul.mubr.bf16.vlgmr.msra.gmra.mrb[128].mxu1 %v8820_v2  ;;  %v7222_v2 = vld [vmem:[%s9824_s14 + $0x48] sm:$0xff]  }
 0x4cb   : > { %4944 = vmatprep.mubr.bf16.mxu1 %v8842_v36  ;;  %6705 = vmatpush3.bf16.msra.mxu1 %v7221_v54  ;;  %v7224_v36 = vld [vmem:[%s9824_s14 + $0x50] sm:$0xff]  }
 0x4cc   : > { %6545 = vmatprep.subr.bf16.mxu0 %v7222_v2  ;;  %6698 = vmatprep.subr.bf16.mxu1 %v7222_v2 }
 0x4d2   : > { %4945 = vmatmul.mubr.bf16.gmra.mrb[132].mxu1 %v8838_v53  ;;  %v7223_v53 = vld [vmem:[%s9824_s14 + $0x8] sm:$0xff]  }
 0x4d3   : > { %4954 = vmatprep.mubr.bf16.mxu1 %v8860_v63  ;;  %6546 = vmatpush3.bf16.msra.mxu0 %v7223_v53  ;;  %v7226_v63 = vld [vmem:[%s9824_s14 + $0x58] sm:$0xff]  }
 0x4d4   : > { %6706 = vmatpush3.bf16.msra.mxu1 %v7223_v53  ;;  %6547 = vmatprep.subr.bf16.mxu0 %v7224_v36 }
 0x4d5   : > { %6699 = vmatprep.subr.bf16.mxu1 %v7224_v36 }
 0x4da   : > { %4955 = vmatmul.mubr.bf16.gmra.mrb[136].mxu1 %v8856_v7  ;;  %v7225_v7 = vld [vmem:[%s9824_s14 + $0x10] sm:$0xff]  }
 0x4db   : > { %4964 = vmatprep.mubr.bf16.mxu1 %v8878_v15  ;;  %6548 = vmatpush3.bf16.msra.mxu0 %v7225_v7  ;;  %v7227_v15 = vld [vmem:[%s9824_s14 + $0x18] sm:$0xff]  }
 0x4dc   : > { %6707 = vmatpush3.bf16.msra.mxu1 %v7225_v7  ;;  %6549 = vmatprep.subr.bf16.mxu0 %v7226_v63 }
 0x4dd   : > { %6700 = vmatprep.subr.bf16.mxu1 %v7226_v63 }
 0x4df   : > { %6550 = vmatpush3.bf16.msra.mxu0 %v7227_v15 }
 0x4e0   : > { %6708 = vmatpush3.bf16.msra.mxu1 %v7227_v15 }
 0x4e2   : > { %4965 = vmatmul.mubr.bf16.gmra.mrb[140].mxu1 %v8874_v47  ;;  %v7228_v47 = vld [vmem:[%s9824_s14 + $0x60] sm:$0xff]  }
 0x4e3   : > { %4974 = vmatprep.mubr.bf16.mxu1 %v8896_v52  ;;  %v7229_v52 = vld [vmem:[%s9824_s14 + $0x20] sm:$0xff]   ;;  %6551 = vmatprep.subr.bf16.mxu0 %v7228_v47 }
 0x4e4   : > { %6701 = vmatprep.subr.bf16.mxu1 %v7228_v47  ;;  %6552 = vmatpush3.bf16.msra.mxu0 %v7229_v52 }
 0x4e5   : > { %6709 = vmatpush3.bf16.msra.mxu1 %v7229_v52  ;;  %6553 = vmatprep.subr.bf16.mxu0 %v7230_v25 }
 0x4e6   : > { %6702 = vmatprep.subr.bf16.mxu1 %v7230_v25 }
 0x4e8   : > { %6554 = vmatpush3.bf16.msra.mxu0 %v7231_v28 }
 0x4e9   : > { %6710 = vmatpush3.bf16.msra.mxu1 %v7231_v28 }
 0x4ea   : > { %4975 = vmatmul.mubr.bf16.gmra.mrb[144].mxu1 %v8892_v16  ;;  %v7232_v16 = vld [vmem:[%s9824_s14 + $0x70] sm:$0xff]  }
 0x4eb   : > { %4984 = vmatprep.mubr.bf16.mxu1 %v8914_v39  ;;  %v7233_v39 = vld [vmem:[%s9824_s14 + $0x30] sm:$0xff]   ;;  %6555 = vmatprep.subr.bf16.mxu0 %v7232_v16 }
 0x4ec   : > { %6703 = vmatprep.subr.bf16.mxu1 %v7232_v16  ;;  %6556 = vmatpush3.bf16.msra.mxu0 %v7233_v39 }
 0x4ed   : > { %6711 = vmatpush3.bf16.msra.mxu1 %v7233_v39 }
 0x4f2   : > { %4985 = vmatmul.mubr.bf16.gmra.mrb[148].mxu1 %v8910_v6  ;;  %v9269_v6 = vld [vmem:[%s9821_s11] ss:$0 sm:$0xff] }
 0x4f3   : > { %4994 = vmatprep.mubr.bf16.mxu1 %v8932_v33 }
 0x4fa   : > { %4995 = vmatmul.mubr.bf16.gmra.mrb[152].mxu1 %v8928_v37  ;;  %v7234_v37 = vld [vmem:[%s9824_s14 + $0x78] sm:$0xff]  }
 0x4fb   : > { %5004 = vmatprep.mubr.bf16.mxu1 %v8950_v56  ;;  %6557 = vmatprep.subr.bf16.mxu0 %v7234_v37 }
 0x4fc   : > { %6704 = vmatprep.subr.bf16.mxu1 %v7234_v37 }
 0x502   : > { %5005 = vmatmul.mubr.bf16.gmra.mrb[156].mxu1 %v8946_v43  ;;  %v7235_v43 = vld [vmem:[%s9824_s14 + $0x38] sm:$0xff]  }
 0x503   : > { %6558 = vmatpush3.bf16.msra.mxu0 %v7235_v43  ;;  %6712 = vmatpush3.bf16.msra.mxu1 %v7235_v43 }
 0x51d   : > { %v6495_v24 = vpop.f32.mrb[96].mxu1 }
 0x51e   : > { %v6496_v33 = vpop.f32.mrb[97].mxu1 }
 0x51f   : > { %v6497_v11 = vadd.f32 %v6496_v33, %v6495_v24  ;;  %v6498_v32 = vpop.f32.mrb[98].mxu1 }
 0x520   : > { %v6499_v29 = vpop.f32.mrb[99].mxu1 }
 0x521   : > { %v4307_v55 = vadd.f32 %v6497_v11, %v9269_v6  ;;  %v6500_v49 = vadd.f32 %v6499_v29, %v6498_v32 }
 0x523   : > { %v4310_v27 = vadd.f32 %v6500_v49, %v9269_v6  ;;  %v4369_v56 = vmax.f32 %v4307_v55, 0.0 }
 0x525   : > { %v4370_v19 = vmax.f32 %v4310_v27, 0.0  ;;  %v6501_v59 = vpop.f32.mrb[100].mxu1 }
 0x526   : > { %v6502_v51 = vpop.f32.mrb[101].mxu1 }
 0x527   : > { %v9279_v13 = vpack.c.bf16 %v4370_v19, %v4369_v56  ;;  %v6503_v35 = vadd.f32 %v6502_v51, %v6501_v59  ;;  %v6504_v1 = vpop.f32.mrb[102].mxu1 }
 0x528   : > { %v6505_v61 = vpop.f32.mrb[103].mxu1 }
 0x529   : > { %v4315_v40 = vadd.f32 %v6503_v35, %v9269_v6  ;;  %v6506_v57 = vadd.f32 %v6505_v61, %v6504_v1 }
 0x52b   : > { %v4318_v38 = vadd.f32 %v6506_v57, %v9269_v6  ;;  %v4371_v34 = vmax.f32 %v4315_v40, 0.0 }
 0x52d   : > { %v4372_v14 = vmax.f32 %v4318_v38, 0.0  ;;  %v6507_v44 = vpop.f32.mrb[104].mxu1 }
 0x52e   : > { %v6508_v0 = vpop.f32.mrb[105].mxu1 }
 0x52f   : > { %v6509_v30 = vadd.f32 %v6508_v0, %v6507_v44  ;;  %v6510_v18 = vpop.f32.mrb[106].mxu1  ;;  %v9283_v20 = vpack.c.bf16 %v4372_v14, %v4371_v34 }
 0x530   : > { %v6511_v5 = vpop.f32.mrb[107].mxu1 }
 0x531   : > { %v4323_v10 = vadd.f32 %v6509_v30, %v9269_v6  ;;  %v6512_v21 = vadd.f32 %v6511_v5, %v6510_v18 }
 0x533   : > { %v4326_v22 = vadd.f32 %v6512_v21, %v9269_v6  ;;  %v4373_v46 = vmax.f32 %v4323_v10, 0.0 }
 0x535   : > { %v4374_v60 = vmax.f32 %v4326_v22, 0.0  ;;  %v6513_v58 = vpop.f32.mrb[108].mxu1 }
 0x536   : > { %v6514_v42 = vpop.f32.mrb[109].mxu1 }
 0x537   : > { %v6515_v41 = vadd.f32 %v6514_v42, %v6513_v58  ;;  %v6516_v17 = vpop.f32.mrb[110].mxu1  ;;  %v9287_v62 = vpack.c.bf16 %v4374_v60, %v4373_v46  ;;  %v7236_v46 = vld [vmem:[%s9826_s16 + $0x40] sm:$0xff]  }
 0x538   : > { %v6517_v26 = vpop.f32.mrb[111].mxu1  ;;  %6607 = vmatprep.subr.bf16.mxu0 %v7236_v46  ;;  %v4457_v60 = vld [vmem:[%s9823_s13] sm:$0x3] }
 0x539   : > { %v4331_v31 = vadd.f32 %v6515_v41, %v9269_v6  ;;  %v6518_v12 = vadd.f32 %v6517_v26, %v6516_v17  ;;  %v9316_v58 = vrot.slane %v4457_v60, %v7879_v48  ;;  %v9319_v42 = vrot.slane %v4457_v60, %v7885_v50  ;;  %v7245_v46 = vld [vmem:[%s9826_s16 + $0x20] sm:$0xff]  }
 0x53b   : > { %v4334_v3 = vadd.f32 %v6518_v12, %v9269_v6  ;;  %v4375_v23 = vmax.f32 %v4331_v31, 0.0 }
 0x53d   : > { %v4376_v8 = vmax.f32 %v4334_v3, 0.0  ;;  %v6519_v4 = vpop.f32.mrb[112].mxu1 }
 0x53e   : > { %v6520_v9 = vpop.f32.mrb[113].mxu1 }
 0x53f   : > { %v6521_v54 = vadd.f32 %v6520_v9, %v6519_v4  ;;  %v6522_v2 = vpop.f32.mrb[114].mxu1  ;;  %v9291_v53 = vpack.c.bf16 %v4376_v8, %v4375_v23 }
 0x540   : > { %v6523_v36 = vpop.f32.mrb[115].mxu1 }
 0x541   : > { %v4339_v7 = vadd.f32 %v6521_v54, %v9269_v6  ;;  %v6524_v63 = vadd.f32 %v6523_v36, %v6522_v2  ;;  %v7237_v36 = vld [vmem:[%s9826_s16] sm:$0xff]  }
 0x543   : > { %v4342_v15 = vadd.f32 %v6524_v63, %v9269_v6  ;;  %v4377_v47 = vmax.f32 %v4339_v7, 0.0 }
 0x545   : > { %v4378_v52 = vmax.f32 %v4342_v15, 0.0  ;;  %v6525_v25 = vpop.f32.mrb[116].mxu1  ;;  %v7238_v15 = vld [vmem:[%s9826_s16 + $0x48] sm:$0xff]  }
 0x546   : > { %v6526_v28 = vpop.f32.mrb[117].mxu1 }
 0x547   : > { %v6527_v16 = vadd.f32 %v6526_v28, %v6525_v25  ;;  %v6528_v39 = vpop.f32.mrb[118].mxu1  ;;  %v9295_v24 = vpack.c.bf16 %v4378_v52, %v4377_v47 }
 0x548   : > { %v6529_v33 = vpop.f32.mrb[119].mxu1 }
 0x549   : > { %v4347_v11 = vadd.f32 %v6527_v16, %v9269_v6  ;;  %v6530_v32 = vadd.f32 %v6529_v33, %v6528_v39  ;;  %v7239_v39 = vld [vmem:[%s9826_s16 + $0x8] sm:$0xff]  }
 0x54b   : > { %v4350_v29 = vadd.f32 %v6530_v32, %v9269_v6  ;;  %v4379_v55 = vmax.f32 %v4347_v11, 0.0  ;;  %v7240_v32 = vld [vmem:[%s9826_s16 + $0x50] sm:$0xff]  }
 0x54d   : > { %v4380_v49 = vmax.f32 %v4350_v29, 0.0  ;;  %v6531_v27 = vpop.f32.mrb[120].mxu1 }
 0x54e   : > { %v6532_v37 = vpop.f32.mrb[121].mxu1 }
 0x54f   : > { %v6533_v43 = vadd.f32 %v6532_v37, %v6531_v27  ;;  %v6534_v56 = vpop.f32.mrb[122].mxu1  ;;  %v9299_v19 = vpack.c.bf16 %v4380_v49, %v4379_v55 }
 0x550   : > { %v6535_v59 = vpop.f32.mrb[123].mxu1 }
 0x551   : > { %v4355_v51 = vadd.f32 %v6533_v43, %v9269_v6  ;;  %v6536_v35 = vadd.f32 %v6535_v59, %v6534_v56  ;;  %v7241_v43 = vld [vmem:[%s9826_s16 + $0x10] sm:$0xff]  }
 0x553   : > { %v4358_v1 = vadd.f32 %v6536_v35, %v9269_v6  ;;  %v4381_v61 = vmax.f32 %v4355_v51, 0.0  ;;  %v7242_v51 = vld [vmem:[%s9826_s16 + $0x58] sm:$0xff]  }
 0x555   : > { %v4382_v40 = vmax.f32 %v4358_v1, 0.0  ;;  %v6537_v57 = vpop.f32.mrb[124].mxu1 }
 0x556   : > { %v6538_v38 = vpop.f32.mrb[125].mxu1 }
 0x557   : > { %v6539_v34 = vadd.f32 %v6538_v38, %v6537_v57  ;;  %v6540_v14 = vpop.f32.mrb[126].mxu1  ;;  %v9303_v44 = vpack.c.bf16 %v4382_v40, %v4381_v61  ;;  %v7243_v38 = vld [vmem:[%s9826_s16 + $0x18] sm:$0xff]  }
 0x558   : > { %v6541_v0 = vpop.f32.mrb[127].mxu1 }
 0x559   : > { %v4363_v30 = vadd.f32 %v6539_v34, %v9269_v6  ;;  %v6542_v18 = vadd.f32 %v6541_v0, %v6540_v14  ;;  %v7244_v0 = vld [vmem:[%s9826_s16 + $0x60] sm:$0xff]  }
 0x55b   : > { %v4366_v5 = vadd.f32 %v6542_v18, %v9269_v6  ;;  %v4383_v10 = vmax.f32 %v4363_v30, 0.0 }
 0x55d   : > { %v4384_v21 = vmax.f32 %v4366_v5, 0.0 }
 0x55f   : > { %v9307_v22 = vpack.c.bf16 %v4384_v21, %v4383_v10 }
 0x59d   : > { %v4936_v6 = vpop.f32.mrb[128].mxu1 }
 0x59e   : > { %v6745_v41 = vadd.f32 %v4936_v6, %v9316_v58  ;;  %v4938_v17 = vpop.f32.mrb[129].mxu1 }
 0x59f   : > { %v6746_v26 = vadd.f32 %v4938_v17, %v9319_v42  ;;  %v4940_v31 = vpop.f32.mrb[130].mxu1 }
 0x5a0   : > { %v6747_v12 = vadd.f32 %v4940_v31, %v9316_v58  ;;  %v4942_v3 = vpop.f32.mrb[131].mxu1  ;;  %v5015_v8 = vmax.f32 %v6745_v41, 0.0  ;;  %v7246_v41 = vld [vmem:[%s9826_s16 + $0x68] sm:$0xff]  }
 0x5a1   : > { %v6748_v23 = vadd.f32 %v4942_v3, %v9319_v42  ;;  %v5016_v9 = vmax.f32 %v6746_v26, 0.0 }
 0x5a2   : > { %v5017_v4 = vmax.f32 %v6747_v12, 0.0 }
 0x5a3   : > { %v5018_v48 = vmax.f32 %v6748_v23, 0.0  ;;  %v7247_v23 = vld [vmem:[%s9826_s16 + $0x28] sm:$0xff]  }
 0x5a4   : > { %v5047_v54 = vpack.c.bf16 %v5017_v4, %v5015_v8 }
 0x5a5   : > { %v5048_v2 = vpack.c.bf16 %v5018_v48, %v5016_v9  ;;  %v4946_v50 = vpop.f32.mrb[132].mxu1 }
 0x5a6   : > { %v6749_v7 = vadd.f32 %v4946_v50, %v9316_v58  ;;  %v4948_v63 = vpop.f32.mrb[133].mxu1 }
 0x5a7   : > { %v6750_v47 = vadd.f32 %v4948_v63, %v9319_v42  ;;  %v4950_v52 = vpop.f32.mrb[134].mxu1  ;;  %5230 = vmatprep.mubr.bf16.mxu0 %v5048_v2 }
 0x5a8   : > { %v6751_v25 = vadd.f32 %v4950_v52, %v9316_v58  ;;  %v4952_v28 = vpop.f32.mrb[135].mxu1  ;;  %5231 = vmatmul.mubr.bf16.vlgmr.msra.gmra.mrb[112].mxu0 %v5047_v54  ;;  %v5019_v33 = vmax.f32 %v6749_v7, 0.0 }
 0x5a9   : > { %v6752_v16 = vadd.f32 %v4952_v28, %v9319_v42  ;;  %6608 = vmatpush3.bf16.msra.mxu0 %v7237_v36  ;;  %v5020_v29 = vmax.f32 %v6750_v47, 0.0 }
 0x5aa   : > { %v5021_v11 = vmax.f32 %v6751_v25, 0.0  ;;  %6609 = vmatprep.subr.bf16.mxu0 %v7238_v15 }
 0x5ab   : > { %v5022_v55 = vmax.f32 %v6752_v16, 0.0 }
 0x5ac   : > { %v5049_v49 = vpack.c.bf16 %v5021_v11, %v5019_v33 }
 0x5ad   : > { %v5050_v27 = vpack.c.bf16 %v5022_v55, %v5020_v29  ;;  %v4956_v37 = vpop.f32.mrb[136].mxu1  ;;  %6610 = vmatpush3.bf16.msra.mxu0 %v7239_v39 }
 0x5ae   : > { %v6753_v56 = vadd.f32 %v4956_v37, %v9316_v58  ;;  %v4958_v59 = vpop.f32.mrb[137].mxu1  ;;  %6611 = vmatprep.subr.bf16.mxu0 %v7240_v32 }
 0x5af   : > { %v6754_v35 = vadd.f32 %v4958_v59, %v9319_v42  ;;  %v4960_v1 = vpop.f32.mrb[138].mxu1  ;;  %5238 = vmatprep.mubr.bf16.mxu0 %v5050_v27 }
 0x5b0   : > { %v6755_v61 = vadd.f32 %v4960_v1, %v9316_v58  ;;  %v4962_v40 = vpop.f32.mrb[139].mxu1  ;;  %5239 = vmatmul.mubr.bf16.gmra.mrb[116].mxu0 %v5049_v49  ;;  %v5023_v34 = vmax.f32 %v6753_v56, 0.0 }
 0x5b1   : > { %v6756_v57 = vadd.f32 %v4962_v40, %v9319_v42  ;;  %6612 = vmatpush3.bf16.msra.mxu0 %v7241_v43  ;;  %v5024_v30 = vmax.f32 %v6754_v35, 0.0 }
 0x5b2   : > { %v5025_v14 = vmax.f32 %v6755_v61, 0.0  ;;  %6613 = vmatprep.subr.bf16.mxu0 %v7242_v51 }
 0x5b3   : > { %v5026_v18 = vmax.f32 %v6756_v57, 0.0 }
 0x5b4   : > { %v5051_v5 = vpack.c.bf16 %v5025_v14, %v5023_v34 }
 0x5b5   : > { %v5052_v10 = vpack.c.bf16 %v5026_v18, %v5024_v30  ;;  %v4966_v21 = vpop.f32.mrb[140].mxu1  ;;  %6614 = vmatpush3.bf16.msra.mxu0 %v7243_v38 }
 0x5b6   : > { %v6757_v60 = vadd.f32 %v4966_v21, %v9316_v58  ;;  %v4968_v6 = vpop.f32.mrb[141].mxu1  ;;  %6615 = vmatprep.subr.bf16.mxu0 %v7244_v0 }
 0x5b7   : > { %v6758_v17 = vadd.f32 %v4968_v6, %v9319_v42  ;;  %v4970_v26 = vpop.f32.mrb[142].mxu1  ;;  %5246 = vmatprep.mubr.bf16.mxu0 %v5052_v10 }
 0x5b8   : > { %v6759_v31 = vadd.f32 %v4970_v26, %v9316_v58  ;;  %v4972_v12 = vpop.f32.mrb[143].mxu1  ;;  %5247 = vmatmul.mubr.bf16.gmra.mrb[120].mxu0 %v5051_v5  ;;  %v5027_v8 = vmax.f32 %v6757_v60, 0.0 }
 0x5b9   : > { %v6760_v3 = vadd.f32 %v4972_v12, %v9319_v42  ;;  %6616 = vmatpush3.bf16.msra.mxu0 %v7245_v46  ;;  %v5028_v9 = vmax.f32 %v6758_v17, 0.0 }
 0x5ba   : > { %v5029_v4 = vmax.f32 %v6759_v31, 0.0  ;;  %6617 = vmatprep.subr.bf16.mxu0 %v7246_v41 }
 0x5bb   : > { %v5030_v48 = vmax.f32 %v6760_v3, 0.0 }
 0x5bc   : > { %v5053_v54 = vpack.c.bf16 %v5029_v4, %v5027_v8 }
 0x5bd   : > { %v5054_v2 = vpack.c.bf16 %v5030_v48, %v5028_v9  ;;  %v4976_v50 = vpop.f32.mrb[144].mxu1  ;;  %6618 = vmatpush3.bf16.msra.mxu0 %v7247_v23 }
 0x5be   : > { %v6761_v36 = vadd.f32 %v4976_v50, %v9316_v58  ;;  %v4978_v7 = vpop.f32.mrb[145].mxu1 }
 0x5bf   : > { %v6762_v63 = vadd.f32 %v4978_v7, %v9319_v42  ;;  %v4980_v15 = vpop.f32.mrb[146].mxu1  ;;  %5254 = vmatprep.mubr.bf16.mxu0 %v5054_v2 }
 0x5c0   : > { %v6763_v47 = vadd.f32 %v4980_v15, %v9316_v58  ;;  %v4982_v52 = vpop.f32.mrb[147].mxu1  ;;  %5255 = vmatmul.mubr.bf16.gmra.mrb[124].mxu0 %v5053_v54  ;;  %v5031_v28 = vmax.f32 %v6761_v36, 0.0  ;;  %v7251_v15 = vld [vmem:[%s9826_s16 + $0x38] sm:$0xff]  }
 0x5c1   : > { %v6764_v25 = vadd.f32 %v4982_v52, %v9319_v42  ;;  %v5032_v39 = vmax.f32 %v6762_v63, 0.0  ;;  %v7248_v63 = vld [vmem:[%s9826_s16 + $0x70] sm:$0xff]   ;;  %v9401_v52 = vld [vmem:[%s9825_s15] ss:$0 sm:$0xff] }
 0x5c2   : > { %v5033_v16 = vmax.f32 %v6763_v47, 0.0  ;;  %6619 = vmatprep.subr.bf16.mxu0 %v7248_v63 }
 0x5c3   : > { %v5034_v33 = vmax.f32 %v6764_v25, 0.0 }
 0x5c4   : > { %v5055_v11 = vpack.c.bf16 %v5033_v16, %v5031_v28 }
 0x5c5   : > { %v5056_v32 = vpack.c.bf16 %v5034_v33, %v5032_v39  ;;  %v4986_v29 = vpop.f32.mrb[148].mxu1 }
 0x5c6   : > { %v6765_v55 = vadd.f32 %v4986_v29, %v9316_v58  ;;  %v4988_v49 = vpop.f32.mrb[149].mxu1 }
 0x5c7   : > { %v6766_v27 = vadd.f32 %v4988_v49, %v9319_v42  ;;  %v4990_v37 = vpop.f32.mrb[150].mxu1  ;;  %5262 = vmatprep.mubr.bf16.mxu0 %v5056_v32 }
 0x5c8   : > { %v6767_v43 = vadd.f32 %v4990_v37, %v9316_v58  ;;  %v4992_v56 = vpop.f32.mrb[151].mxu1  ;;  %5263 = vmatmul.mubr.bf16.gmra.mrb[128].mxu0 %v5055_v11  ;;  %v5035_v51 = vmax.f32 %v6765_v55, 0.0 }
 0x5c9   : > { %v6768_v59 = vadd.f32 %v4992_v56, %v9319_v42  ;;  %v5036_v1 = vmax.f32 %v6766_v27, 0.0 }
 0x5ca   : > { %v5037_v35 = vmax.f32 %v6767_v43, 0.0 }
 0x5cb   : > { %v5038_v61 = vmax.f32 %v6768_v59, 0.0 }
 0x5cc   : > { %v5057_v40 = vpack.c.bf16 %v5037_v35, %v5035_v51 }
 0x5cd   : > { %v5058_v57 = vpack.c.bf16 %v5038_v61, %v5036_v1  ;;  %v4996_v38 = vpop.f32.mrb[152].mxu1 }
 0x5ce   : > { %v6769_v34 = vadd.f32 %v4996_v38, %v9316_v58  ;;  %v4998_v14 = vpop.f32.mrb[153].mxu1 }
 0x5cf   : > { %v6770_v0 = vadd.f32 %v4998_v14, %v9319_v42  ;;  %v5000_v30 = vpop.f32.mrb[154].mxu1  ;;  %5270 = vmatprep.mubr.bf16.mxu0 %v5058_v57 }
 0x5d0   : > { %v6771_v18 = vadd.f32 %v5000_v30, %v9316_v58  ;;  %v5002_v5 = vpop.f32.mrb[155].mxu1  ;;  %5271 = vmatmul.mubr.bf16.gmra.mrb[132].mxu0 %v5057_v40  ;;  %v5039_v21 = vmax.f32 %v6769_v34, 0.0 }
 0x5d1   : > { %v6772_v10 = vadd.f32 %v5002_v5, %v9319_v42  ;;  %v5040_v60 = vmax.f32 %v6770_v0, 0.0 }
 0x5d2   : > { %v5041_v46 = vmax.f32 %v6771_v18, 0.0 }
 0x5d3   : > { %v5042_v6 = vmax.f32 %v6772_v10, 0.0 }
 0x5d4   : > { %v5059_v41 = vpack.c.bf16 %v5041_v46, %v5039_v21 }
 0x5d5   : > { %v5060_v17 = vpack.c.bf16 %v5042_v6, %v5040_v60  ;;  %v5006_v26 = vpop.f32.mrb[156].mxu1 }
 0x5d6   : > { %v6773_v31 = vadd.f32 %v5006_v26, %v9316_v58  ;;  %v5008_v12 = vpop.f32.mrb[157].mxu1 }
 0x5d7   : > { %v6774_v3 = vadd.f32 %v5008_v12, %v9319_v42  ;;  %v5010_v23 = vpop.f32.mrb[158].mxu1  ;;  %5278 = vmatprep.mubr.bf16.mxu1 %v5060_v17 }
 0x5d8   : > { %v6775_v8 = vadd.f32 %v5010_v23, %v9316_v58  ;;  %v5012_v4 = vpop.f32.mrb[159].mxu1  ;;  %5279 = vmatmul.mubr.bf16.vlgmr.msra.gmra.mrb[160].mxu1 %v5059_v41  ;;  %v5043_v48 = vmax.f32 %v6773_v31, 0.0  ;;  %v7249_v58 = vld [vmem:[%s9826_s16 + $0x30] sm:$0xff]  }
 0x5d9   : > { %v6776_v9 = vadd.f32 %v5012_v4, %v9319_v42  ;;  %v5044_v2 = vmax.f32 %v6774_v3, 0.0  ;;  %6620 = vmatpush3.bf16.msra.mxu0 %v7249_v58  ;;  %v7250_v42 = vld [vmem:[%s9826_s16 + $0x78] sm:$0xff]  }
 0x5da   : > { %v5045_v54 = vmax.f32 %v6775_v8, 0.0  ;;  %6621 = vmatprep.subr.bf16.mxu0 %v7250_v42 }
 0x5db   : > { %v5046_v50 = vmax.f32 %v6776_v9, 0.0 }
 0x5dc   : > { %v5061_v36 = vpack.c.bf16 %v5045_v54, %v5043_v48 }
 0x5dd   : > { %v5062_v7 = vpack.c.bf16 %v5046_v50, %v5044_v2  ;;  %6622 = vmatpush3.bf16.msra.mxu0 %v7251_v15 }
 0x5df   : > { %5286 = vmatprep.mubr.bf16.mxu1 %v5062_v7 }
 0x5e0   : > { %5287 = vmatmul.mubr.bf16.gmra.mrb[164].mxu1 %v5061_v36 }
 0x67b   : > { %v6559_v47 = vpop.f32.mrb[112].mxu0 }
 0x67c   : > { %v6560_v25 = vpop.f32.mrb[113].mxu0 }
 0x67d   : > { %v6561_v28 = vadd.f32 %v6560_v25, %v6559_v47  ;;  %v6562_v16 = vpop.f32.mrb[114].mxu0 }
 0x67e   : > { %v6563_v39 = vpop.f32.mrb[115].mxu0 }
 0x67f   : > { %v5233_v33 = vadd.f32 %v6561_v28, %v9401_v52  ;;  %v6564_v11 = vadd.f32 %v6563_v39, %v6562_v16 }
 0x681   : > { %v5236_v32 = vadd.f32 %v6564_v11, %v9401_v52  ;;  %v5295_v29 = vmax.f32 %v5233_v33, 0.0 }
 0x683   : > { %v5296_v55 = vmax.f32 %v5236_v32, 0.0  ;;  %v6565_v49 = vpop.f32.mrb[116].mxu0 }
 0x684   : > { %v6566_v27 = vpop.f32.mrb[117].mxu0 }
 0x685   : > { %v6567_v37 = vadd.f32 %v6566_v27, %v6565_v49  ;;  %v6568_v43 = vpop.f32.mrb[118].mxu0  ;;  %v5311_v56 = vpack.c.bf16 %v5296_v55, %v5295_v29 }
 0x686   : > { %v6569_v59 = vpop.f32.mrb[119].mxu0 }
 0x687   : > { %v5241_v51 = vadd.f32 %v6567_v37, %v9401_v52  ;;  %v6570_v35 = vadd.f32 %v6569_v59, %v6568_v43  ;;  %5486 = vmatprep.mubr.bf16.mxu0 %v5311_v56 }
 0x688   : > { %5487 = vmatmul.mubr.bf16.vlgmr.msra.gmra.mrb[136].mxu0 %v9279_v13 }
 0x689   : > { %v5244_v1 = vadd.f32 %v6570_v35, %v9401_v52  ;;  %v5297_v61 = vmax.f32 %v5241_v51, 0.0 }
 0x68b   : > { %v5298_v40 = vmax.f32 %v5244_v1, 0.0  ;;  %v6571_v57 = vpop.f32.mrb[120].mxu0 }
 0x68c   : > { %v6572_v38 = vpop.f32.mrb[121].mxu0 }
 0x68d   : > { %v6573_v34 = vadd.f32 %v6572_v38, %v6571_v57  ;;  %v6574_v14 = vpop.f32.mrb[122].mxu0  ;;  %v5312_v0 = vpack.c.bf16 %v5298_v40, %v5297_v61 }
 0x68e   : > { %v6575_v30 = vpop.f32.mrb[123].mxu0 }
 0x68f   : > { %v5249_v18 = vadd.f32 %v6573_v34, %v9401_v52  ;;  %v6576_v5 = vadd.f32 %v6575_v30, %v6574_v14  ;;  %5494 = vmatprep.mubr.bf16.mxu0 %v5312_v0 }
 0x690   : > { %5495 = vmatmul.mubr.bf16.gmra.mrb[140].mxu0 %v9283_v20 }
 0x691   : > { %v5252_v10 = vadd.f32 %v6576_v5, %v9401_v52  ;;  %v5299_v21 = vmax.f32 %v5249_v18, 0.0  ;;  %v9428_v5 = vand.u32 127, %v889_v45 }
 0x693   : > { %v5300_v13 = vmax.f32 %v5252_v10, 0.0  ;;  %v6577_v46 = vpop.f32.mrb[124].mxu0  ;;  %vm5553_vm2 = vcmp.lt.s32.totalorder %v9428_v5, 8  ;;  %vm5730_vm3 = vcmp.ge.s32.totalorder %v9428_v5, 20  ;;  %vm5731_vm4 = vcmp.lt.s32.totalorder %v9428_v5, 24 }
 0x694   : > { %v6578_v60 = vpop.f32.mrb[125].mxu0  ;;  %vm9657_vm5 = vmand %vm5730_vm3, %vm5731_vm4 }
 0x695   : > { %v6579_v6 = vadd.f32 %v6578_v60, %v6577_v46  ;;  %v6580_v41 = vpop.f32.mrb[126].mxu0  ;;  %v5313_v17 = vpack.c.bf16 %v5300_v13, %v5299_v21  ;;  %v9433_v21 = vld [vmem:[%s9827_s17] ss:$0 sm:$0xff] }
 0x696   : > { %v6581_v26 = vpop.f32.mrb[127].mxu0 }
 0x697   : > { %v5257_v31 = vadd.f32 %v6579_v6, %v9401_v52  ;;  %v6582_v12 = vadd.f32 %v6581_v26, %v6580_v41  ;;  %5502 = vmatprep.mubr.bf16.mxu0 %v5313_v17 }
 0x698   : > { %5503 = vmatmul.mubr.bf16.gmra.mrb[144].mxu0 %v9287_v62 }
 0x699   : > { %v5260_v3 = vadd.f32 %v6582_v12, %v9401_v52  ;;  %v5301_v23 = vmax.f32 %v5257_v31, 0.0 }
 0x69b   : > { %v5302_v20 = vmax.f32 %v5260_v3, 0.0  ;;  %v6583_v8 = vpop.f32.mrb[128].mxu0 }
 0x69c   : > { %v6584_v4 = vpop.f32.mrb[129].mxu0 }
 0x69d   : > { %v6585_v9 = vadd.f32 %v6584_v4, %v6583_v8  ;;  %v6586_v48 = vpop.f32.mrb[130].mxu0  ;;  %v5314_v54 = vpack.c.bf16 %v5302_v20, %v5301_v23 }
 0x69e   : > { %v6587_v2 = vpop.f32.mrb[131].mxu0 }
 0x69f   : > { %v5265_v50 = vadd.f32 %v6585_v9, %v9401_v52  ;;  %v6588_v36 = vadd.f32 %v6587_v2, %v6586_v48  ;;  %5510 = vmatprep.mubr.bf16.mxu0 %v5314_v54 }
 0x6a0   : > { %5511 = vmatmul.mubr.bf16.gmra.mrb[148].mxu0 %v9291_v53 }
 0x6a1   : > { %v5268_v7 = vadd.f32 %v6588_v36, %v9401_v52  ;;  %v5303_v63 = vmax.f32 %v5265_v50, 0.0 }
 0x6a3   : > { %v5304_v62 = vmax.f32 %v5268_v7, 0.0  ;;  %v6589_v58 = vpop.f32.mrb[132].mxu0 }
 0x6a4   : > { %v6590_v42 = vpop.f32.mrb[133].mxu0 }
 0x6a5   : > { %v6591_v15 = vadd.f32 %v6590_v42, %v6589_v58  ;;  %v6592_v47 = vpop.f32.mrb[134].mxu0  ;;  %v5315_v25 = vpack.c.bf16 %v5304_v62, %v5303_v63 }
 0x6a6   : > { %v6593_v28 = vpop.f32.mrb[135].mxu0 }
 0x6a7   : > { %v5273_v16 = vadd.f32 %v6591_v15, %v9401_v52  ;;  %v6594_v39 = vadd.f32 %v6593_v28, %v6592_v47  ;;  %5518 = vmatprep.mubr.bf16.mxu0 %v5315_v25 }
 0x6a8   : > { %5519 = vmatmul.mubr.bf16.gmra.mrb[152].mxu0 %v9295_v24 }
 0x6a9   : > { %v5276_v33 = vadd.f32 %v6594_v39, %v9401_v52  ;;  %v5305_v11 = vmax.f32 %v5273_v16, 0.0 }
 0x6ab   : > { %v5306_v53 = vmax.f32 %v5276_v33, 0.0  ;;  %v6595_v32 = vpop.f32.mrb[160].mxu1 }
 0x6ac   : > { %v6596_v29 = vpop.f32.mrb[161].mxu1 }
 0x6ad   : > { %v6597_v55 = vadd.f32 %v6596_v29, %v6595_v32  ;;  %v6598_v49 = vpop.f32.mrb[162].mxu1  ;;  %v5316_v27 = vpack.c.bf16 %v5306_v53, %v5305_v11 }
 0x6ae   : > { %v6599_v37 = vpop.f32.mrb[163].mxu1 }
 0x6af   : > { %v5281_v43 = vadd.f32 %v6597_v55, %v9401_v52  ;;  %v6600_v56 = vadd.f32 %v6599_v37, %v6598_v49  ;;  %5526 = vmatprep.mubr.bf16.mxu0 %v5316_v27 }
 0x6b0   : > { %5527 = vmatmul.mubr.bf16.gmra.mrb[156].mxu0 %v9299_v19 }
 0x6b1   : > { %v5284_v59 = vadd.f32 %v6600_v56, %v9401_v52  ;;  %v5307_v51 = vmax.f32 %v5281_v43, 0.0 }
 0x6b3   : > { %v5308_v24 = vmax.f32 %v5284_v59, 0.0  ;;  %v6601_v35 = vpop.f32.mrb[164].mxu1 }
 0x6b4   : > { %v6602_v1 = vpop.f32.mrb[165].mxu1 }
 0x6b5   : > { %v6603_v61 = vadd.f32 %v6602_v1, %v6601_v35  ;;  %v6604_v40 = vpop.f32.mrb[166].mxu1  ;;  %v5317_v57 = vpack.c.bf16 %v5308_v24, %v5307_v51 }
 0x6b6   : > { %v6605_v38 = vpop.f32.mrb[167].mxu1 }
 0x6b7   : > { %v5289_v34 = vadd.f32 %v6603_v61, %v9401_v52  ;;  %v6606_v14 = vadd.f32 %v6605_v38, %v6604_v40  ;;  %5534 = vmatprep.mubr.bf16.mxu0 %v5317_v57 }
 0x6b8   : > { %5535 = vmatmul.mubr.bf16.gmra.mrb[160].mxu0 %v9303_v44 }
 0x6b9   : > { %v5292_v0 = vadd.f32 %v6606_v14, %v9401_v52  ;;  %v5309_v30 = vmax.f32 %v5289_v34, 0.0 }
 0x6bb   : > { %v5310_v19 = vmax.f32 %v5292_v0, 0.0 }
 0x6bd   : > { %v5318_v18 = vpack.c.bf16 %v5310_v19, %v5309_v30 }
 0x6bf   : > { %5542 = vmatprep.mubr.bf16.mxu0 %v5318_v18 }
 0x6c0   : > { %5543 = vmatmul.mubr.bf16.gmra.mrb[164].mxu0 %v9307_v22 }
 0x75b   : > { %v6623_v10 = vpop.f32.mrb[136].mxu0 }
 0x75c   : > { %v6624_v13 = vpop.f32.mrb[137].mxu0 }
 0x75d   : > { %v6625_v46 = vadd.f32 %v6624_v13, %v6623_v10  ;;  %v6626_v44 = vpop.f32.mrb[138].mxu0 }
 0x75e   : > { %v6627_v60 = vpop.f32.mrb[139].mxu0 }
 0x75f   : > { %v9437_v52 = vadd.f32 %v6625_v46, %v9433_v21  ;;  %v6628_v6 = vadd.f32 %v6627_v60, %v6626_v44 }
 0x761   : > { %v9440_v22 = vadd.f32 %v6628_v6, %v9433_v21  ;;  %v9445_v45 = vsel %vm5553_vm2, %v9437_v52, -inf }
 0x762   : > { %5570 = vmax.xlane.f32.xlu0 %v9445_v45 }
 0x763   : > { %v6629_v41 = vpop.f32.mrb[140].mxu0  ;;  %v9451_v12 = vsel %vm5553_vm2, %v9440_v22, -inf }
 0x764   : > { %v6630_v17 = vpop.f32.mrb[141].mxu0 }
 0x765   : > { %v6631_v26 = vadd.f32 %v6630_v17, %v6629_v41  ;;  %v6632_v31 = vpop.f32.mrb[142].mxu0 }
 0x766   : > { %v6633_v3 = vpop.f32.mrb[143].mxu0  ;;  %5572 = vmax.xlane.f32.xlu0 %v9451_v12 }
 0x767   : > { %v9455_v23 = vadd.f32 %v6631_v26, %v9433_v21  ;;  %v6634_v20 = vadd.f32 %v6633_v3, %v6632_v31 }
 0x769   : > { %v9458_v8 = vadd.f32 %v6634_v20, %v9433_v21  ;;  %v9463_v4 = vsel %vm5553_vm2, %v9455_v23, -inf }
 0x76a   : > { %5574 = vmax.xlane.f32.xlu1 %v9463_v4 }
 0x76b   : > { %v6635_v9 = vpop.f32.mrb[144].mxu0  ;;  %v9469_v50 = vsel %vm5553_vm2, %v9458_v8, -inf }
 0x76c   : > { %v6636_v48 = vpop.f32.mrb[145].mxu0 }
 0x76d   : > { %v6637_v54 = vadd.f32 %v6636_v48, %v6635_v9  ;;  %v6638_v2 = vpop.f32.mrb[146].mxu0 }
 0x76e   : > { %v6639_v36 = vpop.f32.mrb[147].mxu0  ;;  %5576 = vmax.xlane.f32.xlu1 %v9469_v50 }
 0x76f   : > { %v9473_v7 = vadd.f32 %v6637_v54, %v9433_v21  ;;  %v6640_v63 = vadd.f32 %v6639_v36, %v6638_v2 }
 0x771   : > { %v9476_v62 = vadd.f32 %v6640_v63, %v9433_v21  ;;  %v9481_v58 = vsel %vm5553_vm2, %v9473_v7, -inf }
 0x772   : > { %5578 = vmax.xlane.f32.xlu0 %v9481_v58 }
 0x773   : > { %v6641_v42 = vpop.f32.mrb[148].mxu0  ;;  %v9487_v15 = vsel %vm5553_vm2, %v9476_v62, -inf }
 0x774   : > { %v6642_v47 = vpop.f32.mrb[149].mxu0  ;;  %5580 = vmax.xlane.f32.xlu1 %v9487_v15 }
 0x775   : > { %v6643_v25 = vadd.f32 %v6642_v47, %v6641_v42  ;;  %v6644_v28 = vpop.f32.mrb[150].mxu0 }
 0x776   : > { %v6645_v16 = vpop.f32.mrb[151].mxu0 }
 0x777   : > { %v9491_v39 = vadd.f32 %v6643_v25, %v9433_v21  ;;  %v6646_v33 = vadd.f32 %v6645_v16, %v6644_v28 }
 0x779   : > { %v9494_v11 = vadd.f32 %v6646_v33, %v9433_v21  ;;  %v9499_v53 = vsel %vm5553_vm2, %v9491_v39, -inf }
 0x77a   : > { %5582 = vmax.xlane.f32.xlu0 %v9499_v53 }
 0x77b   : > { %v6647_v32 = vpop.f32.mrb[152].mxu0  ;;  %v9505_v29 = vsel %vm5553_vm2, %v9494_v11, -inf }
 0x77c   : > { %v6648_v55 = vpop.f32.mrb[153].mxu0  ;;  %5584 = vmax.xlane.f32.xlu1 %v9505_v29 }
 0x77d   : > { %v6649_v49 = vadd.f32 %v6648_v55, %v6647_v32  ;;  %v6650_v27 = vpop.f32.mrb[154].mxu0 }
 0x77e   : > { %v6651_v37 = vpop.f32.mrb[155].mxu0 }
 0x77f   : > { %v9509_v43 = vadd.f32 %v6649_v49, %v9433_v21  ;;  %v6652_v56 = vadd.f32 %v6651_v37, %v6650_v27 }
 0x781   : > { %v9512_v59 = vadd.f32 %v6652_v56, %v9433_v21  ;;  %v9517_v51 = vsel %vm5553_vm2, %v9509_v43, -inf }
 0x782   : > { %5586 = vmax.xlane.f32.xlu0 %v9517_v51 }
 0x783   : > { %v6653_v24 = vpop.f32.mrb[156].mxu0  ;;  %v9523_v35 = vsel %vm5553_vm2, %v9512_v59, -inf }
 0x784   : > { %v6654_v1 = vpop.f32.mrb[157].mxu0  ;;  %5588 = vmax.xlane.f32.xlu1 %v9523_v35 }
 0x785   : > { %v6655_v61 = vadd.f32 %v6654_v1, %v6653_v24  ;;  %v6656_v40 = vpop.f32.mrb[158].mxu0 }
 0x786   : > { %v6657_v57 = vpop.f32.mrb[159].mxu0 }
 0x787   : > { %v9527_v38 = vadd.f32 %v6655_v61, %v9433_v21  ;;  %v6658_v34 = vadd.f32 %v6657_v57, %v6656_v40 }
 0x789   : > { %v9530_v14 = vadd.f32 %v6658_v34, %v9433_v21  ;;  %v9535_v0 = vsel %vm5553_vm2, %v9527_v38, -inf }
 0x78a   : > { %5590 = vmax.xlane.f32.xlu0 %v9535_v0 }
 0x78b   : > { %v6659_v30 = vpop.f32.mrb[160].mxu0  ;;  %v9541_v19 = vsel %vm5553_vm2, %v9530_v14, -inf }
 0x78c   : > { %v6660_v18 = vpop.f32.mrb[161].mxu0  ;;  %5592 = vmax.xlane.f32.xlu1 %v9541_v19 }
 0x78d   : > { %v6661_v10 = vadd.f32 %v6660_v18, %v6659_v30  ;;  %v6662_v13 = vpop.f32.mrb[162].mxu0 }
 0x78e   : > { %v6663_v46 = vpop.f32.mrb[163].mxu0 }
 0x78f   : > { %v9545_v44 = vadd.f32 %v6661_v10, %v9433_v21  ;;  %v6664_v60 = vadd.f32 %v6663_v46, %v6662_v13 }
 0x791   : > { %v9548_v6 = vadd.f32 %v6664_v60, %v9433_v21  ;;  %v9553_v41 = vsel %vm5553_vm2, %v9545_v44, -inf }
 0x792   : > { %5594 = vmax.xlane.f32.xlu0 %v9553_v41 }
 0x793   : > { %v6665_v17 = vpop.f32.mrb[164].mxu0  ;;  %v9559_v26 = vsel %vm5553_vm2, %v9548_v6, -inf }
 0x794   : > { %v6666_v31 = vpop.f32.mrb[165].mxu0  ;;  %5596 = vmax.xlane.f32.xlu1 %v9559_v26 }
 0x795   : > { %v6667_v3 = vadd.f32 %v6666_v31, %v6665_v17  ;;  %v6668_v20 = vpop.f32.mrb[166].mxu0 }
 0x796   : > { %v6669_v9 = vpop.f32.mrb[167].mxu0 }
 0x797   : > { %v9563_v48 = vadd.f32 %v6667_v3, %v9433_v21  ;;  %v6670_v54 = vadd.f32 %v6669_v9, %v6668_v20 }
 0x799   : > { %v9566_v2 = vadd.f32 %v6670_v54, %v9433_v21  ;;  %v9571_v36 = vsel %vm5553_vm2, %v9563_v48, -inf }
 0x79a   : > { %5598 = vmax.xlane.f32.xlu0 %v9571_v36 }
 0x79b   : > { %v9577_v63 = vsel %vm5553_vm2, %v9566_v2, -inf }
 0x79c   : > { %5600 = vmax.xlane.f32.xlu1 %v9577_v63 }
 0x7ef   : > { %v9580_v42 = vpop.xlane.xlu0 %5570 }
 0x7f0   : > { %v5602_v21 = vsub.f32 %v9445_v45, %v9580_v42 }
 0x7f2   : > { %v5618_v47 = vmul.f32 1.442695, %v5602_v21 }
 0x7f3   : > { %v9584_v25 = vpop.xlane.xlu0 %5572 }
 0x7f4   : > { %7252 = vpow2.f32 %v5618_v47  ;;  %v5603_v28 = vsub.f32 %v9451_v12, %v9584_v25 }
 0x7f6   : > { %v5620_v16 = vmul.f32 1.442695, %v5603_v28 }
 0x7f7   : > { %v9588_v33 = vpop.xlane.xlu1 %5574 }
 0x7f8   : > { %7254 = vpow2.f32 %v5620_v16  ;;  %v5604_v32 = vsub.f32 %v9463_v4, %v9588_v33 }
 0x7fa   : > { %v5622_v55 = vmul.f32 1.442695, %v5604_v32 }
 0x7fb   : > { %v9592_v49 = vpop.xlane.xlu1 %5576 }
 0x7fc   : > { %7256 = vpow2.f32 %v5622_v55  ;;  %v5605_v45 = vsub.f32 %v9469_v50, %v9592_v49 }
 0x7fe   : > { %v7253_v27 = vpop.eup %7252  ;;  %v5624_v37 = vmul.f32 1.442695, %v5605_v45 }
 0x7ff   : > { %5650 = vadd.xlane.f32.xlu0 %v7253_v27  ;;  %v9596_v56 = vpop.xlane.xlu0 %5578 }
 0x800   : > { %7258 = vpow2.f32 %v5624_v37  ;;  %v5606_v12 = vsub.f32 %v9481_v58, %v9596_v56 }
 0x801   : > { %v9600_v24 = vpop.xlane.xlu1 %5580 }
 0x802   : > { %v7255_v1 = vpop.eup %7254  ;;  %v5626_v4 = vmul.f32 1.442695, %v5606_v12  ;;  %v5607_v61 = vsub.f32 %v9487_v15, %v9600_v24 }
 0x803   : > { %5652 = vadd.xlane.f32.xlu1 %v7255_v1 }
 0x804   : > { %7260 = vpow2.f32 %v5626_v4  ;;  %v5628_v40 = vmul.f32 1.442695, %v5607_v61 }
 0x806   : > { %v7257_v50 = vpop.eup %7256  ;;  %7262 = vpow2.f32 %v5628_v40 }
 0x807   : > { %5654 = vadd.xlane.f32.xlu0 %v7257_v50  ;;  %v9604_v57 = vpop.xlane.xlu0 %5582 }
 0x808   : > { %v5608_v34 = vsub.f32 %v9499_v53, %v9604_v57 }
 0x809   : > { %v9608_v30 = vpop.xlane.xlu1 %5584 }
 0x80a   : > { %v7259_v58 = vpop.eup %7258  ;;  %v5630_v18 = vmul.f32 1.442695, %v5608_v34  ;;  %v5609_v10 = vsub.f32 %v9505_v29, %v9608_v30 }
 0x80b   : > { %5656 = vadd.xlane.f32.xlu1 %v7259_v58 }
 0x80c   : > { %7264 = vpow2.f32 %v5630_v18  ;;  %v5632_v15 = vmul.f32 1.442695, %v5609_v10 }
 0x80e   : > { %v7261_v13 = vpop.eup %7260  ;;  %7266 = vpow2.f32 %v5632_v15 }
 0x80f   : > { %5658 = vadd.xlane.f32.xlu0 %v7261_v13  ;;  %v9612_v46 = vpop.xlane.xlu0 %5586  ;;  %v6443_v13 = vclamps-f32 %v9440_v22, 30.0 }
 0x810   : > { %v7263_v60 = vpop.eup %7262  ;;  %v5610_v17 = vsub.f32 %v9517_v51, %v9612_v46 }
 0x811   : > { %v9616_v53 = vpop.xlane.xlu1 %5588  ;;  %5660 = vadd.xlane.f32.xlu1 %v7263_v60 }
 0x812   : > { %v5634_v31 = vmul.f32 1.442695, %v5610_v17  ;;  %v5611_v3 = vsub.f32 %v9523_v35, %v9616_v53  ;;  %v6444_v17 = vclamps-f32 %v9455_v23, 30.0 }
 0x814   : > { %7268 = vpow2.f32 %v5634_v31  ;;  %v5636_v29 = vmul.f32 1.442695, %v5611_v3  ;;  %v6445_v31 = vclamps-f32 %v9458_v8, 30.0  ;;  %v5767_v3 = vsub.f32 0.0, %v6444_v17 }
 0x816   : > { %v7265_v20 = vpop.eup %7264  ;;  %7270 = vpow2.f32 %v5636_v29 }
 0x817   : > { %5662 = vadd.xlane.f32.xlu0 %v7265_v20  ;;  %v9620_v9 = vpop.xlane.xlu0 %5590  ;;  %v5768_v20 = vsub.f32 0.0, %v6445_v31 }
 0x818   : > { %v7267_v54 = vpop.eup %7266  ;;  %v5612_v21 = vsub.f32 %v9535_v0, %v9620_v9 }
 0x819   : > { %v9624_v47 = vpop.xlane.xlu1 %5592  ;;  %5664 = vadd.xlane.f32.xlu1 %v7267_v54  ;;  %v5785_v54 = vmul.f32 1.442695, %v5767_v3 }
 0x81a   : > { %v5638_v51 = vmul.f32 1.442695, %v5612_v21  ;;  %v5613_v28 = vsub.f32 %v9541_v19, %v9624_v47  ;;  %v6446_v21 = vclamps-f32 %v9473_v7, 30.0 }
 0x81c   : > { %7272 = vpow2.f32 %v5638_v51  ;;  %v5640_v35 = vmul.f32 1.442695, %v5613_v28  ;;  %v5787_v51 = vmul.f32 1.442695, %v5768_v20  ;;  %v6447_v28 = vclamps-f32 %v9476_v62, 30.0 }
 0x81e   : > { %v7269_v16 = vpop.eup %7268  ;;  %7274 = vpow2.f32 %v5640_v35  ;;  %v5769_v35 = vsub.f32 0.0, %v6446_v21 }
 0x81f   : > { %5666 = vadd.xlane.f32.xlu0 %v7269_v16  ;;  %v9628_v32 = vpop.xlane.xlu0 %5594 }
 0x820   : > { %v7271_v55 = vpop.eup %7270  ;;  %v5614_v45 = vsub.f32 %v9553_v41, %v9628_v32 }
 0x821   : > { %v9632_v27 = vpop.xlane.xlu1 %5596  ;;  %5668 = vadd.xlane.f32.xlu1 %v7271_v55  ;;  %v5770_v55 = vsub.f32 0.0, %v6447_v28 }
 0x822   : > { %v5642_v0 = vmul.f32 1.442695, %v5614_v45  ;;  %v5615_v37 = vsub.f32 %v9559_v26, %v9632_v27 }
 0x824   : > { %7276 = vpow2.f32 %v5642_v0  ;;  %v5644_v19 = vmul.f32 1.442695, %v5615_v37  ;;  %v5789_v0 = vmul.f32 1.442695, %v5769_v35  ;;  %v6448_v37 = vclamps-f32 %v9491_v39, 30.0 }
 0x826   : > { %v7273_v12 = vpop.eup %7272  ;;  %7278 = vpow2.f32 %v5644_v19 }
 0x827   : > { %5670 = vadd.xlane.f32.xlu0 %v7273_v12  ;;  %v9636_v1 = vpop.xlane.xlu0 %5598  ;;  %v5791_v12 = vmul.f32 1.442695, %v5770_v55 }
 0x828   : > { %v7275_v4 = vpop.eup %7274  ;;  %v5616_v61 = vsub.f32 %v9571_v36, %v9636_v1  ;;  %v6442_v36 = vclamps-f32 %v9437_v52, 30.0 }
 0x829   : > { %v9640_v40 = vpop.xlane.xlu1 %5600  ;;  %5672 = vadd.xlane.f32.xlu1 %v7275_v4  ;;  %v6449_v4 = vclamps-f32 %v9494_v11, 30.0 }
 0x82a   : > { %v5646_v41 = vmul.f32 1.442695, %v5616_v61  ;;  %v5617_v50 = vsub.f32 %v9577_v63, %v9640_v40  ;;  %v5765_v15 = vsub.f32 0.0, %v6442_v36  ;;  %v5766_v63 = vsub.f32 0.0, %v6443_v13 }
 0x82c   : > { %7280 = vpow2.f32 %v5646_v41  ;;  %v5648_v26 = vmul.f32 1.442695, %v5617_v50  ;;  %v5781_v60 = vmul.f32 1.442695, %v5765_v15  ;;  %v5783_v29 = vmul.f32 1.442695, %v5766_v63 }
 0x82d   : > { %v5771_v50 = vsub.f32 0.0, %v6448_v37  ;;  %v6451_v63 = vclamps-f32 %v9512_v59, 30.0  ;;  %v6452_v37 = vclamps-f32 %v9527_v38, 30.0 }
 0x82e   : > { %v7277_v34 = vpop.eup %7276  ;;  %7282 = vpow2.f32 %v5648_v26 }
 0x82f   : > { %5674 = vadd.xlane.f32.xlu0 %v7277_v34  ;;  %7284 = vpow2.f32 %v5781_v60  ;;  %v5793_v15 = vmul.f32 1.442695, %v5771_v50  ;;  %v5774_v28 = vsub.f32 0.0, %v6451_v63 }
 0x830   : > { %v7279_v58 = vpop.eup %7278  ;;  %7286 = vpow2.f32 %v5783_v29 }
 0x831   : > { %5676 = vadd.xlane.f32.xlu1 %v7279_v58  ;;  %7288 = vpow2.f32 %v5785_v54  ;;  %v5772_v58 = vsub.f32 0.0, %v6449_v4 }
 0x832   : > { %7290 = vpow2.f32 %v5787_v51 }
 0x833   : > { %v5795_v17 = vmul.f32 1.442695, %v5772_v58  ;;  %v6453_v58 = vclamps-f32 %v9530_v14, 30.0 }
 0x836   : > { %v7281_v18 = vpop.eup %7280 }
 0x837   : > { %5678 = vadd.xlane.f32.xlu0 %v7281_v18 }
 0x838   : > { %v7283_v10 = vpop.eup %7282 }
 0x839   : > { %5680 = vadd.xlane.f32.xlu1 %v7283_v10  ;;  %v7285_v16 = vpop.eup %7284  ;;  %v6450_v10 = vclamps-f32 %v9509_v43, 30.0 }
 0x83a   : > { %v5813_v19 = vadd.f32 1.0, %v7285_v16  ;;  %v7287_v41 = vpop.eup %7286 }
 0x83b   : > { %v7289_v26 = vpop.eup %7288  ;;  %v5814_v34 = vadd.f32 1.0, %v7287_v41  ;;  %v5773_v29 = vsub.f32 0.0, %v6450_v10 }
 0x83c   : > { %v7291_v36 = vpop.eup %7290  ;;  %v5815_v60 = vadd.f32 1.0, %v7289_v26 }
 0x83d   : > { %v5816_v20 = vadd.f32 1.0, %v7291_v36  ;;  %v5775_v36 = vsub.f32 0.0, %v6452_v37 }
 0x88c   : > { %v5651_v45 = vpop.xlane.xlu0 %5650 }
 0x88d   : > { %7292 = vlog2.f32 %v5651_v45 }
 0x890   : > { %v5653_v61 = vpop.xlane.xlu1 %5652 }
 0x891   : > { %7294 = vlog2.f32 %v5653_v61 }
 0x892   : > { %7296 = vpow2.f32 %v5789_v0 }
 0x893   : > { %7298 = vrcp.f32 %v5813_v19 }
 0x894   : > { %7300 = vpow2.f32 %v5791_v12  ;;  %v5655_v18 = vpop.xlane.xlu0 %5654 }
 0x895   : > { %7302 = vlog2.f32 %v5655_v18 }
 0x896   : > { %7304 = vrcp.f32 %v5814_v34  ;;  %v5799_v34 = vmul.f32 1.442695, %v5774_v28 }
 0x897   : > { %v7293_v13 = vpop.eup %7292 }
 0x898   : > { %v5683_v31 = vmul.f32 0.6931472, %v7293_v13  ;;  %v5657_v3 = vpop.xlane.xlu1 %5656 }
 0x899   : > { %7306 = vlog2.f32 %v5657_v3 }
 0x89a   : > { %7308 = vpow2.f32 %v5793_v15  ;;  %v5714_v54 = vadd.f32 %v5683_v31, %v9580_v42  ;;  %v5797_v42 = vmul.f32 1.442695, %v5773_v29  ;;  %v5776_v31 = vsub.f32 0.0, %v6453_v58 }
 0x89b   : > { %v7295_v21 = vpop.eup %7294  ;;  %7310 = vrcp.f32 %v5815_v60 }
 0x89c   : > { %v7297_v51 = vpop.eup %7296  ;;  %7312 = vpow2.f32 %v5795_v17  ;;  %v5845_v16 = vsub.f32 %v9437_v52, %v5714_v54  ;;  %v5685_v55 = vmul.f32 0.6931472, %v7295_v21  ;;  %v5659_v45 = vpop.xlane.xlu0 %5658  ;;  %v5801_v21 = vmul.f32 1.442695, %v5775_v36 }
 0x89d   : > { %v7299_v0 = vpop.eup %7298  ;;  %7314 = vlog2.f32 %v5659_v45  ;;  %v5817_v50 = vadd.f32 1.0, %v7297_v51  ;;  %v6454_v45 = vclamps-f32 %v9545_v44, 30.0  ;;  %v5803_v37 = vmul.f32 1.442695, %v5776_v31 }
 0x89e   : > { %v7301_v19 = vpop.eup %7300  ;;  %7316 = vrcp.f32 %v5816_v20  ;;  %v5861_v12 = vsel %vm5553_vm2, %v5845_v16, %v9437_v52  ;;  %v5715_v4 = vadd.f32 %v5685_v55, %v9584_v25  ;;  %v5661_v61 = vpop.xlane.xlu1 %5660  ;;  %v6456_v31 = vclamps-f32 %v9563_v48, 30.0 }
 0x89f   : > { %v7303_v41 = vpop.eup %7302  ;;  %v5877_v26 = vsel %vm9657_vm5, %v7299_v0, %v5861_v12  ;;  %7318 = vlog2.f32 %v5661_v61  ;;  %v5818_v15 = vadd.f32 1.0, %v7301_v19  ;;  %v6455_v19 = vclamps-f32 %v9548_v6, 30.0 }
 0x8a0   : > { %5893 = vst [vmem:[%s9667_s23] sm:$0xff] %v5877_v26  ;;  %v5846_v18 = vsub.f32 %v9440_v22, %v5715_v4  ;;  %v5687_v10 = vmul.f32 0.6931472, %v7303_v41  ;;  %7320 = vpow2.f32 %v5797_v42  ;;  %v7305_v52 = vpop.eup %7304 }
 0x8a1   : > { %7322 = vrcp.f32 %v5817_v50 }
 0x8a2   : > { %v5862_v25 = vsel %vm5553_vm2, %v5846_v18, %v9440_v22  ;;  %v5716_v13 = vadd.f32 %v5687_v10, %v9588_v33  ;;  %7324 = vpow2.f32 %v5799_v34  ;;  %v5777_v34 = vsub.f32 0.0, %v6454_v45 }
 0x8a3   : > { %v7307_v60 = vpop.eup %7306  ;;  %v5878_v17 = vsel %vm9657_vm5, %v7305_v52, %v5862_v25  ;;  %v5778_v18 = vsub.f32 0.0, %v6455_v19 }
 0x8a4   : > { %v7309_v63 = vpop.eup %7308  ;;  %5894 = vst [vmem:[%s9667_s23 + $0x8] sm:$0xff] %v5878_v17  ;;  %v5847_v3 = vsub.f32 %v9455_v23, %v5716_v13  ;;  %v5689_v29 = vmul.f32 0.6931472, %v7307_v60  ;;  %v5663_v20 = vpop.xlane.xlu0 %5662 }
 0x8a5   : > { %v7311_v54 = vpop.eup %7310  ;;  %7326 = vlog2.f32 %v5663_v20  ;;  %v5819_v55 = vadd.f32 1.0, %v7309_v63  ;;  %v5805_v63 = vmul.f32 1.442695, %v5777_v34  ;;  %v6457_v20 = vclamps-f32 %v9566_v2, 30.0 }
 0x8a6   : > { %v7313_v22 = vpop.eup %7312  ;;  %7328 = vrcp.f32 %v5818_v15  ;;  %v5863_v33 = vsel %vm5553_vm2, %v5847_v3, %v9455_v23  ;;  %v5717_v51 = vadd.f32 %v5689_v29, %v9592_v49  ;;  %v5665_v28 = vpop.xlane.xlu1 %5664  ;;  %v5807_v29 = vmul.f32 1.442695, %v5778_v18 }
 0x8a7   : > { %v7315_v16 = vpop.eup %7314  ;;  %v5879_v0 = vsel %vm9657_vm5, %v7311_v54, %v5863_v33  ;;  %7330 = vlog2.f32 %v5665_v28  ;;  %v5820_v49 = vadd.f32 1.0, %v7313_v22  ;;  %v5780_v45 = vsub.f32 0.0, %v6457_v20 }
 0x8a8   : > { %v7317_v42 = vpop.eup %7316  ;;  %5895 = vst [vmem:[%s9667_s23 + $0x10] sm:$0xff] %v5879_v0  ;;  %v5848_v12 = vsub.f32 %v9458_v8, %v5717_v51  ;;  %v5691_v23 = vmul.f32 0.6931472, %v7315_v16  ;;  %7332 = vpow2.f32 %v5801_v21 }
 0x8a9   : > { %v7319_v4 = vpop.eup %7318  ;;  %7334 = vrcp.f32 %v5819_v55  ;;  %v5779_v55 = vsub.f32 0.0, %v6456_v31 }
 0x8aa   : > { %v5864_v61 = vsel %vm5553_vm2, %v5848_v12, %v9458_v8  ;;  %v5718_v41 = vadd.f32 %v5691_v23, %v9596_v56  ;;  %v5693_v50 = vmul.f32 0.6931472, %v7319_v4  ;;  %v7321_v26 = vpop.eup %7320  ;;  %7336 = vpow2.f32 %v5803_v37 }
 0x8ab   : > { %v5880_v58 = vsel %vm9657_vm5, %v7317_v42, %v5864_v61  ;;  %v7323_v15 = vpop.eup %7322  ;;  %v5821_v56 = vadd.f32 1.0, %v7321_v26  ;;  %v5809_v61 = vmul.f32 1.442695, %v5779_v55 }
 0x8ac   : > { %5896 = vst [vmem:[%s9667_s23 + $0x18] sm:$0xff] %v5880_v58  ;;  %v5849_v10 = vsub.f32 %v9473_v7, %v5718_v41  ;;  %v5719_v36 = vadd.f32 %v5693_v50, %v9600_v24  ;;  %v5667_v52 = vpop.xlane.xlu0 %5666  ;;  %v7325_v8 = vpop.eup %7324  ;;  %v5811_v50 = vmul.f32 1.442695, %v5780_v45 }
 0x8ad   : > { %7338 = vlog2.f32 %v5667_v52  ;;  %v5822_v33 = vadd.f32 1.0, %v7325_v8 }
 0x8ae   : > { %7340 = vrcp.f32 %v5820_v49  ;;  %v5865_v25 = vsel %vm5553_vm2, %v5849_v10, %v9473_v7  ;;  %v5850_v13 = vsub.f32 %v9476_v62, %v5719_v36  ;;  %v5669_v60 = vpop.xlane.xlu1 %5668 }
 0x8af   : > { %v7327_v17 = vpop.eup %7326  ;;  %v5881_v24 = vsel %vm9657_vm5, %v7323_v15, %v5865_v25  ;;  %7342 = vlog2.f32 %v5669_v60 }
 0x8b0   : > { %v7329_v3 = vpop.eup %7328  ;;  %5897 = vst [vmem:[%s9667_s23 + $0x20] sm:$0xff] %v5881_v24  ;;  %v5866_v7 = vsel %vm5553_vm2, %v5850_v13, %v9476_v62  ;;  %v5695_v54 = vmul.f32 0.6931472, %v7327_v17  ;;  %7344 = vrcp.f32 %v5821_v56 }
 0x8b1   : > { %v7331_v21 = vpop.eup %7330  ;;  %v5882_v22 = vsel %vm9657_vm5, %v7329_v3, %v5866_v7  ;;  %7346 = vpow2.f32 %v5805_v63 }
 0x8b2   : > { %5898 = vst [vmem:[%s9667_s23 + $0x28] sm:$0xff] %v5882_v22  ;;  %v5720_v51 = vadd.f32 %v5695_v54, %v9604_v57  ;;  %v5697_v28 = vmul.f32 0.6931472, %v7331_v21  ;;  %v7333_v16 = vpop.eup %7332  ;;  %7348 = vpow2.f32 %v5807_v29 }
 0x8b3   : > { %v7335_v37 = vpop.eup %7334  ;;  %v5823_v12 = vadd.f32 1.0, %v7333_v16 }
 0x8b4   : > { %v5851_v0 = vsub.f32 %v9491_v39, %v5720_v51  ;;  %v5721_v62 = vadd.f32 %v5697_v28, %v9608_v30  ;;  %v5671_v42 = vpop.xlane.xlu0 %5670  ;;  %v7337_v19 = vpop.eup %7336 }
 0x8b5   : > { %7350 = vlog2.f32 %v5671_v42  ;;  %v5824_v18 = vadd.f32 1.0, %v7337_v19 }
 0x8b6   : > { %7352 = vrcp.f32 %v5822_v33  ;;  %v5867_v57 = vsel %vm5553_vm2, %v5851_v0, %v9491_v39  ;;  %v5852_v23 = vsub.f32 %v9494_v11, %v5721_v62  ;;  %v5673_v4 = vpop.xlane.xlu1 %5672 }
 0x8b7   : > { %v7339_v49 = vpop.eup %7338  ;;  %v5883_v30 = vsel %vm9657_vm5, %v7335_v37, %v5867_v57  ;;  %7354 = vlog2.f32 %v5673_v4 }
 0x8b8   : > { %v7341_v41 = vpop.eup %7340  ;;  %5899 = vst [vmem:[%s9667_s23 + $0x30] sm:$0xff] %v5883_v30  ;;  %v5868_v26 = vsel %vm5553_vm2, %v5852_v23, %v9494_v11  ;;  %v5699_v34 = vmul.f32 0.6931472, %v7339_v49  ;;  %7356 = vrcp.f32 %v5823_v12 }
 0x8b9   : > { %v7343_v58 = vpop.eup %7342  ;;  %v5884_v39 = vsel %vm9657_vm5, %v7341_v41, %v5868_v26  ;;  %7358 = vpow2.f32 %v5809_v61 }
 0x8ba   : > { %5900 = vst [vmem:[%s9667_s23 + $0x38] sm:$0xff] %v5884_v39  ;;  %v5722_v10 = vadd.f32 %v5699_v34, %v9612_v46  ;;  %v5701_v36 = vmul.f32 0.6931472, %v7343_v58  ;;  %v7345_v52 = vpop.eup %7344  ;;  %7360 = vpow2.f32 %v5811_v50 }
 0x8bb   : > { %v7347_v56 = vpop.eup %7346 }
 0x8bc   : > { %v5853_v15 = vsub.f32 %v9509_v43, %v5722_v10  ;;  %v5723_v8 = vadd.f32 %v5701_v36, %v9616_v53  ;;  %v5675_v11 = vpop.xlane.xlu0 %5674  ;;  %v7349_v25 = vpop.eup %7348  ;;  %v5825_v53 = vadd.f32 1.0, %v7347_v56 }
 0x8bd   : > { %7362 = vlog2.f32 %v5675_v11  ;;  %v5826_v20 = vadd.f32 1.0, %v7349_v25 }
 0x8be   : > { %7364 = vrcp.f32 %v5824_v18  ;;  %v5869_v13 = vsel %vm5553_vm2, %v5853_v15, %v9509_v43  ;;  %v5854_v46 = vsub.f32 %v9512_v59, %v5723_v8  ;;  %v5677_v60 = vpop.xlane.xlu1 %5676 }
 0x8bf   : > { %v7351_v17 = vpop.eup %7350  ;;  %v5885_v63 = vsel %vm9657_vm5, %v7345_v52, %v5869_v13  ;;  %7366 = vlog2.f32 %v5677_v60 }
 0x8c0   : > { %v7353_v31 = vpop.eup %7352  ;;  %5901 = vst [vmem:[%s9667_s23 + $0x40] sm:$0xff] %v5885_v63  ;;  %v5870_v24 = vsel %vm5553_vm2, %v5854_v46, %v9512_v59  ;;  %v5703_v3 = vmul.f32 0.6931472, %v7351_v17  ;;  %7368 = vrcp.f32 %v5825_v53 }
 0x8c1   : > { %v7355_v29 = vpop.eup %7354  ;;  %v5886_v43 = vsel %vm9657_vm5, %v7353_v31, %v5870_v24 }
 0x8c2   : > { %5902 = vst [vmem:[%s9667_s23 + $0x48] sm:$0xff] %v5886_v43  ;;  %v5724_v7 = vadd.f32 %v5703_v3, %v9620_v9  ;;  %v5705_v54 = vmul.f32 0.6931472, %v7355_v29  ;;  %v7357_v21 = vpop.eup %7356 }
 0x8c3   : > { %v7359_v28 = vpop.eup %7358 }
 0x8c4   : > { %v5855_v22 = vsub.f32 %v9527_v38, %v5724_v7  ;;  %v5725_v33 = vadd.f32 %v5705_v54, %v9624_v47  ;;  %v5679_v51 = vpop.xlane.xlu0 %5678  ;;  %v7361_v59 = vpop.eup %7360  ;;  %v5827_v47 = vadd.f32 1.0, %v7359_v28 }
 0x8c5   : > { %7370 = vlog2.f32 %v5679_v51  ;;  %v5828_v12 = vadd.f32 1.0, %v7361_v59 }
 0x8c6   : > { %7372 = vrcp.f32 %v5826_v20  ;;  %v5871_v16 = vsel %vm5553_vm2, %v5855_v22, %v9527_v38  ;;  %v5856_v9 = vsub.f32 %v9530_v14, %v5725_v33  ;;  %v5681_v55 = vpop.xlane.xlu1 %5680 }
 0x8c7   : > { %v7363_v45 = vpop.eup %7362  ;;  %v5887_v0 = vsel %vm9657_vm5, %v7357_v21, %v5871_v16  ;;  %7374 = vlog2.f32 %v5681_v55 }
 0x8c8   : > { %v7365_v62 = vpop.eup %7364  ;;  %5903 = vst [vmem:[%s9667_s23 + $0x50] sm:$0xff] %v5887_v0  ;;  %v5872_v42 = vsel %vm5553_vm2, %v5856_v9, %v9530_v14  ;;  %v5707_v37 = vmul.f32 0.6931472, %v7363_v45  ;;  %7376 = vrcp.f32 %v5827_v47 }
 0x8c9   : > { %v7367_v19 = vpop.eup %7366  ;;  %v5888_v38 = vsel %vm9657_vm5, %v7365_v62, %v5872_v42  ;;  %7378 = vrcp.f32 %v5828_v12 }
 0x8ca   : > { %5904 = vst [vmem:[%s9667_s23 + $0x58] sm:$0xff] %v5888_v38  ;;  %v5726_v57 = vadd.f32 %v5707_v37, %v9628_v32  ;;  %v5709_v23 = vmul.f32 0.6931472, %v7367_v19  ;;  %v7369_v61 = vpop.eup %7368 }
 0x8cc   : > { %v5857_v4 = vsub.f32 %v9545_v44, %v5726_v57  ;;  %v5727_v49 = vadd.f32 %v5709_v23, %v9632_v27 }
 0x8ce   : > { %v5873_v14 = vsel %vm5553_vm2, %v5857_v4, %v9545_v44  ;;  %v5858_v30 = vsub.f32 %v9548_v6, %v5727_v49 }
 0x8cf   : > { %v7371_v41 = vpop.eup %7370  ;;  %v5889_v50 = vsel %vm9657_vm5, %v7369_v61, %v5873_v14 }
 0x8d0   : > { %v7373_v32 = vpop.eup %7372  ;;  %5905 = vst [vmem:[%s9667_s23 + $0x60] sm:$0xff] %v5889_v50  ;;  %v5874_v26 = vsel %vm5553_vm2, %v5858_v30, %v9548_v6  ;;  %v5711_v27 = vmul.f32 0.6931472, %v7371_v41 }
 0x8d1   : > { %v7375_v34 = vpop.eup %7374  ;;  %v5890_v58 = vsel %vm9657_vm5, %v7373_v32, %v5874_v26 }
 0x8d2   : > { %5906 = vst [vmem:[%s9667_s23 + $0x68] sm:$0xff] %v5890_v58  ;;  %v5728_v44 = vadd.f32 %v5711_v27, %v9636_v1  ;;  %v5713_v39 = vmul.f32 0.6931472, %v7375_v34  ;;  %v7377_v36 = vpop.eup %7376 }
 0x8d3   : > { %v7379_v8 = vpop.eup %7378 }
 0x8d4   : > { %v5859_v18 = vsub.f32 %v9563_v48, %v5728_v44  ;;  %v5729_v10 = vadd.f32 %v5713_v39, %v9640_v40 }
 0x8d6   : > { %v5875_v52 = vsel %vm5553_vm2, %v5859_v18, %v9563_v48  ;;  %v5860_v6 = vsub.f32 %v9566_v2, %v5729_v10 }
 0x8d7   : > { %v5891_v15 = vsel %vm9657_vm5, %v7377_v36, %v5875_v52 }
 0x8d8   : > { %5907 = vst [vmem:[%s9667_s23 + $0x70] sm:$0xff] %v5891_v15  ;;  %v5876_v1 = vsel %vm5553_vm2, %v5860_v6, %v9566_v2 }
 0x8d9   : > { %v5892_v11 = vsel %vm9657_vm5, %v7379_v8, %v5876_v1 }
 0x8da   : > { %5908 = vst [vmem:[%s9667_s23 + $0x78] sm:$0xff] %v5892_v11 }
 0x8db PF: > { %s28_s29 = sadd.s32 1, %s7402_s29   ;;  %s9837_s27 = smov %s7398_s28 }
 0x8dc   : > { %p25_p5 = scmp.ge.s32.totalorder %s28_s29, 4   ;;  %s9838_s28 = smov %s9840_s30 }
 0x8de   :  { %27 = sbr.rel (!%p25_p5) target bundleno = 4 (0x4), region = 125 }

</bundles_post_ra>
